<compile_context>
chip_gen: v6e
topology: v6e:2x2x1
jax: 0.10.0
libtpu: 0.0.40
codegen_flags: <defaults>
</compile_context>

<pallas_src>
import functools

import jax
import jax.numpy as jnp
from jax.experimental import pallas as pl
from jax.experimental.pallas import tpu as pltpu

EPS = 1e-5
K = 5                           # conv kernel size
C1, C2 = 8, 16                  # conv output channels
IMG = 16                        # input spatial size (H = W)
CO1 = IMG - K + 1               # 12 : conv1 output spatial
P1 = CO1 // 2                   # 6  : pooled conv1 spatial
CO2 = P1 - K + 1                # 2  : conv2 output spatial (pooled to 1x1)
FC1_DIM, FC2_DIM, FC3_DIM = 256, 64, 10
IMGS_PER_ROW = FC1_DIM // C2    # 16 images packed into one view(-1, 256) row


# ----------------------------- fused Pallas kernel ---------------------------------- #

def fused_net_kernel(x_ref, w1b_ref, w2_ref, wf1_ref, wf2_ref, wf3_ref, sp_ref,
                     o_ref, *, n_img):
    """Entire Net forward in one grid-less invocation on VMEM-resident data.

    x_ref  : (IMG*N, IMG) pixels, rows (h, image)-major; images pre-permuted to
             (n % 16, n // 16) order so the view(-1,256) regroup is contiguous.
    w1b_ref: (K*IMG, CO1*C1) banded conv1 weights -> one lane-dense matmul.
    w2_ref : (K*K*C1, C2) conv2 weights, feature order (ki, kj, cin).
    wf*_ref: FC weights pre-transposed to (in, out).
    sp_ref : (16, 256) packed small per-channel params (biases / BN affine).
    """
    n = n_img
    b2 = o_ref.shape[0]                      # = N // 16 rows after view(-1, 256)

    sp = sp_ref[...]
    b1t  = sp[0:1, 0:CO1 * C1]               # conv1 bias, tiled over the 12 ow's
    g2d  = sp[1:2, 0:P1 * C1]                # BN2d gamma, tiled over the 6 pw's
    be2d = sp[2:3, 0:P1 * C1]                # BN2d beta,  tiled over the 6 pw's
    bc2  = sp[3:4, 0:C2]
    g1d  = sp[4:5, :]
    be1d = sp[5:6, :]
    bf1  = sp[6:7, :]
    bf2  = sp[7:8, 0:FC2_DIM]
    bf3  = sp[8:9, 0:FC3_DIM]

    # ---- conv1 + bias + relu : ONE banded matmul --------------------------------
    # x5[(oh, m), ki*16 + w] = x[m, oh+ki, w] -> contraction depth 80, 96 out lanes
    x5 = jnp.concatenate(
        [x_ref[ki * n:(ki + CO1) * n, :] for ki in range(K)], axis=1)    # (12N, 80)
    y1 = jnp.dot(x5, w1b_ref[...], preferred_element_type=jnp.float32)   # (12N, 96)
    y1 = jnp.maximum(y1 + b1t, 0.0)          # rows (oh, m), cols (ow, c)

    # ---- 2x2 max-pool: oh pairs in rows, ow pairs in lanes ----------------------
    pr = jnp.concatenate(
        [jnp.maximum(y1[(2 * ph) * n:(2 * ph + 1) * n, :],
                     y1[(2 * ph + 1) * n:(2 * ph + 2) * n, :])
         for ph in range(P1)], axis=0)                                   # (6N, 96)
    z = jnp.concatenate(
        [jnp.maximum(pr[:, (2 * pw) * C1:(2 * pw + 1) * C1],
                     pr[:, (2 * pw + 1) * C1:(2 * pw + 2) * C1])
         for pw in range(P1)], axis=1)                                   # (6N, 48)

    # ---- BatchNorm2d(8): training-mode batch stats, two-pass variance -----------
    cnt = float(P1 * P1 * n)                 # N * 6 * 6 elements per channel
    cs = jnp.sum(z, axis=0, keepdims=True)                               # (1, 48)
    s1 = cs[:, 0:C1]
    for pw in range(1, P1):
        s1 = s1 + cs[:, pw * C1:(pw + 1) * C1]
    mu_c = s1 * (1.0 / cnt)                                              # (1, 8)
    d = z - jnp.concatenate([mu_c] * P1, axis=1)
    cq = jnp.sum(d * d, axis=0, keepdims=True)
    s2 = cq[:, 0:C1]
    for pw in range(1, P1):
        s2 = s2 + cq[:, pw * C1:(pw + 1) * C1]
    inv_c = jax.lax.rsqrt(s2 * (1.0 / cnt) + EPS)                        # (1, 8)
    z = d * jnp.concatenate([inv_c] * P1, axis=1) * g2d + be2d           # (6N, 48)

    # ---- conv2 + bias + relu + pool : ONE lane-dense (4N,200)x(200,16) matmul ---
    # z rows are (ph, image), cols are (pw, cin), so every (output position, ki)
    # patch slice is a contiguous block of z -- no gathers.
    blocks = []
    for oh in range(CO2):
        for ow in range(CO2):
            blocks.append(jnp.concatenate(
                [z[(oh + ki) * n:(oh + ki + 1) * n, ow * C1:(ow + K) * C1]
                 for ki in range(K)], axis=1))                           # (N, 200)
    p2 = jnp.concatenate(blocks, axis=0)                                 # (4N, 200)
    y2 = jnp.dot(p2, w2_ref[...], preferred_element_type=jnp.float32) + bc2
    y2 = jnp.maximum(y2, 0.0)                                            # (4N, 16)
    h2 = jnp.maximum(jnp.maximum(y2[0:n], y2[n:2 * n]),
                     jnp.maximum(y2[2 * n:3 * n], y2[3 * n:4 * n]))      # (N, 16)

    # ---- torch view(-1, 256): 16 contiguous row blocks -> 256 lanes -------------
    flat = jnp.concatenate(
        [h2[j * b2:(j + 1) * b2, :] for j in range(IMGS_PER_ROW)], axis=1)  # (B2, 256)

    # ---- BatchNorm1d(256): stats over only the B2 view rows (torch quirk) -------
    mu = jnp.mean(flat, axis=0, keepdims=True)
    df = flat - mu
    var = jnp.mean(df * df, axis=0, keepdims=True)
    flat = df * jax.lax.rsqrt(var + EPS) * g1d + be1d

    # ---- fc1 + relu, fc2 + relu, fc3, exact softmax ------------------------------
    a1 = jnp.maximum(
        jnp.dot(flat, wf1_ref[...], preferred_element_type=jnp.float32) + bf1, 0.0)
    a2 = jnp.maximum(
        jnp.dot(a1, wf2_ref[...], preferred_element_type=jnp.float32) + bf2, 0.0)
    zl = jnp.dot(a2, wf3_ref[...], preferred_element_type=jnp.float32) + bf3
    zl = zl - jnp.max(zl, axis=1, keepdims=True)
    e = jnp.exp(zl)
    o_ref[...] = e / jnp.sum(e, axis=1, keepdims=True)        # exact divide


# --------------------------------- JAX glue ------------------------------------------ #

def net_forward(x_nchw, params):
    n, c, h, w = x_nchw.shape
    assert c == 1 and h == IMG and w == IMG
    assert n % IMGS_PER_ROW == 0, "torch view(-1, 256) requires batch % 16 == 0"
    b2 = n // IMGS_PER_ROW

    # Permute images to (j = n % 16, b = n // 16) order so the in-kernel
    # view(-1,256) regroup reads contiguous row blocks, then lay pixels out
    # (h, image)-major with w in lanes (the layout the in-kernel im2col slices).
    x = x_nchw.astype(jnp.float32).reshape(b2, IMGS_PER_ROW, h, w)
    x = jnp.transpose(x, (1, 0, 2, 3)).reshape(n, h, w)
    x_in = jnp.transpose(x, (1, 0, 2)).reshape(h * n, w)                 # (H*N, W)

    kernel = functools.partial(fused_net_kernel, n_img=n)
    args = (x_in, params["w1b"], params["w2p"], params["wf1"], params["wf2"],
            params["wf3"], params["small"])

    # Grid-less single-core call: at N=32 (~4 MFLOP) a grid is pure overhead.
    # For large N, add a leading "parallel" image-block axis (shards across
    # v7x's 2 TensorCores) and carry the BN statistics as partial sums.
    return pl.pallas_call(
        kernel,
        out_shape=jax.ShapeDtypeStruct((b2, FC3_DIM), jnp.float32),
        in_specs=[pl.BlockSpec(memory_space=pltpu.MemorySpace.VMEM)] * len(args),
        out_specs=pl.BlockSpec(memory_space=pltpu.MemorySpace.VMEM),
    )(*args)


def init_raw_params(key):
    """Torch default init, in torch layouts (used by the pure-JAX reference)."""
    ks = jax.random.split(key, 10)

    def u(k, shape, fan_in):
        bound = 1.0 / (fan_in ** 0.5)
        return jax.random.uniform(k, shape, jnp.float32, -bound, bound)

    return dict(
        w_conv1=u(ks[0], (C1, 1, K, K), 1 * K * K), b_conv1=u(ks[5], (C1,), 1 * K * K),
        w_conv2=u(ks[1], (C2, C1, K, K), C1 * K * K), b_conv2=u(ks[6], (C2,), C1 * K * K),
        g_bn2d=jnp.ones((C1,), jnp.float32), b_bn2d=jnp.zeros((C1,), jnp.float32),
        g_bn1d=jnp.ones((FC1_DIM,), jnp.float32), b_bn1d=jnp.zeros((FC1_DIM,), jnp.float32),
        w_fc1=u(ks[2], (FC1_DIM, FC1_DIM), FC1_DIM), b_fc1=u(ks[7], (FC1_DIM,), FC1_DIM),
        w_fc2=u(ks[3], (FC2_DIM, FC1_DIM), FC1_DIM), b_fc2=u(ks[8], (FC2_DIM,), FC1_DIM),
        w_fc3=u(ks[4], (FC3_DIM, FC2_DIM), FC2_DIM), b_fc3=u(ks[9], (FC3_DIM,), FC2_DIM),
    )


def pack_params(p):
    """Pre-pack weights into matmul layout + one (16,256) slab for small params."""
    # conv1 -> banded (K*IMG, CO1*C1) matrix: w1b[ki, w_in, ow, c] = w1[c,0,ki,w_in-ow]
    w1 = p["w_conv1"]
    w1b = jnp.zeros((K, IMG, CO1, C1), jnp.float32)
    ow = jnp.arange(CO1)
    for ki in range(K):
        for kj in range(K):
            w1b = w1b.at[ki, ow + kj, ow, :].set(
                jnp.broadcast_to(w1[:, 0, ki, kj], (CO1, C1)))
    w1b = w1b.reshape(K * IMG, CO1 * C1)

    # conv2 -> (K*K*C1, C2), feature order (ki, kj, cin)
    w2p = jnp.transpose(p["w_conv2"], (2, 3, 1, 0)).reshape(K * K * C1, C2)

    small = jnp.zeros((16, FC1_DIM), jnp.float32)
    small = small.at[0, 0:CO1 * C1].set(jnp.tile(p["b_conv1"], CO1))
    small = small.at[1, 0:P1 * C1].set(jnp.tile(p["g_bn2d"], P1))
    small = small.at[2, 0:P1 * C1].set(jnp.tile(p["b_bn2d"], P1))
    small = small.at[3, 0:C2].set(p["b_conv2"])
    small = small.at[4, :].set(p["g_bn1d"])
    small = small.at[5, :].set(p["b_bn1d"])
    small = small.at[6, :].set(p["b_fc1"])
    small = small.at[7, 0:FC2_DIM].set(p["b_fc2"])
    small = small.at[8, 0:FC3_DIM].set(p["b_fc3"])

    return dict(w1b=w1b, w2p=w2p, wf1=p["w_fc1"].T, wf2=p["w_fc2"].T,
                wf3=p["w_fc3"].T, small=small)


@jax.jit
def reference_forward(x_nchw, p):
    """Pure-JAX re-implementation of the torch forward (training-mode BN)."""
    x = x_nchw.astype(jnp.float32)

    def conv(x, w, b):
        n, cin, hh, ww = x.shape
        cout, _, k, _ = w.shape
        ho, wo = hh - k + 1, ww - k + 1
        y = jnp.zeros((n, cout, ho, wo), jnp.float32)
        for ki in range(k):
            for kj in range(k):
                y = y + jnp.einsum('nchw,oc->nohw',
                                   x[:, :, ki:ki + ho, kj:kj + wo], w[:, :, ki, kj])
        return y + b[None, :, None, None]

    def pool(x):
        n, ch, hh, ww = x.shape
        return x.reshape(n, ch, hh // 2, 2, ww // 2, 2).max(axis=(3, 5))

    def bn2d(x, g, b):
        mu = x.mean(axis=(0, 2, 3), keepdims=True)
        var = ((x - mu) ** 2).mean(axis=(0, 2, 3), keepdims=True)
        return ((x - mu) * jax.lax.rsqrt(var + EPS) * g[None, :, None, None]
                + b[None, :, None, None])

    def bn1d(x, g, b):
        mu = x.mean(axis=0, keepdims=True)
        var = ((x - mu) ** 2).mean(axis=0, keepdims=True)
        return (x - mu) * jax.lax.rsqrt(var + EPS) * g[None, :] + b[None, :]

    h1 = bn2d(pool(jax.nn.relu(conv(x, p["w_conv1"], p["b_conv1"]))),
              p["g_bn2d"], p["b_bn2d"])
    h2 = pool(jax.nn.relu(conv(h1, p["w_conv2"], p["b_conv2"])))
    flat = h2.reshape(-1, FC1_DIM)                        # torch view(-1, 16*4*4)
    flat = bn1d(flat, p["g_bn1d"], p["b_bn1d"])
    a1 = jax.nn.relu(flat @ p["w_fc1"].T + p["b_fc1"])
    a2 = jax.nn.relu(a1 @ p["w_fc2"].T + p["b_fc2"])
    zl = a2 @ p["w_fc3"].T + p["b_fc3"]
    return jax.nn.softmax(zl, axis=1)


if __name__ == "__main__":
    key = jax.random.PRNGKey(0)
    kx, kp = jax.random.split(key)
    # N must be a multiple of 16 for the module's view(-1, 256) to be valid.
    N = 32
    x = jax.random.uniform(kx, (N, 1, IMG, IMG), dtype=jnp.float32)

    raw = init_raw_params(kp)
    packed = pack_params(raw)

    out = jax.jit(net_forward)(x, packed)
    out = jax.block_until_ready(out)

    assert out.shape == (N // IMGS_PER_ROW, FC3_DIM), out.shape
    assert bool(jnp.all(jnp.isfinite(out)))
    # exact softmax divide -> rows sum to 1
    assert bool(jnp.allclose(jnp.sum(out, axis=1), 1.0, atol=1e-3))
    # parity with the pure-JAX reference of the torch forward
    ref = reference_forward(x, raw)
    assert bool(jnp.allclose(out, ref, atol=2e-3)), float(jnp.max(jnp.abs(out - ref)))
    print("KERNEL_OK")
</pallas_src>

<mosaic_0001>
module attributes {stable_mosaic.version = 11 : i64} {
  func.func @fused_net_kernel(%arg0: memref<512x16xf32, #tpu.memory_space<vmem>>, %arg1: memref<80x96xf32, #tpu.memory_space<vmem>>, %arg2: memref<200x16xf32, #tpu.memory_space<vmem>>, %arg3: memref<256x256xf32, #tpu.memory_space<vmem>>, %arg4: memref<256x64xf32, #tpu.memory_space<vmem>>, %arg5: memref<64x10xf32, #tpu.memory_space<vmem>>, %arg6: memref<16x256xf32, #tpu.memory_space<vmem>>, %arg7: memref<2x10xf32, #tpu.memory_space<vmem>>) attributes {dimension_semantics = [], scalar_prefetch = 0 : i64, scratch_operands = 0 : i64, tpu.core_type = #tpu.core_type<tc>} {
    %c0 = arith.constant 0 : index
    %c0_0 = arith.constant 0 : index
    %0 = vector.load %arg6[%c0, %c0_0] : memref<16x256xf32, #tpu.memory_space<vmem>>, vector<16x256xf32>
    %1 = vector.extract_strided_slice %0 {offsets = [0, 0], sizes = [1, 96], strides = [1, 1]} : vector<16x256xf32> to vector<1x96xf32>
    %2 = vector.extract_strided_slice %0 {offsets = [1, 0], sizes = [1, 48], strides = [1, 1]} : vector<16x256xf32> to vector<1x48xf32>
    %3 = vector.extract_strided_slice %0 {offsets = [2, 0], sizes = [1, 48], strides = [1, 1]} : vector<16x256xf32> to vector<1x48xf32>
    %4 = vector.extract_strided_slice %0 {offsets = [3, 0], sizes = [1, 16], strides = [1, 1]} : vector<16x256xf32> to vector<1x16xf32>
    %5 = vector.extract_strided_slice %0 {offsets = [4, 0], sizes = [1, 256], strides = [1, 1]} : vector<16x256xf32> to vector<1x256xf32>
    %6 = vector.extract_strided_slice %0 {offsets = [5, 0], sizes = [1, 256], strides = [1, 1]} : vector<16x256xf32> to vector<1x256xf32>
    %7 = vector.extract_strided_slice %0 {offsets = [6, 0], sizes = [1, 256], strides = [1, 1]} : vector<16x256xf32> to vector<1x256xf32>
    %8 = vector.extract_strided_slice %0 {offsets = [7, 0], sizes = [1, 64], strides = [1, 1]} : vector<16x256xf32> to vector<1x64xf32>
    %9 = vector.extract_strided_slice %0 {offsets = [8, 0], sizes = [1, 10], strides = [1, 1]} : vector<16x256xf32> to vector<1x10xf32>
    %c0_1 = arith.constant 0 : index
    %c0_2 = arith.constant 0 : index
    %10 = vector.load %arg0[%c0_1, %c0_2] : memref<512x16xf32, #tpu.memory_space<vmem>>, vector<384x16xf32>
    %c32 = arith.constant 32 : index
    %c0_3 = arith.constant 0 : index
    %11 = vector.load %arg0[%c32, %c0_3] : memref<512x16xf32, #tpu.memory_space<vmem>>, vector<384x16xf32>
    %c64 = arith.constant 64 : index
    %c0_4 = arith.constant 0 : index
    %12 = vector.load %arg0[%c64, %c0_4] : memref<512x16xf32, #tpu.memory_space<vmem>>, vector<384x16xf32>
    %c96 = arith.constant 96 : index
    %c0_5 = arith.constant 0 : index
    %13 = vector.load %arg0[%c96, %c0_5] : memref<512x16xf32, #tpu.memory_space<vmem>>, vector<384x16xf32>
    %c128 = arith.constant 128 : index
    %c0_6 = arith.constant 0 : index
    %14 = vector.load %arg0[%c128, %c0_6] : memref<512x16xf32, #tpu.memory_space<vmem>>, vector<384x16xf32>
    %15 = tpu.concatenate %10, %11, %12, %13, %14 in 1 : vector<384x16xf32>, vector<384x16xf32>, vector<384x16xf32>, vector<384x16xf32>, vector<384x16xf32> -> vector<384x80xf32>
    %c0_7 = arith.constant 0 : index
    %c0_8 = arith.constant 0 : index
    %16 = vector.load %arg1[%c0_7, %c0_8] : memref<80x96xf32, #tpu.memory_space<vmem>>, vector<80x96xf32>
    %cst = arith.constant dense<0.000000e+00> : vector<384x96xf32>
    %17 = tpu.matmul %15, %16, %cst {dimension_numbers = #tpu.dot_dimension_numbers<[1], [0], [0], [1], [0, 0, 1, 1], [], []>} : vector<384x80xf32>, vector<80x96xf32>, vector<384x96xf32> -> vector<384x96xf32>
    %18 = vector.broadcast %1 : vector<1x96xf32> to vector<384x96xf32>
    %19 = arith.addf %17, %18 : vector<384x96xf32>
    %cst_9 = arith.constant 0.000000e+00 : f32
    %20 = vector.broadcast %cst_9 : f32 to vector<384x96xf32>
    %21 = arith.maximumf %19, %20 : vector<384x96xf32>
    %22 = vector.extract_strided_slice %21 {offsets = [0, 0], sizes = [32, 96], strides = [1, 1]} : vector<384x96xf32> to vector<32x96xf32>
    %23 = vector.extract_strided_slice %21 {offsets = [32, 0], sizes = [32, 96], strides = [1, 1]} : vector<384x96xf32> to vector<32x96xf32>
    %24 = arith.maximumf %22, %23 : vector<32x96xf32>
    %25 = vector.extract_strided_slice %21 {offsets = [64, 0], sizes = [32, 96], strides = [1, 1]} : vector<384x96xf32> to vector<32x96xf32>
    %26 = vector.extract_strided_slice %21 {offsets = [96, 0], sizes = [32, 96], strides = [1, 1]} : vector<384x96xf32> to vector<32x96xf32>
    %27 = arith.maximumf %25, %26 : vector<32x96xf32>
    %28 = vector.extract_strided_slice %21 {offsets = [128, 0], sizes = [32, 96], strides = [1, 1]} : vector<384x96xf32> to vector<32x96xf32>
    %29 = vector.extract_strided_slice %21 {offsets = [160, 0], sizes = [32, 96], strides = [1, 1]} : vector<384x96xf32> to vector<32x96xf32>
    %30 = arith.maximumf %28, %29 : vector<32x96xf32>
    %31 = vector.extract_strided_slice %21 {offsets = [192, 0], sizes = [32, 96], strides = [1, 1]} : vector<384x96xf32> to vector<32x96xf32>
    %32 = vector.extract_strided_slice %21 {offsets = [224, 0], sizes = [32, 96], strides = [1, 1]} : vector<384x96xf32> to vector<32x96xf32>
    %33 = arith.maximumf %31, %32 : vector<32x96xf32>
    %34 = vector.extract_strided_slice %21 {offsets = [256, 0], sizes = [32, 96], strides = [1, 1]} : vector<384x96xf32> to vector<32x96xf32>
    %35 = vector.extract_strided_slice %21 {offsets = [288, 0], sizes = [32, 96], strides = [1, 1]} : vector<384x96xf32> to vector<32x96xf32>
    %36 = arith.maximumf %34, %35 : vector<32x96xf32>
    %37 = vector.extract_strided_slice %21 {offsets = [320, 0], sizes = [32, 96], strides = [1, 1]} : vector<384x96xf32> to vector<32x96xf32>
    %38 = vector.extract_strided_slice %21 {offsets = [352, 0], sizes = [32, 96], strides = [1, 1]} : vector<384x96xf32> to vector<32x96xf32>
    %39 = arith.maximumf %37, %38 : vector<32x96xf32>
    %40 = tpu.concatenate %24, %27, %30, %33, %36, %39 in 0 : vector<32x96xf32>, vector<32x96xf32>, vector<32x96xf32>, vector<32x96xf32>, vector<32x96xf32>, vector<32x96xf32> -> vector<192x96xf32>
    %41 = vector.extract_strided_slice %40 {offsets = [0, 0], sizes = [192, 8], strides = [1, 1]} : vector<192x96xf32> to vector<192x8xf32>
    %42 = vector.extract_strided_slice %40 {offsets = [0, 8], sizes = [192, 8], strides = [1, 1]} : vector<192x96xf32> to vector<192x8xf32>
    %43 = arith.maximumf %41, %42 : vector<192x8xf32>
    %44 = vector.extract_strided_slice %40 {offsets = [0, 16], sizes = [192, 8], strides = [1, 1]} : vector<192x96xf32> to vector<192x8xf32>
    %45 = vector.extract_strided_slice %40 {offsets = [0, 24], sizes = [192, 8], strides = [1, 1]} : vector<192x96xf32> to vector<192x8xf32>
    %46 = arith.maximumf %44, %45 : vector<192x8xf32>
    %47 = vector.extract_strided_slice %40 {offsets = [0, 32], sizes = [192, 8], strides = [1, 1]} : vector<192x96xf32> to vector<192x8xf32>
    %48 = vector.extract_strided_slice %40 {offsets = [0, 40], sizes = [192, 8], strides = [1, 1]} : vector<192x96xf32> to vector<192x8xf32>
    %49 = arith.maximumf %47, %48 : vector<192x8xf32>
    %50 = vector.extract_strided_slice %40 {offsets = [0, 48], sizes = [192, 8], strides = [1, 1]} : vector<192x96xf32> to vector<192x8xf32>
    %51 = vector.extract_strided_slice %40 {offsets = [0, 56], sizes = [192, 8], strides = [1, 1]} : vector<192x96xf32> to vector<192x8xf32>
    %52 = arith.maximumf %50, %51 : vector<192x8xf32>
    %53 = vector.extract_strided_slice %40 {offsets = [0, 64], sizes = [192, 8], strides = [1, 1]} : vector<192x96xf32> to vector<192x8xf32>
    %54 = vector.extract_strided_slice %40 {offsets = [0, 72], sizes = [192, 8], strides = [1, 1]} : vector<192x96xf32> to vector<192x8xf32>
    %55 = arith.maximumf %53, %54 : vector<192x8xf32>
    %56 = vector.extract_strided_slice %40 {offsets = [0, 80], sizes = [192, 8], strides = [1, 1]} : vector<192x96xf32> to vector<192x8xf32>
    %57 = vector.extract_strided_slice %40 {offsets = [0, 88], sizes = [192, 8], strides = [1, 1]} : vector<192x96xf32> to vector<192x8xf32>
    %58 = arith.maximumf %56, %57 : vector<192x8xf32>
    %59 = tpu.concatenate %43, %46, %49, %52, %55, %58 in 1 : vector<192x8xf32>, vector<192x8xf32>, vector<192x8xf32>, vector<192x8xf32>, vector<192x8xf32>, vector<192x8xf32> -> vector<192x48xf32>
    %cst_10 = arith.constant dense<0.000000e+00> : vector<48xf32>
    %60 = vector.multi_reduction <add>, %59, %cst_10 [0] : vector<192x48xf32> to vector<48xf32>
    %61 = vector.shape_cast %60 : vector<48xf32> to vector<1x48xf32>
    %62 = vector.extract_strided_slice %61 {offsets = [0, 0], sizes = [1, 8], strides = [1, 1]} : vector<1x48xf32> to vector<1x8xf32>
    %63 = vector.extract_strided_slice %61 {offsets = [0, 8], sizes = [1, 8], strides = [1, 1]} : vector<1x48xf32> to vector<1x8xf32>
    %64 = arith.addf %62, %63 : vector<1x8xf32>
    %65 = vector.extract_strided_slice %61 {offsets = [0, 16], sizes = [1, 8], strides = [1, 1]} : vector<1x48xf32> to vector<1x8xf32>
    %66 = arith.addf %64, %65 : vector<1x8xf32>
    %67 = vector.extract_strided_slice %61 {offsets = [0, 24], sizes = [1, 8], strides = [1, 1]} : vector<1x48xf32> to vector<1x8xf32>
    %68 = arith.addf %66, %67 : vector<1x8xf32>
    %69 = vector.extract_strided_slice %61 {offsets = [0, 32], sizes = [1, 8], strides = [1, 1]} : vector<1x48xf32> to vector<1x8xf32>
    %70 = arith.addf %68, %69 : vector<1x8xf32>
    %71 = vector.extract_strided_slice %61 {offsets = [0, 40], sizes = [1, 8], strides = [1, 1]} : vector<1x48xf32> to vector<1x8xf32>
    %72 = arith.addf %70, %71 : vector<1x8xf32>
    %cst_11 = arith.constant 8.68055562E-4 : f32
    %73 = vector.broadcast %cst_11 : f32 to vector<1x8xf32>
    %74 = arith.mulf %72, %73 : vector<1x8xf32>
    %75 = tpu.concatenate %74, %74, %74, %74, %74, %74 in 1 : vector<1x8xf32>, vector<1x8xf32>, vector<1x8xf32>, vector<1x8xf32>, vector<1x8xf32>, vector<1x8xf32> -> vector<1x48xf32>
    %76 = vector.broadcast %75 : vector<1x48xf32> to vector<192x48xf32>
    %77 = arith.subf %59, %76 : vector<192x48xf32>
    %78 = arith.mulf %77, %77 : vector<192x48xf32>
    %cst_12 = arith.constant dense<0.000000e+00> : vector<48xf32>
    %79 = vector.multi_reduction <add>, %78, %cst_12 [0] : vector<192x48xf32> to vector<48xf32>
    %80 = vector.shape_cast %79 : vector<48xf32> to vector<1x48xf32>
    %81 = vector.extract_strided_slice %80 {offsets = [0, 0], sizes = [1, 8], strides = [1, 1]} : vector<1x48xf32> to vector<1x8xf32>
    %82 = vector.extract_strided_slice %80 {offsets = [0, 8], sizes = [1, 8], strides = [1, 1]} : vector<1x48xf32> to vector<1x8xf32>
    %83 = arith.addf %81, %82 : vector<1x8xf32>
    %84 = vector.extract_strided_slice %80 {offsets = [0, 16], sizes = [1, 8], strides = [1, 1]} : vector<1x48xf32> to vector<1x8xf32>
    %85 = arith.addf %83, %84 : vector<1x8xf32>
    %86 = vector.extract_strided_slice %80 {offsets = [0, 24], sizes = [1, 8], strides = [1, 1]} : vector<1x48xf32> to vector<1x8xf32>
    %87 = arith.addf %85, %86 : vector<1x8xf32>
    %88 = vector.extract_strided_slice %80 {offsets = [0, 32], sizes = [1, 8], strides = [1, 1]} : vector<1x48xf32> to vector<1x8xf32>
    %89 = arith.addf %87, %88 : vector<1x8xf32>
    %90 = vector.extract_strided_slice %80 {offsets = [0, 40], sizes = [1, 8], strides = [1, 1]} : vector<1x48xf32> to vector<1x8xf32>
    %91 = arith.addf %89, %90 : vector<1x8xf32>
    %cst_13 = arith.constant 8.68055562E-4 : f32
    %92 = vector.broadcast %cst_13 : f32 to vector<1x8xf32>
    %93 = arith.mulf %91, %92 : vector<1x8xf32>
    %cst_14 = arith.constant 9.99999974E-6 : f32
    %94 = vector.broadcast %cst_14 : f32 to vector<1x8xf32>
    %95 = arith.addf %93, %94 : vector<1x8xf32>
    %96 = math.rsqrt %95 : vector<1x8xf32>
    %97 = tpu.concatenate %96, %96, %96, %96, %96, %96 in 1 : vector<1x8xf32>, vector<1x8xf32>, vector<1x8xf32>, vector<1x8xf32>, vector<1x8xf32>, vector<1x8xf32> -> vector<1x48xf32>
    %98 = vector.broadcast %97 : vector<1x48xf32> to vector<192x48xf32>
    %99 = arith.mulf %77, %98 : vector<192x48xf32>
    %100 = vector.broadcast %2 : vector<1x48xf32> to vector<192x48xf32>
    %101 = arith.mulf %99, %100 : vector<192x48xf32>
    %102 = vector.broadcast %3 : vector<1x48xf32> to vector<192x48xf32>
    %103 = arith.addf %101, %102 : vector<192x48xf32>
    %104 = vector.extract_strided_slice %103 {offsets = [0, 0], sizes = [32, 40], strides = [1, 1]} : vector<192x48xf32> to vector<32x40xf32>
    %105 = vector.extract_strided_slice %103 {offsets = [32, 0], sizes = [32, 40], strides = [1, 1]} : vector<192x48xf32> to vector<32x40xf32>
    %106 = vector.extract_strided_slice %103 {offsets = [64, 0], sizes = [32, 40], strides = [1, 1]} : vector<192x48xf32> to vector<32x40xf32>
    %107 = vector.extract_strided_slice %103 {offsets = [96, 0], sizes = [32, 40], strides = [1, 1]} : vector<192x48xf32> to vector<32x40xf32>
    %108 = vector.extract_strided_slice %103 {offsets = [128, 0], sizes = [32, 40], strides = [1, 1]} : vector<192x48xf32> to vector<32x40xf32>
    %109 = tpu.concatenate %104, %105, %106, %107, %108 in 1 : vector<32x40xf32>, vector<32x40xf32>, vector<32x40xf32>, vector<32x40xf32>, vector<32x40xf32> -> vector<32x200xf32>
    %110 = vector.extract_strided_slice %103 {offsets = [0, 8], sizes = [32, 40], strides = [1, 1]} : vector<192x48xf32> to vector<32x40xf32>
    %111 = vector.extract_strided_slice %103 {offsets = [32, 8], sizes = [32, 40], strides = [1, 1]} : vector<192x48xf32> to vector<32x40xf32>
    %112 = vector.extract_strided_slice %103 {offsets = [64, 8], sizes = [32, 40], strides = [1, 1]} : vector<192x48xf32> to vector<32x40xf32>
    %113 = vector.extract_strided_slice %103 {offsets = [96, 8], sizes = [32, 40], strides = [1, 1]} : vector<192x48xf32> to vector<32x40xf32>
    %114 = vector.extract_strided_slice %103 {offsets = [128, 8], sizes = [32, 40], strides = [1, 1]} : vector<192x48xf32> to vector<32x40xf32>
    %115 = tpu.concatenate %110, %111, %112, %113, %114 in 1 : vector<32x40xf32>, vector<32x40xf32>, vector<32x40xf32>, vector<32x40xf32>, vector<32x40xf32> -> vector<32x200xf32>
    %116 = vector.extract_strided_slice %103 {offsets = [32, 0], sizes = [32, 40], strides = [1, 1]} : vector<192x48xf32> to vector<32x40xf32>
    %117 = vector.extract_strided_slice %103 {offsets = [64, 0], sizes = [32, 40], strides = [1, 1]} : vector<192x48xf32> to vector<32x40xf32>
    %118 = vector.extract_strided_slice %103 {offsets = [96, 0], sizes = [32, 40], strides = [1, 1]} : vector<192x48xf32> to vector<32x40xf32>
    %119 = vector.extract_strided_slice %103 {offsets = [128, 0], sizes = [32, 40], strides = [1, 1]} : vector<192x48xf32> to vector<32x40xf32>
    %120 = vector.extract_strided_slice %103 {offsets = [160, 0], sizes = [32, 40], strides = [1, 1]} : vector<192x48xf32> to vector<32x40xf32>
    %121 = tpu.concatenate %116, %117, %118, %119, %120 in 1 : vector<32x40xf32>, vector<32x40xf32>, vector<32x40xf32>, vector<32x40xf32>, vector<32x40xf32> -> vector<32x200xf32>
    %122 = vector.extract_strided_slice %103 {offsets = [32, 8], sizes = [32, 40], strides = [1, 1]} : vector<192x48xf32> to vector<32x40xf32>
    %123 = vector.extract_strided_slice %103 {offsets = [64, 8], sizes = [32, 40], strides = [1, 1]} : vector<192x48xf32> to vector<32x40xf32>
    %124 = vector.extract_strided_slice %103 {offsets = [96, 8], sizes = [32, 40], strides = [1, 1]} : vector<192x48xf32> to vector<32x40xf32>
    %125 = vector.extract_strided_slice %103 {offsets = [128, 8], sizes = [32, 40], strides = [1, 1]} : vector<192x48xf32> to vector<32x40xf32>
    %126 = vector.extract_strided_slice %103 {offsets = [160, 8], sizes = [32, 40], strides = [1, 1]} : vector<192x48xf32> to vector<32x40xf32>
    %127 = tpu.concatenate %122, %123, %124, %125, %126 in 1 : vector<32x40xf32>, vector<32x40xf32>, vector<32x40xf32>, vector<32x40xf32>, vector<32x40xf32> -> vector<32x200xf32>
    %128 = tpu.concatenate %109, %115, %121, %127 in 0 : vector<32x200xf32>, vector<32x200xf32>, vector<32x200xf32>, vector<32x200xf32> -> vector<128x200xf32>
    %c0_15 = arith.constant 0 : index
    %c0_16 = arith.constant 0 : index
    %129 = vector.load %arg2[%c0_15, %c0_16] : memref<200x16xf32, #tpu.memory_space<vmem>>, vector<200x16xf32>
    %cst_17 = arith.constant dense<0.000000e+00> : vector<128x16xf32>
    %130 = tpu.matmul %128, %129, %cst_17 {dimension_numbers = #tpu.dot_dimension_numbers<[1], [0], [0], [1], [0, 0, 1, 1], [], []>} : vector<128x200xf32>, vector<200x16xf32>, vector<128x16xf32> -> vector<128x16xf32>
    %131 = vector.broadcast %4 : vector<1x16xf32> to vector<128x16xf32>
    %132 = arith.addf %130, %131 : vector<128x16xf32>
    %cst_18 = arith.constant 0.000000e+00 : f32
    %133 = vector.broadcast %cst_18 : f32 to vector<128x16xf32>
    %134 = arith.maximumf %132, %133 : vector<128x16xf32>
    %135 = vector.extract_strided_slice %134 {offsets = [0, 0], sizes = [32, 16], strides = [1, 1]} : vector<128x16xf32> to vector<32x16xf32>
    %136 = vector.extract_strided_slice %134 {offsets = [32, 0], sizes = [32, 16], strides = [1, 1]} : vector<128x16xf32> to vector<32x16xf32>
    %137 = arith.maximumf %135, %136 : vector<32x16xf32>
    %138 = vector.extract_strided_slice %134 {offsets = [64, 0], sizes = [32, 16], strides = [1, 1]} : vector<128x16xf32> to vector<32x16xf32>
    %139 = vector.extract_strided_slice %134 {offsets = [96, 0], sizes = [32, 16], strides = [1, 1]} : vector<128x16xf32> to vector<32x16xf32>
    %140 = arith.maximumf %138, %139 : vector<32x16xf32>
    %141 = arith.maximumf %137, %140 : vector<32x16xf32>
    %142 = vector.extract_strided_slice %141 {offsets = [0, 0], sizes = [2, 16], strides = [1, 1]} : vector<32x16xf32> to vector<2x16xf32>
    %143 = vector.extract_strided_slice %141 {offsets = [2, 0], sizes = [2, 16], strides = [1, 1]} : vector<32x16xf32> to vector<2x16xf32>
    %144 = vector.extract_strided_slice %141 {offsets = [4, 0], sizes = [2, 16], strides = [1, 1]} : vector<32x16xf32> to vector<2x16xf32>
    %145 = vector.extract_strided_slice %141 {offsets = [6, 0], sizes = [2, 16], strides = [1, 1]} : vector<32x16xf32> to vector<2x16xf32>
    %146 = vector.extract_strided_slice %141 {offsets = [8, 0], sizes = [2, 16], strides = [1, 1]} : vector<32x16xf32> to vector<2x16xf32>
    %147 = vector.extract_strided_slice %141 {offsets = [10, 0], sizes = [2, 16], strides = [1, 1]} : vector<32x16xf32> to vector<2x16xf32>
    %148 = vector.extract_strided_slice %141 {offsets = [12, 0], sizes = [2, 16], strides = [1, 1]} : vector<32x16xf32> to vector<2x16xf32>
    %149 = vector.extract_strided_slice %141 {offsets = [14, 0], sizes = [2, 16], strides = [1, 1]} : vector<32x16xf32> to vector<2x16xf32>
    %150 = vector.extract_strided_slice %141 {offsets = [16, 0], sizes = [2, 16], strides = [1, 1]} : vector<32x16xf32> to vector<2x16xf32>
    %151 = vector.extract_strided_slice %141 {offsets = [18, 0], sizes = [2, 16], strides = [1, 1]} : vector<32x16xf32> to vector<2x16xf32>
    %152 = vector.extract_strided_slice %141 {offsets = [20, 0], sizes = [2, 16], strides = [1, 1]} : vector<32x16xf32> to vector<2x16xf32>
    %153 = vector.extract_strided_slice %141 {offsets = [22, 0], sizes = [2, 16], strides = [1, 1]} : vector<32x16xf32> to vector<2x16xf32>
    %154 = vector.extract_strided_slice %141 {offsets = [24, 0], sizes = [2, 16], strides = [1, 1]} : vector<32x16xf32> to vector<2x16xf32>
    %155 = vector.extract_strided_slice %141 {offsets = [26, 0], sizes = [2, 16], strides = [1, 1]} : vector<32x16xf32> to vector<2x16xf32>
    %156 = vector.extract_strided_slice %141 {offsets = [28, 0], sizes = [2, 16], strides = [1, 1]} : vector<32x16xf32> to vector<2x16xf32>
    %157 = vector.extract_strided_slice %141 {offsets = [30, 0], sizes = [2, 16], strides = [1, 1]} : vector<32x16xf32> to vector<2x16xf32>
    %158 = tpu.concatenate %142, %143, %144, %145, %146, %147, %148, %149, %150, %151, %152, %153, %154, %155, %156, %157 in 1 : vector<2x16xf32>, vector<2x16xf32>, vector<2x16xf32>, vector<2x16xf32>, vector<2x16xf32>, vector<2x16xf32>, vector<2x16xf32>, vector<2x16xf32>, vector<2x16xf32>, vector<2x16xf32>, vector<2x16xf32>, vector<2x16xf32>, vector<2x16xf32>, vector<2x16xf32>, vector<2x16xf32>, vector<2x16xf32> -> vector<2x256xf32>
    %cst_19 = arith.constant dense<0.000000e+00> : vector<256xf32>
    %159 = vector.multi_reduction <add>, %158, %cst_19 [0] : vector<2x256xf32> to vector<256xf32>
    %160 = vector.shape_cast %159 : vector<256xf32> to vector<1x256xf32>
    %cst_20 = arith.constant 2.000000e+00 : f32
    %161 = vector.broadcast %cst_20 : f32 to vector<1x256xf32>
    %162 = arith.divf %160, %161 : vector<1x256xf32>
    %163 = vector.broadcast %162 : vector<1x256xf32> to vector<2x256xf32>
    %164 = arith.subf %158, %163 : vector<2x256xf32>
    %165 = arith.mulf %164, %164 : vector<2x256xf32>
    %cst_21 = arith.constant dense<0.000000e+00> : vector<256xf32>
    %166 = vector.multi_reduction <add>, %165, %cst_21 [0] : vector<2x256xf32> to vector<256xf32>
    %167 = vector.shape_cast %166 : vector<256xf32> to vector<1x256xf32>
    %cst_22 = arith.constant 2.000000e+00 : f32
    %168 = vector.broadcast %cst_22 : f32 to vector<1x256xf32>
    %169 = arith.divf %167, %168 : vector<1x256xf32>
    %cst_23 = arith.constant 9.99999974E-6 : f32
    %170 = vector.broadcast %cst_23 : f32 to vector<1x256xf32>
    %171 = arith.addf %169, %170 : vector<1x256xf32>
    %172 = math.rsqrt %171 : vector<1x256xf32>
    %173 = vector.broadcast %172 : vector<1x256xf32> to vector<2x256xf32>
    %174 = arith.mulf %164, %173 : vector<2x256xf32>
    %175 = vector.broadcast %5 : vector<1x256xf32> to vector<2x256xf32>
    %176 = arith.mulf %174, %175 : vector<2x256xf32>
    %177 = vector.broadcast %6 : vector<1x256xf32> to vector<2x256xf32>
    %178 = arith.addf %176, %177 : vector<2x256xf32>
    %c0_24 = arith.constant 0 : index
    %c0_25 = arith.constant 0 : index
    %179 = vector.load %arg3[%c0_24, %c0_25] : memref<256x256xf32, #tpu.memory_space<vmem>>, vector<256x256xf32>
    %cst_26 = arith.constant dense<0.000000e+00> : vector<2x256xf32>
    %180 = tpu.matmul %178, %179, %cst_26 {dimension_numbers = #tpu.dot_dimension_numbers<[1], [0], [0], [1], [0, 0, 1, 1], [], []>} : vector<2x256xf32>, vector<256x256xf32>, vector<2x256xf32> -> vector<2x256xf32>
    %181 = vector.broadcast %7 : vector<1x256xf32> to vector<2x256xf32>
    %182 = arith.addf %180, %181 : vector<2x256xf32>
    %cst_27 = arith.constant 0.000000e+00 : f32
    %183 = vector.broadcast %cst_27 : f32 to vector<2x256xf32>
    %184 = arith.maximumf %182, %183 : vector<2x256xf32>
    %c0_28 = arith.constant 0 : index
    %c0_29 = arith.constant 0 : index
    %185 = vector.load %arg4[%c0_28, %c0_29] : memref<256x64xf32, #tpu.memory_space<vmem>>, vector<256x64xf32>
    %cst_30 = arith.constant dense<0.000000e+00> : vector<2x64xf32>
    %186 = tpu.matmul %184, %185, %cst_30 {dimension_numbers = #tpu.dot_dimension_numbers<[1], [0], [0], [1], [0, 0, 1, 1], [], []>} : vector<2x256xf32>, vector<256x64xf32>, vector<2x64xf32> -> vector<2x64xf32>
    %187 = vector.broadcast %8 : vector<1x64xf32> to vector<2x64xf32>
    %188 = arith.addf %186, %187 : vector<2x64xf32>
    %cst_31 = arith.constant 0.000000e+00 : f32
    %189 = vector.broadcast %cst_31 : f32 to vector<2x64xf32>
    %190 = arith.maximumf %188, %189 : vector<2x64xf32>
    %c0_32 = arith.constant 0 : index
    %c0_33 = arith.constant 0 : index
    %191 = vector.load %arg5[%c0_32, %c0_33] : memref<64x10xf32, #tpu.memory_space<vmem>>, vector<64x10xf32>
    %cst_34 = arith.constant dense<0.000000e+00> : vector<2x10xf32>
    %192 = tpu.matmul %190, %191, %cst_34 {dimension_numbers = #tpu.dot_dimension_numbers<[1], [0], [0], [1], [0, 0, 1, 1], [], []>} : vector<2x64xf32>, vector<64x10xf32>, vector<2x10xf32> -> vector<2x10xf32>
    %193 = vector.broadcast %9 : vector<1x10xf32> to vector<2x10xf32>
    %194 = arith.addf %192, %193 : vector<2x10xf32>
    %cst_35 = arith.constant dense<0xFF800000> : vector<2xf32>
    %195 = vector.multi_reduction <maximumf>, %194, %cst_35 [1] : vector<2x10xf32> to vector<2xf32>
    %196 = vector.shape_cast %195 : vector<2xf32> to vector<2x1xf32>
    %197 = vector.broadcast %196 : vector<2x1xf32> to vector<2x10xf32>
    %198 = arith.subf %194, %197 : vector<2x10xf32>
    %199 = math.exp %198 : vector<2x10xf32>
    %cst_36 = arith.constant dense<0.000000e+00> : vector<2xf32>
    %200 = vector.multi_reduction <add>, %199, %cst_36 [1] : vector<2x10xf32> to vector<2xf32>
    %201 = vector.shape_cast %200 : vector<2xf32> to vector<2x1xf32>
    %202 = vector.broadcast %201 : vector<2x1xf32> to vector<2x10xf32>
    %203 = arith.divf %199, %202 : vector<2x10xf32>
    %c0_37 = arith.constant 0 : index
    %c0_38 = arith.constant 0 : index
    %204 = vector.load %arg7[%c0_37, %c0_38] : memref<2x10xf32, #tpu.memory_space<vmem>>, vector<2x10xf32>
    tpu.vector_store %arg7[%c0_37, %c0_38], %203 {strides = array<i32>} : memref<2x10xf32, #tpu.memory_space<vmem>>, vector<2x10xf32>,
    return
  }
}

</mosaic_0001>

<bundles_post_ra>
// kernel: net_forward.1
= control target key start
LH: loop header
LB: loop body
LE: loop exit
PB: predicated region body
PF: predicated region fallthrough
CT: control target
= control target key end

     0   :  { %s3906_s28 = smov 32   ;;  %s3907_s29 = smov 16   ;;  %s7008_s0 = inlined_call_operand.vmem [shape: f32[512,16], index: 0, kind: input, shape index: {}]   ;;  %s7009_s1 = inlined_call_operand.vmem [shape: f32[80,96], index: 1, kind: input, shape index: {}]   ;;  %s7010_s2 = inlined_call_operand.vmem [shape: f32[200,16], index: 2, kind: input, shape index: {}]   ;;  %s7011_s3 = inlined_call_operand.vmem [shape: f32[256,256], index: 3, kind: input, shape index: {}]   ;;  %s7012_s4 = inlined_call_operand.vmem [shape: f32[256,64], index: 4, kind: input, shape index: {}]   ;;  %s7013_s5 = inlined_call_operand.vmem [shape: f32[64,10], index: 5, kind: input, shape index: {}]   ;;  %s7014_s6 = inlined_call_operand.vmem [shape: f32[16,256], index: 6, kind: input, shape index: {}]   ;;  %s7015_s7 = inlined_call_operand.hbm [shape: f32[2,10], index: 7, kind: output, shape index: {}]  }
   0x1   :  { %v3966_v0 = vld [vmem:[%s7008_s0 + $0x40] sm:$0xff]  ;;  %v3980_v2 = vld [vmem:[%s7008_s0 + $0x48] sm:$0xff]  ;;  %s3908_s15 = smov 48   ;;  %v4011_v7 = vld [vmem:[%s7008_s0 + $0x30] sm:$0xff]  ;;  %s3909_s26 = smov 64  }
   0x2   :  { %v3971_v1 = vld [vmem:[%s7008_s0 + $0x20] sm:$0xff]  ;;  %290 = vrot.lane.b32.xlu1 %v3966_v0, %s3906_s28  ;;  %v3985_v3 = vld [vmem:[%s7008_s0 + $0x28] sm:$0xff]  ;;  %v933_v10 = vld [vmem:[%s7009_s1 + $0x38] sm:$0xff] }
   0x3   :  { %142 = vrot.lane.b32.xlu0 %v3971_v1, %s3907_s29  ;;  %v3994_v4 = vld [vmem:[%s7008_s0 + $0x68] sm:$0xff]  ;;  %v3999_v5 = vld [vmem:[%s7008_s0 + $0x60] sm:$0xff]  ;;  %v4031_v11 = vld [vmem:[%s7008_s0 + $0x38] sm:$0xff] }
   0x4   :  { %v935_v6 = vld [vmem:[%s7009_s1 + $0x48] sm:$0xff]  ;;  %v4016_v8 = vld [vmem:[%s7008_s0 + $0x80] sm:$0xff]  ;;  %v932_v13 = vld [vmem:[%s7009_s1 + $0x30] sm:$0xff] }
   0x5   :  { %3644 = vmatprep.subr.mxu0 %v935_v6  ;;  %v934_v9 = vld [vmem:[%s7009_s1 + $0x40] sm:$0xff]  ;;  %v4036_v12 = vld [vmem:[%s7008_s0 + $0x88] sm:$0xff] }
   0x6   :  { %292 = vrot.lane.b32.xlu1 %v3980_v2, %s3906_s28  ;;  %3645 = vmatpush3.msra.mxu0 %v935_v6 }
   0x7   :  { %144 = vrot.lane.b32.xlu0 %v3985_v3, %s3907_s29  ;;  %3646 = vmatprep.subr.mxu0 %v934_v9 }
   0x8   :  { %3647 = vmatpush3.msra.mxu0 %v934_v9 }
   0x9   :  { %3648 = vmatprep.subr.mxu0 %v933_v10 }
   0xa   :  { %440 = vrot.lane.b32.xlu1 %v3994_v4, %s3908_s15 }
   0xb   :  { %438 = vrot.lane.b32.xlu0 %v3999_v5, %s3908_s15 }
   0xe   :  { %146 = vrot.lane.b32.xlu1 %v4011_v7, %s3907_s29 }
   0xf   :  { %586 = vrot.lane.b32.xlu0 %v4016_v8, %s3909_s26 }
  0x10   :  { %12 = vsyncpa [#allocation3], 0  ;;  %3649 = vmatpush3.msra.mxu0 %v933_v10  ;;  %v931_v14 = vld [vmem:[%s7009_s1 + $0x28] sm:$0xff]  ;;  %v4051_v15 = vld [vmem:[%s7008_s0 + $0x58] sm:$0xff]  ;;  %vm730_vm0 = vcmask 130048   ;;  %vm779_vm1 = vcmask 261120  }
  0x11   :  { %v4056_v16 = vld [vmem:[%s7008_s0 + $0x50] sm:$0xff]  ;;  %3650 = vmatprep.subr.mxu0 %v932_v13  ;;  %v930_v17 = vld [vmem:[%s7009_s1 + $0x20] sm:$0xff]  ;;  %v4068_v18 = vld [vmem:[%s7008_s0 + $0x78] sm:$0xff]  ;;  %vm828_vm2 = vcmask 392192   ;;  %vm877_vm3 = vcmask 523264   ;;  %vm940_vm4 = vcmask 654336  }
  0x12   :  { %148 = vrot.lane.b32.xlu1 %v4031_v11, %s3907_s29  ;;  %3651 = vmatpush3.msra.mxu0 %v932_v13  ;;  %v4073_v19 = vld [vmem:[%s7008_s0 + $0x70] sm:$0xff]  ;;  %v929_v20 = vld [vmem:[%s7009_s1 + $0x18] sm:$0xff]  ;;  %v927_v23 = vld [vmem:[%s7009_s1 + $0x8] sm:$0xff]  ;;  %s3911_s16 = smov 104   ;;  %s3912_s17 = smov 112   ;;  %vm1966_vm5 = vcmask 64512  }
  0x13   :  { %588 = vrot.lane.b32.xlu0 %v4036_v12, %s3909_s26  ;;  %3652 = vmatprep.subr.mxu0 %v931_v14  ;;  %v928_v21 = vld [vmem:[%s7009_s1 + $0x10] sm:$0xff]  ;;  %v4100_v24 = vld [vmem:[%s7008_s0 + $0x98] sm:$0xff]  ;;  %v926_v25 = vld [vmem:[%s7009_s1] sm:$0xff]  ;;  %s3913_s1 = smov 96   ;;  %s3914_s18 = smov 88   ;;  %vm2015_vm6 = vcmask 195584  }
  0x14   :  { %3653 = vmatpush3.msra.mxu0 %v931_v14  ;;  %v4088_v22 = vld [vmem:[%s7008_s0 + $0x90] sm:$0xff]  ;;  %v4120_v26 = vld [vmem:[%s7008_s0 + $0xa0] sm:$0xff]  ;;  %v4129_v27 = vld [vmem:[%s7008_s0 + $0xa8] sm:$0xff]  ;;  %vm2064_vm7 = vcmask 326656   ;;  %s3915_s19 = smov 8   ;;  %s3916_s20 = smov 24  }
  0x15   :  { %3654 = vmatprep.subr.mxu0 %v930_v17  ;;  %v4146_v28 = vld [vmem:[%s7008_s0 + $0xb0] sm:$0xff]  ;;  %v4155_v29 = vld [vmem:[%s7008_s0 + $0xb8] sm:$0xff]  ;;  %v4172_v30 = vld [vmem:[%s7008_s0 + $0xc0] sm:$0xff]  ;;  %s3917_s21 = smov 40   ;;  %s3920_s27 = smov 72   ;;  %vm2491_vm8 = vcmask 982016  }
  0x16   :  { %296 = vrot.lane.b32.xlu1 %v4051_v15, %s3906_s28  ;;  %3655 = vmatpush3.msra.mxu0 %v930_v17  ;;  %v4181_v31 = vld [vmem:[%s7008_s0 + $0xc8] sm:$0xff]  ;;  %v4198_v32 = vld [vmem:[%s7008_s0 + $0xd0] sm:$0xff]  ;;  %v4207_v33 = vld [vmem:[%s7008_s0 + $0xd8] sm:$0xff]  ;;  %vm2753_vm9 = vcmask 588800   ;;  %vm3038_vm10 = vcmask 785408   ;;  %vm3040_vm11 = vcmask 916480  }
  0x17   :  { %294 = vrot.lane.b32.xlu0 %v4056_v16, %s3906_s28  ;;  %3656 = vmatprep.subr.mxu0 %v929_v20  ;;  %v4224_v34 = vld [vmem:[%s7008_s0 + $0xe0] sm:$0xff]  ;;  %v4233_v35 = vld [vmem:[%s7008_s0 + $0xe8] sm:$0xff]  ;;  %v4253_v41 = vld [vmem:[%s7008_s0 + $0xf0] sm:$0xff]  ;;  %vm3049_vm12 = vcmask 1041408   ;;  %vm3921_vm13 = vmmov 0   ;;  %vm3450_vm14 = vcmask 74752  }
  0x18   :  { %3657 = vmatpush3.msra.mxu0 %v929_v20  ;;  %v30_v40 = vld [vmem:[%s7008_s0] sm:$0xff]  ;;  %v31_v45 = vld [vmem:[%s7008_s0 + $0x8] sm:$0xff]  ;;  %v4267_v47 = vld [vmem:[%s7008_s0 + $0xf8] sm:$0xff] }
  0x19   :  { %3658 = vmatprep.subr.mxu0 %v928_v21  ;;  %v32_v60 = vld [vmem:[%s7008_s0 + $0x10] sm:$0xff]  ;;  %v4295_v61 = vld [vmem:[%s7008_s0 + $0x100] sm:$0xff]  ;;  %v33_v9 = vld [vmem:[%s7008_s0 + $0x18] sm:$0xff] }
  0x1a   :  { %444 = vrot.lane.b32.xlu1 %v4068_v18, %s3908_s15  ;;  %3659 = vmatpush3.msra.mxu0 %v928_v21  ;;  %v4309_v13 = vld [vmem:[%s7008_s0 + $0x108] sm:$0xff] }
  0x1b   :  { %442 = vrot.lane.b32.xlu0 %v4073_v19, %s3908_s15  ;;  %3660 = vmatprep.subr.mxu0 %v927_v23 }
  0x1c   :  { %3661 = vmatpush3.msra.mxu0 %v927_v23 }
  0x1d   :  { %3662 = vmatprep.subr.mxu0 %v926_v25 }
  0x1e   :  { %150 = vrot.lane.b32.xlu1 %v3966_v0, %s3907_s29  ;;  %3663 = vmatpush3.msra.mxu0 %v926_v25 }
  0x1f   :  { %590 = vrot.lane.b32.xlu0 %v4088_v22, %s3909_s26 }
  0x22   :  { %152 = vrot.lane.b32.xlu1 %v3980_v2, %s3907_s29 }
  0x23   :  { %592 = vrot.lane.b32.xlu0 %v4100_v24, %s3909_s26 }
  0x26   :  { %300 = vrot.lane.b32.xlu1 %v3994_v4, %s3906_s28 }
  0x27   :  { %298 = vrot.lane.b32.xlu0 %v3999_v5, %s3906_s28 }
  0x2a   :  { %448 = vrot.lane.b32.xlu1 %v4036_v12, %s3908_s15 }
  0x2b   :  { %446 = vrot.lane.b32.xlu0 %v4016_v8, %s3908_s15 }
  0x2e   :  { %154 = vrot.lane.b32.xlu1 %v4056_v16, %s3907_s29 }
  0x2f   :  { %594 = vrot.lane.b32.xlu0 %v4120_v26, %s3909_s26 }
  0x32   :  { %156 = vrot.lane.b32.xlu1 %v4051_v15, %s3907_s29 }
  0x33   :  { %596 = vrot.lane.b32.xlu0 %v4129_v27, %s3909_s26 }
  0x36   :  { %304 = vrot.lane.b32.xlu1 %v4068_v18, %s3906_s28 }
  0x37   :  { %302 = vrot.lane.b32.xlu0 %v4073_v19, %s3906_s28 }
  0x3a   :  { %452 = vrot.lane.b32.xlu1 %v4100_v24, %s3908_s15 }
  0x3b   :  { %450 = vrot.lane.b32.xlu0 %v4088_v22, %s3908_s15 }
  0x3e   :  { %158 = vrot.lane.b32.xlu1 %v3999_v5, %s3907_s29 }
  0x3f   :  { %598 = vrot.lane.b32.xlu0 %v4146_v28, %s3909_s26 }
  0x42   :  { %160 = vrot.lane.b32.xlu1 %v3994_v4, %s3907_s29 }
  0x43   :  { %600 = vrot.lane.b32.xlu0 %v4155_v29, %s3909_s26 }
  0x46   :  { %308 = vrot.lane.b32.xlu1 %v4036_v12, %s3906_s28 }
  0x47   :  { %306 = vrot.lane.b32.xlu0 %v4016_v8, %s3906_s28 }
  0x4a   :  { %456 = vrot.lane.b32.xlu1 %v4129_v27, %s3908_s15 }
  0x4b   :  { %454 = vrot.lane.b32.xlu0 %v4120_v26, %s3908_s15 }
  0x4e   :  { %162 = vrot.lane.b32.xlu1 %v4073_v19, %s3907_s29 }
  0x4f   :  { %602 = vrot.lane.b32.xlu0 %v4172_v30, %s3909_s26 }
  0x52   :  { %164 = vrot.lane.b32.xlu1 %v4068_v18, %s3907_s29 }
  0x53   :  { %604 = vrot.lane.b32.xlu0 %v4181_v31, %s3909_s26 }
  0x56   :  { %312 = vrot.lane.b32.xlu1 %v4100_v24, %s3906_s28 }
  0x57   :  { %310 = vrot.lane.b32.xlu0 %v4088_v22, %s3906_s28 }
  0x5a   :  { %460 = vrot.lane.b32.xlu1 %v4155_v29, %s3908_s15 }
  0x5b   :  { %458 = vrot.lane.b32.xlu0 %v4146_v28, %s3908_s15 }
  0x5e   :  { %166 = vrot.lane.b32.xlu1 %v4016_v8, %s3907_s29 }
  0x5f   :  { %606 = vrot.lane.b32.xlu0 %v4198_v32, %s3909_s26 }
  0x62   :  { %168 = vrot.lane.b32.xlu1 %v4036_v12, %s3907_s29 }
  0x63   :  { %608 = vrot.lane.b32.xlu0 %v4207_v33, %s3909_s26 }
  0x66   :  { %316 = vrot.lane.b32.xlu1 %v4129_v27, %s3906_s28 }
  0x67   :  { %314 = vrot.lane.b32.xlu0 %v4120_v26, %s3906_s28 }
  0x6a   :  { %464 = vrot.lane.b32.xlu1 %v4181_v31, %s3908_s15 }
  0x6b   :  { %462 = vrot.lane.b32.xlu0 %v4172_v30, %s3908_s15 }
  0x6e   :  { %170 = vrot.lane.b32.xlu1 %v4088_v22, %s3907_s29 }
  0x6f   :  { %610 = vrot.lane.b32.xlu0 %v4224_v34, %s3909_s26 }
  0x72   :  { %172 = vrot.lane.b32.xlu1 %v4100_v24, %s3907_s29 }
  0x73   :  { %612 = vrot.lane.b32.xlu0 %v4233_v35, %s3909_s26 }
  0x74   :  { %v291_v36 = vpop.permute.xlu1 %290 }
  0x75   :  { %v143_v37 = vpop.permute.xlu0 %142 }
  0x76   :  { %320 = vrot.lane.b32.xlu1 %v4155_v29, %s3906_s28  ;;  %v731_v42 = vsel %vm730_vm0, %v30_v40, %v143_v37 }
  0x77   :  { %318 = vrot.lane.b32.xlu0 %v4146_v28, %s3906_s28  ;;  %v780_v46 = vsel %vm779_vm1, %v731_v42, %v291_v36 }
  0x78   :  { %v293_v38 = vpop.permute.xlu1 %292 }
  0x79   :  { %v145_v39 = vpop.permute.xlu0 %144 }
  0x7a   :  { %468 = vrot.lane.b32.xlu1 %v4207_v33, %s3908_s15  ;;  %v732_v48 = vsel %vm730_vm0, %v31_v45, %v145_v39 }
  0x7b   :  { %466 = vrot.lane.b32.xlu0 %v4198_v32, %s3908_s15  ;;  %v781_v53 = vsel %vm779_vm1, %v732_v48, %v293_v38 }
  0x7c   :  { %v441_v43 = vpop.permute.xlu1 %440 }
  0x7d   :  { %v439_v44 = vpop.permute.xlu0 %438  ;;  %v830_v54 = vsel %vm828_vm2, %v781_v53, %v441_v43  ;;  %v4334_v43 = vld [vmem:[%s7008_s0 + $0x110] sm:$0xff] }
  0x7e   :  { %174 = vrot.lane.b32.xlu1 %v4120_v26, %s3907_s29  ;;  %v829_v49 = vsel %vm828_vm2, %v780_v46, %v439_v44 }
  0x7f   :  { %614 = vrot.lane.b32.xlu0 %v4253_v41, %s3909_s26 }
  0x80   :  { %v147_v50 = vpop.permute.xlu1 %146 }
  0x81   :  { %v587_v51 = vpop.permute.xlu0 %586  ;;  %v733_v6 = vsel %vm730_vm0, %v32_v60, %v147_v50  ;;  %v4372_v60 = vld [vmem:[%s7008_s0 + $0x120] sm:$0xff] }
  0x82   :  { %v878_v52 = vsel %vm877_vm3, %v829_v49, %v587_v51  ;;  %176 = vrot.lane.b32.xlu1 %v4129_v27, %s3907_s29  ;;  %v4346_v49 = vld [vmem:[%s7008_s0 + $0x118] sm:$0xff] }
  0x83   :  { %616 = vrot.lane.b32.xlu0 %v4267_v47, %s3909_s26  ;;  %3664 = vmatprep.mubr.msk.f32.mxu0 %vm940_vm4, %v878_v52 }
  0x84   :  { %v149_v55 = vpop.permute.xlu1 %148 }
  0x85   :  { %v589_v56 = vpop.permute.xlu0 %588  ;;  %v734_v23 = vsel %vm730_vm0, %v33_v9, %v149_v55 }
  0x86   :  { %v879_v57 = vsel %vm877_vm3, %v830_v54, %v589_v56  ;;  %324 = vrot.lane.b32.xlu1 %v4181_v31, %s3906_s28 }
  0x87   :  { %322 = vrot.lane.b32.xlu0 %v4172_v30, %s3906_s28  ;;  %3665 = vmatmul.mubr.msk.f32.vlgmr.msra.gmra.mxu0 %vm940_vm4, %v879_v57 }
  0x88   :  { %v297_v58 = vpop.permute.xlu1 %296 }
  0x89   :  { %v295_v59 = vpop.permute.xlu0 %294  ;;  %v783_v25 = vsel %vm779_vm1, %v734_v23, %v297_v58 }
  0x8a   :  { %472 = vrot.lane.b32.xlu1 %v4233_v35, %s3908_s15  ;;  %v782_v10 = vsel %vm779_vm1, %v733_v6, %v295_v59 }
  0x8b   :  { %470 = vrot.lane.b32.xlu0 %v4224_v34, %s3908_s15 }
  0x8c   :  { %v445_v62 = vpop.permute.xlu1 %444 }
  0x8d   :  { %v443_v63 = vpop.permute.xlu0 %442  ;;  %v832_v36 = vsel %vm828_vm2, %v783_v25, %v445_v62 }
  0x8e   :  { %178 = vrot.lane.b32.xlu1 %v4146_v28, %s3907_s29  ;;  %v831_v14 = vsel %vm828_vm2, %v782_v10, %v443_v63  ;;  %v4384_v10 = vld [vmem:[%s7008_s0 + $0x128] sm:$0xff] }
  0x8f   :  { %618 = vrot.lane.b32.xlu0 %v4295_v61, %s3909_s26 }
  0x90   :  { %v151_v17 = vpop.permute.xlu1 %150 }
  0x91   :  { %v591_v20 = vpop.permute.xlu0 %590  ;;  %v735_v46 = vsel %vm730_vm0, %v3971_v1, %v151_v17 }
  0x92   :  { %v880_v21 = vsel %vm877_vm3, %v831_v14, %v591_v20  ;;  %180 = vrot.lane.b32.xlu1 %v4155_v29, %s3907_s29 }
  0x93   :  { %620 = vrot.lane.b32.xlu0 %v4309_v13, %s3909_s26  ;;  %3667 = vmatprep.mubr.msk.f32.mxu0 %vm940_vm4, %v880_v21 }
  0x94   :  { %v153_v37 = vpop.permute.xlu1 %152 }
  0x95   :  { %v593_v38 = vpop.permute.xlu0 %592  ;;  %v736_v1 = vsel %vm730_vm0, %v3985_v3, %v153_v37 }
  0x96   :  { %v881_v39 = vsel %vm877_vm3, %v832_v36, %v593_v38  ;;  %328 = vrot.lane.b32.xlu1 %v4207_v33, %s3906_s28 }
  0x97   :  { %326 = vrot.lane.b32.xlu0 %v4198_v32, %s3906_s28  ;;  %3668 = vmatmul.mubr.msk.f32.gmra.mxu0 %vm940_vm4, %v881_v39 }
  0x98   :  { %v301_v40 = vpop.permute.xlu1 %300 }
  0x99   :  { %v299_v42 = vpop.permute.xlu0 %298  ;;  %v785_v54 = vsel %vm779_vm1, %v736_v1, %v301_v40  ;;  %v4410_v40 = vld [vmem:[%s7008_s0 + $0x130] sm:$0xff] }
  0x9a   :  { %476 = vrot.lane.b32.xlu1 %v4267_v47, %s3908_s15  ;;  %v784_v48 = vsel %vm779_vm1, %v735_v46, %v299_v42 }
  0x9b   :  { %474 = vrot.lane.b32.xlu0 %v4253_v41, %s3908_s15 }
  0x9c   :  { %v449_v44 = vpop.permute.xlu1 %448 }
  0x9d   :  { %v447_v45 = vpop.permute.xlu0 %446  ;;  %v834_v55 = vsel %vm828_vm2, %v785_v54, %v449_v44 }
  0x9e   :  { %182 = vrot.lane.b32.xlu1 %v4172_v30, %s3907_s29  ;;  %v833_v50 = vsel %vm828_vm2, %v784_v48, %v447_v45  ;;  %v4422_v48 = vld [vmem:[%s7008_s0 + $0x138] sm:$0xff] }
  0x9f   :  { %622 = vrot.lane.b32.xlu0 %v4334_v43, %s3909_s26 }
  0xa0   :  { %v155_v51 = vpop.permute.xlu1 %154 }
  0xa1   :  { %v595_v52 = vpop.permute.xlu0 %594  ;;  %v737_v6 = vsel %vm730_vm0, %v4011_v7, %v155_v51 }
  0xa2   :  { %v882_v53 = vsel %vm877_vm3, %v833_v50, %v595_v52  ;;  %184 = vrot.lane.b32.xlu1 %v4181_v31, %s3907_s29 }
  0xa3   :  { %624 = vrot.lane.b32.xlu0 %v4346_v49, %s3909_s26  ;;  %3670 = vmatprep.mubr.msk.f32.mxu0 %vm940_vm4, %v882_v53 }
  0xa4   :  { %v157_v56 = vpop.permute.xlu1 %156 }
  0xa5   :  { %v597_v57 = vpop.permute.xlu0 %596  ;;  %v738_v7 = vsel %vm730_vm0, %v4031_v11, %v157_v56 }
  0xa6   :  { %v883_v58 = vsel %vm877_vm3, %v834_v55, %v597_v57  ;;  %332 = vrot.lane.b32.xlu1 %v4233_v35, %s3906_s28 }
  0xa7   :  { %330 = vrot.lane.b32.xlu0 %v4224_v34, %s3906_s28  ;;  %3671 = vmatmul.mubr.msk.f32.gmra.mxu0 %vm940_vm4, %v883_v58 }
  0xa8   :  { %v305_v3 = vpop.permute.xlu1 %304 }
  0xa9   :  { %v303_v59 = vpop.permute.xlu0 %302  ;;  %v787_v23 = vsel %vm779_vm1, %v738_v7, %v305_v3  ;;  %v4448_v3 = vld [vmem:[%s7008_s0 + $0x140] sm:$0xff] }
  0xaa   :  { %480 = vrot.lane.b32.xlu1 %v4309_v13, %s3908_s15  ;;  %v786_v9 = vsel %vm779_vm1, %v737_v6, %v303_v59 }
  0xab   :  { %478 = vrot.lane.b32.xlu0 %v4295_v61, %s3908_s15 }
  0xac   :  { %v453_v62 = vpop.permute.xlu1 %452 }
  0xad   :  { %v451_v63 = vpop.permute.xlu0 %450  ;;  %v836_v25 = vsel %vm828_vm2, %v787_v23, %v453_v62 }
  0xae   :  { %186 = vrot.lane.b32.xlu1 %v4198_v32, %s3907_s29  ;;  %v835_v14 = vsel %vm828_vm2, %v786_v9, %v451_v63  ;;  %v4460_v9 = vld [vmem:[%s7008_s0 + $0x148] sm:$0xff] }
  0xaf   :  { %626 = vrot.lane.b32.xlu0 %v4372_v60, %s3909_s26 }
  0xb0   :  { %v159_v17 = vpop.permute.xlu1 %158 }
  0xb1   :  { %v599_v20 = vpop.permute.xlu0 %598  ;;  %v739_v45 = vsel %vm730_vm0, %v3966_v0, %v159_v17 }
  0xb2   :  { %v884_v21 = vsel %vm877_vm3, %v835_v14, %v599_v20  ;;  %188 = vrot.lane.b32.xlu1 %v4207_v33, %s3907_s29 }
  0xb3   :  { %628 = vrot.lane.b32.xlu0 %v4384_v10, %s3909_s26  ;;  %3673 = vmatprep.mubr.msk.f32.mxu0 %vm940_vm4, %v884_v21 }
  0xb4   :  { %v161_v36 = vpop.permute.xlu1 %160 }
  0xb5   :  { %v601_v37 = vpop.permute.xlu0 %600  ;;  %v740_v0 = vsel %vm730_vm0, %v3980_v2, %v161_v36 }
  0xb6   :  { %v885_v38 = vsel %vm877_vm3, %v836_v25, %v601_v37  ;;  %336 = vrot.lane.b32.xlu1 %v4267_v47, %s3906_s28 }
  0xb7   :  { %334 = vrot.lane.b32.xlu0 %v4253_v41, %s3906_s28  ;;  %3674 = vmatmul.mubr.msk.f32.gmra.mxu0 %vm940_vm4, %v885_v38 }
  0xb8   :  { %v309_v11 = vpop.permute.xlu1 %308 }
  0xb9   :  { %v307_v39 = vpop.permute.xlu0 %306  ;;  %v789_v1 = vsel %vm779_vm1, %v740_v0, %v309_v11  ;;  %v4486_v11 = vld [vmem:[%s7008_s0 + $0x150] sm:$0xff] }
  0xba   :  { %484 = vrot.lane.b32.xlu1 %v4346_v49, %s3908_s15  ;;  %v788_v46 = vsel %vm779_vm1, %v739_v45, %v307_v39 }
  0xbb   :  { %482 = vrot.lane.b32.xlu0 %v4334_v43, %s3908_s15 }
  0xbc   :  { %v457_v42 = vpop.permute.xlu1 %456 }
  0xbd   :  { %v455_v44 = vpop.permute.xlu0 %454  ;;  %v838_v54 = vsel %vm828_vm2, %v789_v1, %v457_v42 }
  0xbe   :  { %190 = vrot.lane.b32.xlu1 %v4224_v34, %s3907_s29  ;;  %v837_v50 = vsel %vm828_vm2, %v788_v46, %v455_v44  ;;  %v4498_v46 = vld [vmem:[%s7008_s0 + $0x158] sm:$0xff] }
  0xbf   :  { %630 = vrot.lane.b32.xlu0 %v4410_v40, %s3909_s26 }
  0xc0   :  { %v163_v51 = vpop.permute.xlu1 %162 }
  0xc1   :  { %v603_v52 = vpop.permute.xlu0 %602  ;;  %v741_v63 = vsel %vm730_vm0, %v4056_v16, %v163_v51 }
  0xc2   :  { %v886_v53 = vsel %vm877_vm3, %v837_v50, %v603_v52  ;;  %192 = vrot.lane.b32.xlu1 %v4233_v35, %s3907_s29 }
  0xc3   :  { %632 = vrot.lane.b32.xlu0 %v4422_v48, %s3909_s26  ;;  %3676 = vmatprep.mubr.msk.f32.mxu0 %vm940_vm4, %v886_v53 }
  0xc4   :  { %v165_v55 = vpop.permute.xlu1 %164 }
  0xc5   :  { %v605_v56 = vpop.permute.xlu0 %604  ;;  %v742_v16 = vsel %vm730_vm0, %v4051_v15, %v165_v55 }
  0xc6   :  { %v887_v57 = vsel %vm877_vm3, %v838_v54, %v605_v56  ;;  %340 = vrot.lane.b32.xlu1 %v4309_v13, %s3906_s28 }
  0xc7   :  { %338 = vrot.lane.b32.xlu0 %v4295_v61, %s3906_s28  ;;  %3677 = vmatmul.mubr.msk.f32.gmra.mxu0 %vm940_vm4, %v887_v57 }
  0xc8   :  { %v313_v2 = vpop.permute.xlu1 %312 }
  0xc9   :  { %v311_v58 = vpop.permute.xlu0 %310  ;;  %v791_v7 = vsel %vm779_vm1, %v742_v16, %v313_v2  ;;  %v4524_v2 = vld [vmem:[%s7008_s0 + $0x160] sm:$0xff] }
  0xca   :  { %488 = vrot.lane.b32.xlu1 %v4384_v10, %s3908_s15  ;;  %v790_v6 = vsel %vm779_vm1, %v741_v63, %v311_v58 }
  0xcb   :  { %486 = vrot.lane.b32.xlu0 %v4372_v60, %s3908_s15 }
  0xcc   :  { %v461_v59 = vpop.permute.xlu1 %460 }
  0xcd   :  { %v459_v62 = vpop.permute.xlu0 %458  ;;  %v840_v23 = vsel %vm828_vm2, %v791_v7, %v461_v59 }
  0xce   :  { %194 = vrot.lane.b32.xlu1 %v4253_v41, %s3907_s29  ;;  %v839_v14 = vsel %vm828_vm2, %v790_v6, %v459_v62  ;;  %v4536_v6 = vld [vmem:[%s7008_s0 + $0x168] sm:$0xff] }
  0xcf   :  { %634 = vrot.lane.b32.xlu0 %v4448_v3, %s3909_s26 }
  0xd0   :  { %v167_v17 = vpop.permute.xlu1 %166 }
  0xd1   :  { %v607_v20 = vpop.permute.xlu0 %606  ;;  %v743_v44 = vsel %vm730_vm0, %v3999_v5, %v167_v17 }
  0xd2   :  { %v888_v21 = vsel %vm877_vm3, %v839_v14, %v607_v20  ;;  %196 = vrot.lane.b32.xlu1 %v4267_v47, %s3907_s29 }
  0xd3   :  { %636 = vrot.lane.b32.xlu0 %v4460_v9, %s3909_s26  ;;  %3679 = vmatprep.mubr.msk.f32.mxu0 %vm940_vm4, %v888_v21 }
  0xd4   :  { %v169_v25 = vpop.permute.xlu1 %168 }
  0xd5   :  { %v609_v36 = vpop.permute.xlu0 %608  ;;  %v744_v5 = vsel %vm730_vm0, %v3994_v4, %v169_v25 }
  0xd6   :  { %v889_v37 = vsel %vm877_vm3, %v840_v23, %v609_v36  ;;  %344 = vrot.lane.b32.xlu1 %v4346_v49, %s3906_s28 }
  0xd7   :  { %342 = vrot.lane.b32.xlu0 %v4334_v43, %s3906_s28  ;;  %3680 = vmatmul.mubr.msk.f32.gmra.mxu0 %vm940_vm4, %v889_v37 }
  0xd8   :  { %v317_v15 = vpop.permute.xlu1 %316 }
  0xd9   :  { %v315_v38 = vpop.permute.xlu0 %314  ;;  %v793_v0 = vsel %vm779_vm1, %v744_v5, %v317_v15  ;;  %v4562_v15 = vld [vmem:[%s7008_s0 + $0x170] sm:$0xff] }
  0xda   :  { %492 = vrot.lane.b32.xlu1 %v4422_v48, %s3908_s15  ;;  %v792_v45 = vsel %vm779_vm1, %v743_v44, %v315_v38 }
  0xdb   :  { %490 = vrot.lane.b32.xlu0 %v4410_v40, %s3908_s15 }
  0xdc   :  { %v465_v39 = vpop.permute.xlu1 %464 }
  0xdd   :  { %v463_v42 = vpop.permute.xlu0 %462  ;;  %v842_v1 = vsel %vm828_vm2, %v793_v0, %v465_v39 }
  0xde   :  { %198 = vrot.lane.b32.xlu1 %v4295_v61, %s3907_s29  ;;  %v841_v50 = vsel %vm828_vm2, %v792_v45, %v463_v42  ;;  %v4574_v45 = vld [vmem:[%s7008_s0 + $0x178] sm:$0xff] }
  0xdf   :  { %638 = vrot.lane.b32.xlu0 %v4486_v11, %s3909_s26 }
  0xe0   :  { %v171_v51 = vpop.permute.xlu1 %170 }
  0xe1   :  { %v611_v52 = vpop.permute.xlu0 %610  ;;  %v745_v62 = vsel %vm730_vm0, %v4073_v19, %v171_v51 }
  0xe2   :  { %v890_v53 = vsel %vm877_vm3, %v841_v50, %v611_v52  ;;  %200 = vrot.lane.b32.xlu1 %v4309_v13, %s3907_s29 }
  0xe3   :  { %640 = vrot.lane.b32.xlu0 %v4498_v46, %s3909_s26  ;;  %3682 = vmatprep.mubr.msk.f32.mxu0 %vm940_vm4, %v890_v53 }
  0xe4   :  { %v173_v54 = vpop.permute.xlu1 %172 }
  0xe5   :  { %v613_v55 = vpop.permute.xlu0 %612  ;;  %v746_v19 = vsel %vm730_vm0, %v4068_v18, %v173_v54 }
  0xe6   :  { %v891_v56 = vsel %vm877_vm3, %v842_v1, %v613_v55  ;;  %348 = vrot.lane.b32.xlu1 %v4384_v10, %s3906_s28 }
  0xe7   :  { %346 = vrot.lane.b32.xlu0 %v4372_v60, %s3906_s28  ;;  %3683 = vmatmul.mubr.msk.f32.gmra.mxu0 %vm940_vm4, %v891_v56 }
  0xe8   :  { %v321_v4 = vpop.permute.xlu1 %320 }
  0xe9   :  { %v319_v57 = vpop.permute.xlu0 %318  ;;  %v795_v16 = vsel %vm779_vm1, %v746_v19, %v321_v4  ;;  %v4600_v4 = vld [vmem:[%s7008_s0 + $0x180] sm:$0xff] }
  0xea   :  { %496 = vrot.lane.b32.xlu1 %v4460_v9, %s3908_s15  ;;  %v794_v63 = vsel %vm779_vm1, %v745_v62, %v319_v57 }
  0xeb   :  { %494 = vrot.lane.b32.xlu0 %v4448_v3, %s3908_s15 }
  0xec   :  { %v469_v58 = vpop.permute.xlu1 %468 }
  0xed   :  { %v467_v59 = vpop.permute.xlu0 %466  ;;  %v844_v7 = vsel %vm828_vm2, %v795_v16, %v469_v58 }
  0xee   :  { %202 = vrot.lane.b32.xlu1 %v4334_v43, %s3907_s29  ;;  %v843_v14 = vsel %vm828_vm2, %v794_v63, %v467_v59  ;;  %v4612_v63 = vld [vmem:[%s7008_s0 + $0x188] sm:$0xff] }
  0xef   :  { %642 = vrot.lane.b32.xlu0 %v4524_v2, %s3909_s26 }
  0xf0   :  { %v175_v17 = vpop.permute.xlu1 %174 }
  0xf1   :  { %v615_v20 = vpop.permute.xlu0 %614  ;;  %v747_v42 = vsel %vm730_vm0, %v4016_v8, %v175_v17 }
  0xf2   :  { %v892_v21 = vsel %vm877_vm3, %v843_v14, %v615_v20  ;;  %204 = vrot.lane.b32.xlu1 %v4346_v49, %s3907_s29 }
  0xf3   :  { %644 = vrot.lane.b32.xlu0 %v4536_v6, %s3909_s26  ;;  %3685 = vmatprep.mubr.msk.f32.mxu0 %vm940_vm4, %v892_v21 }
  0xf4   :  { %v177_v23 = vpop.permute.xlu1 %176 }
  0xf5   :  { %v617_v25 = vpop.permute.xlu0 %616  ;;  %v748_v8 = vsel %vm730_vm0, %v4036_v12, %v177_v23 }
  0xf6   :  { %v893_v36 = vsel %vm877_vm3, %v844_v7, %v617_v25  ;;  %352 = vrot.lane.b32.xlu1 %v4422_v48, %s3906_s28 }
  0xf7   :  { %350 = vrot.lane.b32.xlu0 %v4410_v40, %s3906_s28  ;;  %3686 = vmatmul.mubr.msk.f32.gmra.mxu0 %vm940_vm4, %v893_v36 }
  0xf8   :  { %v325_v18 = vpop.permute.xlu1 %324 }
  0xf9   :  { %v323_v37 = vpop.permute.xlu0 %322  ;;  %v797_v5 = vsel %vm779_vm1, %v748_v8, %v325_v18  ;;  %v4638_v18 = vld [vmem:[%s7008_s0 + $0x190] sm:$0xff] }
  0xfa   :  { %500 = vrot.lane.b32.xlu1 %v4498_v46, %s3908_s15  ;;  %v796_v44 = vsel %vm779_vm1, %v747_v42, %v323_v37 }
  0xfb   :  { %498 = vrot.lane.b32.xlu0 %v4486_v11, %s3908_s15 }
  0xfc   :  { %v473_v38 = vpop.permute.xlu1 %472 }
  0xfd   :  { %v471_v39 = vpop.permute.xlu0 %470  ;;  %v846_v0 = vsel %vm828_vm2, %v797_v5, %v473_v38 }
  0xfe   :  { %206 = vrot.lane.b32.xlu1 %v4372_v60, %s3907_s29  ;;  %v845_v50 = vsel %vm828_vm2, %v796_v44, %v471_v39  ;;  %v4650_v44 = vld [vmem:[%s7008_s0 + $0x198] sm:$0xff] }
  0xff   :  { %646 = vrot.lane.b32.xlu0 %v4562_v15, %s3909_s26 }
 0x100   :  { %v179_v51 = vpop.permute.xlu1 %178 }
 0x101   :  { %v619_v52 = vpop.permute.xlu0 %618  ;;  %v749_v59 = vsel %vm730_vm0, %v4088_v22, %v179_v51 }
 0x102   :  { %v894_v53 = vsel %vm877_vm3, %v845_v50, %v619_v52  ;;  %208 = vrot.lane.b32.xlu1 %v4384_v10, %s3907_s29 }
 0x103   :  { %648 = vrot.lane.b32.xlu0 %v4574_v45, %s3909_s26  ;;  %3688 = vmatprep.mubr.msk.f32.mxu0 %vm940_vm4, %v894_v53 }
 0x104   :  { %v181_v1 = vpop.permute.xlu1 %180 }
 0x105   :  { %v621_v54 = vpop.permute.xlu0 %620  ;;  %v750_v22 = vsel %vm730_vm0, %v4100_v24, %v181_v1 }
 0x106   :  { %v895_v55 = vsel %vm877_vm3, %v846_v0, %v621_v54  ;;  %356 = vrot.lane.b32.xlu1 %v4460_v9, %s3906_s28 }
 0x107   :  { %354 = vrot.lane.b32.xlu0 %v4448_v3, %s3906_s28  ;;  %3689 = vmatmul.mubr.msk.f32.gmra.mxu0 %vm940_vm4, %v895_v55 }
 0x108   :  { %v329_v12 = vpop.permute.xlu1 %328 }
 0x109   :  { %v327_v56 = vpop.permute.xlu0 %326  ;;  %v799_v19 = vsel %vm779_vm1, %v750_v22, %v329_v12  ;;  %v4676_v12 = vld [vmem:[%s7008_s0 + $0x1a0] sm:$0xff] }
 0x10a   :  { %504 = vrot.lane.b32.xlu1 %v4536_v6, %s3908_s15  ;;  %v798_v62 = vsel %vm779_vm1, %v749_v59, %v327_v56 }
 0x10b   :  { %502 = vrot.lane.b32.xlu0 %v4524_v2, %s3908_s15 }
 0x10c   :  { %v477_v57 = vpop.permute.xlu1 %476 }
 0x10d   :  { %v475_v58 = vpop.permute.xlu0 %474  ;;  %v848_v16 = vsel %vm828_vm2, %v799_v19, %v477_v57 }
 0x10e   :  { %210 = vrot.lane.b32.xlu1 %v4410_v40, %s3907_s29  ;;  %v847_v14 = vsel %vm828_vm2, %v798_v62, %v475_v58  ;;  %v4688_v62 = vld [vmem:[%s7008_s0 + $0x1a8] sm:$0xff] }
 0x10f   :  { %650 = vrot.lane.b32.xlu0 %v4600_v4, %s3909_s26 }
 0x110   :  { %v183_v17 = vpop.permute.xlu1 %182 }
 0x111   :  { %v623_v20 = vpop.permute.xlu0 %622  ;;  %v751_v39 = vsel %vm730_vm0, %v4120_v26, %v183_v17 }
 0x112   :  { %v896_v21 = vsel %vm877_vm3, %v847_v14, %v623_v20  ;;  %212 = vrot.lane.b32.xlu1 %v4422_v48, %s3907_s29 }
 0x113   :  { %652 = vrot.lane.b32.xlu0 %v4612_v63, %s3909_s26  ;;  %3691 = vmatprep.mubr.msk.f32.mxu0 %vm940_vm4, %v896_v21 }
 0x114   :  { %v185_v7 = vpop.permute.xlu1 %184 }
 0x115   :  { %v625_v23 = vpop.permute.xlu0 %624  ;;  %v752_v26 = vsel %vm730_vm0, %v4129_v27, %v185_v7 }
 0x116   :  { %v897_v25 = vsel %vm877_vm3, %v848_v16, %v625_v23  ;;  %360 = vrot.lane.b32.xlu1 %v4498_v46, %s3906_s28 }
 0x117   :  { %358 = vrot.lane.b32.xlu0 %v4486_v11, %s3906_s28  ;;  %3692 = vmatmul.mubr.msk.f32.gmra.mxu0 %vm940_vm4, %v897_v25 }
 0x118   :  { %v333_v24 = vpop.permute.xlu1 %332 }
 0x119   :  { %v331_v36 = vpop.permute.xlu0 %330  ;;  %v801_v8 = vsel %vm779_vm1, %v752_v26, %v333_v24  ;;  %v4714_v24 = vld [vmem:[%s7008_s0 + $0x1b0] sm:$0xff] }
 0x11a   :  { %508 = vrot.lane.b32.xlu1 %v4574_v45, %s3908_s15  ;;  %v800_v42 = vsel %vm779_vm1, %v751_v39, %v331_v36 }
 0x11b   :  { %506 = vrot.lane.b32.xlu0 %v4562_v15, %s3908_s15 }
 0x11c   :  { %v481_v37 = vpop.permute.xlu1 %480 }
 0x11d   :  { %v479_v38 = vpop.permute.xlu0 %478  ;;  %v850_v5 = vsel %vm828_vm2, %v801_v8, %v481_v37 }
 0x11e   :  { %214 = vrot.lane.b32.xlu1 %v4448_v3, %s3907_s29  ;;  %v849_v50 = vsel %vm828_vm2, %v800_v42, %v479_v38  ;;  %v4726_v42 = vld [vmem:[%s7008_s0 + $0x1b8] sm:$0xff] }
 0x11f   :  { %654 = vrot.lane.b32.xlu0 %v4638_v18, %s3909_s26 }
 0x120   :  { %v187_v51 = vpop.permute.xlu1 %186 }
 0x121   :  { %v627_v52 = vpop.permute.xlu0 %626  ;;  %v753_v58 = vsel %vm730_vm0, %v4146_v28, %v187_v51 }
 0x122   :  { %v898_v53 = vsel %vm877_vm3, %v849_v50, %v627_v52  ;;  %216 = vrot.lane.b32.xlu1 %v4460_v9, %s3907_s29 }
 0x123   :  { %656 = vrot.lane.b32.xlu0 %v4650_v44, %s3909_s26  ;;  %3694 = vmatprep.mubr.msk.f32.mxu0 %vm940_vm4, %v898_v53 }
 0x124   :  { %v189_v0 = vpop.permute.xlu1 %188 }
 0x125   :  { %v629_v1 = vpop.permute.xlu0 %628  ;;  %v754_v28 = vsel %vm730_vm0, %v4155_v29, %v189_v0 }
 0x126   :  { %v899_v54 = vsel %vm877_vm3, %v850_v5, %v629_v1  ;;  %364 = vrot.lane.b32.xlu1 %v4536_v6, %s3906_s28 }
 0x127   :  { %362 = vrot.lane.b32.xlu0 %v4524_v2, %s3906_s28  ;;  %3695 = vmatmul.mubr.msk.f32.gmra.mxu0 %vm940_vm4, %v899_v54 }
 0x128   :  { %v337_v27 = vpop.permute.xlu1 %336 }
 0x129   :  { %v335_v55 = vpop.permute.xlu0 %334  ;;  %v803_v22 = vsel %vm779_vm1, %v754_v28, %v337_v27  ;;  %v86_v27 = vld [vmem:[%s7008_s0 + $0x1c0] sm:$0xff] }
 0x12a   :  { %512 = vrot.lane.b32.xlu1 %v4612_v63, %s3908_s15  ;;  %v802_v59 = vsel %vm779_vm1, %v753_v58, %v335_v55 }
 0x12b   :  { %510 = vrot.lane.b32.xlu0 %v4600_v4, %s3908_s15 }
 0x12c   :  { %v485_v56 = vpop.permute.xlu1 %484 }
 0x12d   :  { %v483_v57 = vpop.permute.xlu0 %482  ;;  %v852_v19 = vsel %vm828_vm2, %v803_v22, %v485_v56 }
 0x12e   :  { %218 = vrot.lane.b32.xlu1 %v4486_v11, %s3907_s29  ;;  %v851_v14 = vsel %vm828_vm2, %v802_v59, %v483_v57  ;;  %v87_v59 = vld [vmem:[%s7008_s0 + $0x1c8] sm:$0xff] }
 0x12f   :  { %658 = vrot.lane.b32.xlu0 %v4676_v12, %s3909_s26 }
 0x130   :  { %v191_v17 = vpop.permute.xlu1 %190 }
 0x131   :  { %v631_v20 = vpop.permute.xlu0 %630  ;;  %v755_v38 = vsel %vm730_vm0, %v4172_v30, %v191_v17 }
 0x132   :  { %v900_v21 = vsel %vm877_vm3, %v851_v14, %v631_v20  ;;  %220 = vrot.lane.b32.xlu1 %v4498_v46, %s3907_s29 }
 0x133   :  { %660 = vrot.lane.b32.xlu0 %v4688_v62, %s3909_s26  ;;  %3697 = vmatprep.mubr.msk.f32.mxu0 %vm940_vm4, %v900_v21 }
 0x134   :  { %v193_v16 = vpop.permute.xlu1 %192 }
 0x135   :  { %v633_v7 = vpop.permute.xlu0 %632  ;;  %v756_v30 = vsel %vm730_vm0, %v4181_v31, %v193_v16 }
 0x136   :  { %v901_v23 = vsel %vm877_vm3, %v852_v19, %v633_v7  ;;  %368 = vrot.lane.b32.xlu1 %v4574_v45, %s3906_s28 }
 0x137   :  { %366 = vrot.lane.b32.xlu0 %v4562_v15, %s3906_s28  ;;  %3698 = vmatmul.mubr.msk.f32.gmra.mxu0 %vm940_vm4, %v901_v23 }
 0x138   :  { %v341_v29 = vpop.permute.xlu1 %340 }
 0x139   :  { %v339_v25 = vpop.permute.xlu0 %338  ;;  %v805_v26 = vsel %vm779_vm1, %v756_v30, %v341_v29  ;;  %v4784_v29 = vld [vmem:[%s7008_s0 + $0x1d0] sm:$0xff] }
 0x13a   :  { %516 = vrot.lane.b32.xlu1 %v4650_v44, %s3908_s15  ;;  %v804_v39 = vsel %vm779_vm1, %v755_v38, %v339_v25 }
 0x13b   :  { %514 = vrot.lane.b32.xlu0 %v4638_v18, %s3908_s15 }
 0x13c   :  { %v489_v36 = vpop.permute.xlu1 %488 }
 0x13d   :  { %v487_v37 = vpop.permute.xlu0 %486  ;;  %v854_v8 = vsel %vm828_vm2, %v805_v26, %v489_v36 }
 0x13e   :  { %222 = vrot.lane.b32.xlu1 %v4524_v2, %s3907_s29  ;;  %v853_v50 = vsel %vm828_vm2, %v804_v39, %v487_v37  ;;  %v89_v39 = vld [vmem:[%s7008_s0 + $0x1d8] sm:$0xff] }
 0x13f   :  { %662 = vrot.lane.b32.xlu0 %v4714_v24, %s3909_s26 }
 0x140   :  { %v195_v51 = vpop.permute.xlu1 %194 }
 0x141   :  { %v635_v52 = vpop.permute.xlu0 %634  ;;  %v757_v57 = vsel %vm730_vm0, %v4198_v32, %v195_v51 }
 0x142   :  { %v902_v53 = vsel %vm877_vm3, %v853_v50, %v635_v52  ;;  %224 = vrot.lane.b32.xlu1 %v4536_v6, %s3907_s29 }
 0x143   :  { %664 = vrot.lane.b32.xlu0 %v4726_v42, %s3909_s26  ;;  %3700 = vmatprep.mubr.msk.f32.mxu0 %vm940_vm4, %v902_v53 }
 0x144   :  { %v197_v5 = vpop.permute.xlu1 %196 }
 0x145   :  { %v637_v0 = vpop.permute.xlu0 %636  ;;  %v758_v32 = vsel %vm730_vm0, %v4207_v33, %v197_v5 }
 0x146   :  { %v903_v1 = vsel %vm877_vm3, %v854_v8, %v637_v0  ;;  %372 = vrot.lane.b32.xlu1 %v4612_v63, %s3906_s28 }
 0x147   :  { %370 = vrot.lane.b32.xlu0 %v4600_v4, %s3906_s28  ;;  %3701 = vmatmul.mubr.msk.f32.gmra.mxu0 %vm940_vm4, %v903_v1  ;;  %v3666_v5 = vpop.f32.mrf.mxu0 }
 0x148   :  { %v345_v31 = vpop.permute.xlu1 %344 }
 0x149   :  { %v343_v54 = vpop.permute.xlu0 %342  ;;  %v807_v28 = vsel %vm779_vm1, %v758_v32, %v345_v31  ;;  %v1151_v1 = vpop.f32.mrf.mxu0  ;;  %v936_v31 = vlaneseq }
 0x14a   :  { %520 = vrot.lane.b32.xlu1 %v4688_v62, %s3908_s15  ;;  %v806_v58 = vsel %vm779_vm1, %v757_v57, %v343_v54 }
 0x14b   :  { %518 = vrot.lane.b32.xlu0 %v4676_v12, %s3908_s15  ;;  %v4817_v57 = vshrl.u32 %v936_v31, 7 }
 0x14c   :  { %v493_v55 = vpop.permute.xlu1 %492 }
 0x14d   :  { %v491_v56 = vpop.permute.xlu0 %490  ;;  %v856_v22 = vsel %vm828_vm2, %v807_v28, %v493_v55  ;;  %v90_v55 = vld [vmem:[%s7008_s0 + $0x1e0] sm:$0xff]  ;;  %7034 = vst [vmem:[#allocation5_spill] sm:$0xff] %v4817_v57 }
 0x14e   :  { %226 = vrot.lane.b32.xlu1 %v4562_v15, %s3907_s29  ;;  %v855_v14 = vsel %vm828_vm2, %v806_v58, %v491_v56  ;;  %v27_v28 = vld [vmem:[%s7014_s6] sm:$0xff] }
 0x14f   :  { %666 = vrot.lane.b32.xlu0 %v86_v27, %s3909_s26 }
 0x150   :  { %v199_v17 = vpop.permute.xlu1 %198 }
 0x151   :  { %v639_v20 = vpop.permute.xlu0 %638  ;;  %v759_v37 = vsel %vm730_vm0, %v4224_v34, %v199_v17 }
 0x152   :  { %v904_v21 = vsel %vm877_vm3, %v855_v14, %v639_v20  ;;  %228 = vrot.lane.b32.xlu1 %v4574_v45, %s3907_s29 }
 0x153   :  { %668 = vrot.lane.b32.xlu0 %v87_v59, %s3909_s26  ;;  %3703 = vmatprep.mubr.msk.f32.mxu0 %vm940_vm4, %v904_v21 }
 0x154   :  { %v201_v19 = vpop.permute.xlu1 %200 }
 0x155   :  { %v641_v16 = vpop.permute.xlu0 %640  ;;  %v760_v34 = vsel %vm730_vm0, %v4233_v35, %v201_v19 }
 0x156   :  { %v905_v7 = vsel %vm877_vm3, %v856_v22, %v641_v16  ;;  %376 = vrot.lane.b32.xlu1 %v4650_v44, %s3906_s28 }
 0x157   :  { %374 = vrot.lane.b32.xlu0 %v4638_v18, %s3906_s28  ;;  %3704 = vmatmul.mubr.msk.f32.gmra.mxu0 %vm940_vm4, %v905_v7  ;;  %v3669_v54 = vpop.f32.mrf.mxu0 }
 0x158   :  { %v349_v33 = vpop.permute.xlu1 %348 }
 0x159   :  { %v347_v23 = vpop.permute.xlu0 %346  ;;  %v1161_v58 = vpop.f32.mrf.mxu0 }
 0x15a   :  { %524 = vrot.lane.b32.xlu1 %v4726_v42, %s3908_s15  ;;  %v808_v38 = vsel %vm779_vm1, %v759_v37, %v347_v23 }
 0x15b   :  { %522 = vrot.lane.b32.xlu0 %v4714_v24, %s3908_s15 }
 0x15c   :  { %v497_v25 = vpop.permute.xlu1 %496 }
 0x15d   :  { %v495_v36 = vpop.permute.xlu0 %494 }
 0x15e   :  { %230 = vrot.lane.b32.xlu1 %v4600_v4, %s3907_s29  ;;  %v857_v50 = vsel %vm828_vm2, %v808_v38, %v495_v36  ;;  %v809_v4 = vsel %vm779_vm1, %v760_v34, %v349_v33 }
 0x15f   :  { %670 = vrot.lane.b32.xlu0 %v4784_v29, %s3909_s26  ;;  %v858_v30 = vsel %vm828_vm2, %v809_v4, %v497_v25 }
 0x160   :  { %v203_v51 = vpop.permute.xlu1 %202 }
 0x161   :  { %v643_v52 = vpop.permute.xlu0 %642 }
 0x162   :  { %v906_v53 = vsel %vm877_vm3, %v857_v50, %v643_v52  ;;  %232 = vrot.lane.b32.xlu1 %v4612_v63, %s3907_s29  ;;  %v92_v52 = vld [vmem:[%s7008_s0 + $0x1f0] sm:$0xff] }
 0x163   :  { %672 = vrot.lane.b32.xlu0 %v89_v39, %s3909_s26  ;;  %3706 = vmatprep.mubr.msk.f32.mxu0 %vm940_vm4, %v906_v53 }
 0x164   :  { %v205_v26 = vpop.permute.xlu1 %204 }
 0x165   :  { %v645_v8 = vpop.permute.xlu0 %644 }
 0x166   :  { %v907_v0 = vsel %vm877_vm3, %v858_v30, %v645_v8  ;;  %380 = vrot.lane.b32.xlu1 %v4688_v62, %s3906_s28 }
 0x167   :  { %378 = vrot.lane.b32.xlu0 %v4676_v12, %s3906_s28  ;;  %3707 = vmatmul.mubr.msk.f32.gmra.mxu0 %vm940_vm4, %v907_v0  ;;  %v761_v12 = vsel %vm730_vm0, %v4253_v41, %v203_v51  ;;  %v3672_v21 = vpop.f32.mrf.mxu0  ;;  %v4831_v41 = vsub.s32 0, %v4817_v57 }
 0x168   :  { %v353_v35 = vpop.permute.xlu1 %352 }
 0x169   :  { %v351_v63 = vpop.permute.xlu0 %350  ;;  %7035 = vst [vmem:[#allocation6_spill] sm:$0xff] %v4831_v41  ;;  %v1171_v33 = vpop.f32.mrf.mxu0  ;;  %v4846_v23 = vrot.slane %v27_v28, %v4831_v41 }
 0x16a   :  { %528 = vrot.lane.b32.xlu1 %v87_v59, %s3908_s15  ;;  %v91_v59 = vld [vmem:[%s7008_s0 + $0x1e8] sm:$0xff] }
 0x16b   :  { %526 = vrot.lane.b32.xlu0 %v86_v27, %s3908_s15  ;;  %v810_v27 = vsel %vm779_vm1, %v761_v12, %v351_v63  ;;  %v1177_v25 = vadd.f32 %v3672_v21, %v4846_v23  ;;  %v1172_v38 = vadd.f32 %v1171_v33, %v4846_v23  ;;  %v1157_v50 = vadd.f32 %v3666_v5, %v4846_v23 }
 0x16c   :  { %v501_v56 = vpop.permute.xlu1 %500 }
 0x16d   :  { %v499_v62 = vpop.permute.xlu0 %498  ;;  %v1395_v53 = vmax.f32 %v1177_v25, 0.0  ;;  %v1391_v8 = vmax.f32 %v1157_v50, 0.0 }
 0x16e   :  { %234 = vrot.lane.b32.xlu1 %v4638_v18, %s3907_s29  ;;  %v859_v14 = vsel %vm828_vm2, %v810_v27, %v499_v62  ;;  %v762_v18 = vsel %vm730_vm0, %v4267_v47, %v205_v26  ;;  %v1394_v26 = vmax.f32 %v1172_v38, 0.0 }
 0x16f   :  { %674 = vrot.lane.b32.xlu0 %v90_v55, %s3909_s26  ;;  %v811_v22 = vsel %vm779_vm1, %v762_v18, %v353_v35  ;;  %v1162_v35 = vadd.f32 %v1161_v58, %v4846_v23 }
 0x170   :  { %v207_v17 = vpop.permute.xlu1 %206  ;;  %v860_v19 = vsel %vm828_vm2, %v811_v22, %v501_v56 }
 0x171   :  { %v647_v20 = vpop.permute.xlu0 %646  ;;  %v763_v5 = vsel %vm730_vm0, %v4295_v61, %v207_v17  ;;  %v1392_v58 = vmax.f32 %v1162_v35, 0.0 }
 0x172   :  { %v908_v32 = vsel %vm877_vm3, %v859_v14, %v647_v20  ;;  %236 = vrot.lane.b32.xlu1 %v4650_v44, %s3907_s29 }
 0x173   :  { %676 = vrot.lane.b32.xlu0 %v91_v59, %s3909_s26  ;;  %3709 = vmatprep.mubr.msk.f32.mxu0 %vm940_vm4, %v908_v32 }
 0x174   :  { %v209_v16 = vpop.permute.xlu1 %208 }
 0x175   :  { %v649_v7 = vpop.permute.xlu0 %648  ;;  %v764_v59 = vsel %vm730_vm0, %v4309_v13, %v209_v16 }
 0x176   :  { %v909_v47 = vsel %vm877_vm3, %v860_v19, %v649_v7  ;;  %384 = vrot.lane.b32.xlu1 %v4726_v42, %s3906_s28  ;;  %v1152_v42 = vadd.f32 %v1151_v1, %v4846_v23  ;;  %v4875_v1 = vmax.f32 %v1391_v8, %v1395_v53 }
 0x177   :  { %382 = vrot.lane.b32.xlu0 %v4714_v24, %s3906_s28  ;;  %v3675_v44 = vpop.f32.mrf.mxu0  ;;  %3710 = vmatmul.mubr.msk.f32.gmra.mxu0 %vm940_vm4, %v909_v47  ;;  %v93_v24 = vld [vmem:[%s7008_s0 + $0x1f8] sm:$0xff]  ;;  %s3910_s0 = smov 120  }
 0x178   :  { %v357_v36 = vpop.permute.xlu1 %356  ;;  %v1187_v34 = vadd.f32 %v3675_v44, %v4846_v23  ;;  %v1390_v0 = vmax.f32 %v1152_v42, 0.0 }
 0x179   :  { %v355_v37 = vpop.permute.xlu0 %354  ;;  %v1181_v51 = vpop.f32.mrf.mxu0  ;;  %v813_v14 = vsel %vm779_vm1, %v764_v59, %v357_v36 }
 0x17a   :  { %532 = vrot.lane.b32.xlu1 %v89_v39, %s3908_s15  ;;  %v1182_v39 = vadd.f32 %v1181_v51, %v4846_v23  ;;  %v812_v63 = vsel %vm779_vm1, %v763_v5, %v355_v37  ;;  %v1397_v31 = vmax.f32 %v1187_v34, 0.0 }
 0x17b   :  { %530 = vrot.lane.b32.xlu0 %v4784_v29, %s3908_s15  ;;  %v1167_v29 = vadd.f32 %v3669_v54, %v4846_v23  ;;  %v4878_v54 = vmax.f32 %v1390_v0, %v1394_v26 }
 0x17c   :  { %v505_v4 = vpop.permute.xlu1 %504  ;;  %v1396_v12 = vmax.f32 %v1182_v39, 0.0 }
 0x17d   :  { %v503_v30 = vpop.permute.xlu0 %502  ;;  %v1393_v27 = vmax.f32 %v1167_v29, 0.0  ;;  %v862_v20 = vsel %vm828_vm2, %v813_v14, %v505_v4 }
 0x17e   :  { %680 = vrot.lane.b32.xlu1 %v93_v24, %s3909_s26  ;;  %v861_v55 = vsel %vm828_vm2, %v812_v63, %v503_v30  ;;  %v4892_v18 = vmax.f32 %v1392_v58, %v1396_v12 }
 0x17f   :  { %678 = vrot.lane.b32.xlu0 %v92_v52, %s3909_s26  ;;  %v4889_v17 = vmax.f32 %v1393_v27, %v1397_v31 }
 0x180   :  { %v211_v56 = vpop.permute.xlu1 %210 }
 0x181   :  { %v651_v62 = vpop.permute.xlu0 %650  ;;  %v765_v7 = vsel %vm730_vm0, %v4334_v43, %v211_v56 }
 0x182   :  { %v910_v61 = vsel %vm877_vm3, %v861_v55, %v651_v62  ;;  %1488 = vrot.lane.b32.xlu1 %v4875_v1, %s3910_s0 }
 0x183   :  { %3712 = vmatprep.mubr.msk.f32.mxu0 %vm940_vm4, %v910_v61  ;;  %1486 = vrot.lane.b32.xlu0 %v4878_v54, %s3910_s0 }
 0x184   :  { %v213_v21 = vpop.permute.xlu1 %212 }
 0x185   :  { %v653_v32 = vpop.permute.xlu0 %652  ;;  %v766_v37 = vsel %vm730_vm0, %v4346_v49, %v213_v21 }
 0x186   :  { %v911_v13 = vsel %vm877_vm3, %v862_v20, %v653_v32  ;;  %1492 = vrot.lane.b32.xlu1 %v4889_v17, %s3910_s0 }
 0x187   :  { %3713 = vmatmul.mubr.msk.f32.gmra.mxu0 %vm940_vm4, %v911_v13  ;;  %1490 = vrot.lane.b32.xlu0 %v4892_v18, %s3910_s0  ;;  %v3678_v53 = vpop.f32.mrf.mxu0 }
 0x188   :  { %v361_v28 = vpop.permute.xlu1 %360  ;;  %v1197_v12 = vadd.f32 %v3678_v53, %v4846_v23 }
 0x189   :  { %v359_v22 = vpop.permute.xlu0 %358  ;;  %v815_v38 = vsel %vm779_vm1, %v766_v37, %v361_v28  ;;  %v1191_v30 = vpop.f32.mrf.mxu0 }
 0x18a   :  { %v814_v33 = vsel %vm779_vm1, %v765_v7, %v359_v22  ;;  %v1192_v27 = vadd.f32 %v1191_v30, %v4846_v23  ;;  %v1399_v20 = vmax.f32 %v1197_v12, 0.0 }
 0x18c   :  { %v509_v19 = vpop.permute.xlu1 %508  ;;  %v1398_v13 = vmax.f32 %v1192_v27, 0.0 }
 0x18d   :  { %v507_v16 = vpop.permute.xlu0 %506  ;;  %v864_v50 = vsel %vm828_vm2, %v815_v38, %v509_v19 }
 0x18e   :  { %v863_v47 = vsel %vm828_vm2, %v814_v33, %v507_v16 }
 0x190   :  { %v215_v44 = vpop.permute.xlu1 %214 }
 0x191   :  { %v655_v25 = vpop.permute.xlu0 %654  ;;  %v767_v49 = vsel %vm730_vm0, %v4372_v60, %v215_v44 }
 0x192   :  { %v912_v36 = vsel %vm877_vm3, %v863_v47, %v655_v25 }
 0x193   :  { %3715 = vmatprep.mubr.msk.f32.mxu0 %vm940_vm4, %v912_v36 }
 0x194   :  { %v217_v51 = vpop.permute.xlu1 %216 }
 0x195   :  { %v657_v42 = vpop.permute.xlu0 %656  ;;  %v768_v35 = vsel %vm730_vm0, %v4384_v10, %v217_v51 }
 0x196   :  { %v913_v43 = vsel %vm877_vm3, %v864_v50, %v657_v42 }
 0x197   :  { %3716 = vmatmul.mubr.msk.f32.gmra.mxu0 %vm940_vm4, %v913_v43  ;;  %v3681_v5 = vpop.f32.mrf.mxu0 }
 0x198   :  { %v365_v24 = vpop.permute.xlu1 %364 }
 0x199   :  { %v363_v52 = vpop.permute.xlu0 %362  ;;  %v817_v63 = vsel %vm779_vm1, %v768_v35, %v365_v24  ;;  %v1201_v56 = vpop.f32.mrf.mxu0  ;;  %v1207_v24 = vadd.f32 %v3681_v5, %v4846_v23 }
 0x19a   :  { %v816_v26 = vsel %vm779_vm1, %v767_v49, %v363_v52  ;;  %v1202_v53 = vadd.f32 %v1201_v56, %v4846_v23 }
 0x19b   :  { %v1401_v30 = vmax.f32 %v1207_v24, 0.0 }
 0x19c   :  { %v513_v34 = vpop.permute.xlu1 %512 }
 0x19d   :  { %v511_v4 = vpop.permute.xlu0 %510  ;;  %v866_v31 = vsel %vm828_vm2, %v817_v63, %v513_v34 }
 0x19e   :  { %v865_v39 = vsel %vm828_vm2, %v816_v26, %v511_v4 }
 0x1a0   :  { %v219_v8 = vpop.permute.xlu1 %218 }
 0x1a1   :  { %v659_v29 = vpop.permute.xlu0 %658  ;;  %v769_v7 = vsel %vm730_vm0, %v4410_v40, %v219_v8  ;;  %v1400_v8 = vmax.f32 %v1202_v53, 0.0 }
 0x1a2   :  { %v914_v0 = vsel %vm877_vm3, %v865_v39, %v659_v29 }
 0x1a3   :  { %3718 = vmatprep.mubr.msk.f32.mxu0 %vm940_vm4, %v914_v0 }
 0x1a4   :  { %v221_v60 = vpop.permute.xlu1 %220 }
 0x1a5   :  { %v661_v55 = vpop.permute.xlu0 %660  ;;  %v770_v38 = vsel %vm730_vm0, %v4422_v48, %v221_v60 }
 0x1a6   :  { %v915_v62 = vsel %vm877_vm3, %v866_v31, %v661_v55 }
 0x1a7   :  { %3719 = vmatmul.mubr.msk.f32.gmra.mxu0 %vm940_vm4, %v915_v62  ;;  %v3684_v61 = vpop.f32.mrf.mxu0 }
 0x1a8   :  { %v1217_v10 = vadd.f32 %v3684_v61, %v4846_v23  ;;  %v369_v59 = vpop.permute.xlu1 %368 }
 0x1a9   :  { %v367_v58 = vpop.permute.xlu0 %366  ;;  %v1211_v14 = vpop.f32.mrf.mxu0  ;;  %v819_v40 = vsel %vm779_vm1, %v770_v38, %v369_v59 }
 0x1aa   :  { %v1403_v21 = vmax.f32 %v1217_v10, 0.0  ;;  %v1212_v32 = vadd.f32 %v1211_v14, %v4846_v23  ;;  %v818_v47 = vsel %vm779_vm1, %v769_v7, %v367_v58 }
 0x1ac   :  { %v4928_v28 = vmax.f32 %v1399_v20, %v1403_v21  ;;  %v1402_v22 = vmax.f32 %v1212_v32, 0.0  ;;  %v517_v19 = vpop.permute.xlu1 %516 }
 0x1ad   :  { %v515_v16 = vpop.permute.xlu0 %514  ;;  %v868_v50 = vsel %vm828_vm2, %v819_v40, %v517_v19 }
 0x1ae   :  { %v4932_v33 = vmax.f32 %v1398_v13, %v1402_v22  ;;  %1496 = vrot.lane.b32.xlu1 %v4928_v28, %s3910_s0  ;;  %v867_v44 = vsel %vm828_vm2, %v818_v47, %v515_v16 }
 0x1b0   :  { %1494 = vrot.lane.b32.xlu0 %v4932_v33, %s3910_s0  ;;  %v223_v25 = vpop.permute.xlu1 %222 }
 0x1b1   :  { %v663_v36 = vpop.permute.xlu0 %662  ;;  %v771_v63 = vsel %vm730_vm0, %v4448_v3, %v223_v25 }
 0x1b2   :  { %v916_v37 = vsel %vm877_vm3, %v867_v44, %v663_v36 }
 0x1b3   :  { %3721 = vmatprep.mubr.msk.f32.mxu0 %vm940_vm4, %v916_v37 }
 0x1b4   :  { %v225_v51 = vpop.permute.xlu1 %224 }
 0x1b5   :  { %v665_v42 = vpop.permute.xlu0 %664  ;;  %v772_v61 = vsel %vm730_vm0, %v4460_v9, %v225_v51 }
 0x1b6   :  { %v917_v43 = vsel %vm877_vm3, %v868_v50, %v665_v42 }
 0x1b7   :  { %3722 = vmatmul.mubr.msk.f32.gmra.mxu0 %vm940_vm4, %v917_v43  ;;  %v3687_v52 = vpop.f32.mrf.mxu0 }
 0x1b8   :  { %v1227_v34 = vadd.f32 %v3687_v52, %v4846_v23  ;;  %v373_v48 = vpop.permute.xlu1 %372 }
 0x1b9   :  { %v371_v4 = vpop.permute.xlu0 %370  ;;  %v1221_v49 = vpop.f32.mrf.mxu0  ;;  %v821_v3 = vsel %vm779_vm1, %v772_v61, %v373_v48 }
 0x1ba   :  { %v1405_v26 = vmax.f32 %v1227_v34, 0.0  ;;  %v1222_v39 = vadd.f32 %v1221_v49, %v4846_v23  ;;  %v820_v60 = vsel %vm779_vm1, %v771_v63, %v371_v4 }
 0x1bc   :  { %v4952_v29 = vmax.f32 %v1401_v30, %v1405_v26  ;;  %v1404_v0 = vmax.f32 %v1222_v39, 0.0  ;;  %v521_v35 = vpop.permute.xlu1 %520 }
 0x1bd   :  { %v519_v5 = vpop.permute.xlu0 %518  ;;  %v870_v27 = vsel %vm828_vm2, %v821_v3, %v521_v35 }
 0x1be   :  { %v4956_v31 = vmax.f32 %v1400_v8, %v1404_v0  ;;  %1500 = vrot.lane.b32.xlu1 %v4952_v29, %s3910_s0  ;;  %v869_v55 = vsel %vm828_vm2, %v820_v60, %v519_v5 }
 0x1c0   :  { %1498 = vrot.lane.b32.xlu0 %v4956_v31, %s3910_s0  ;;  %v227_v56 = vpop.permute.xlu1 %226 }
 0x1c1   :  { %v667_v62 = vpop.permute.xlu0 %666  ;;  %v773_v13 = vsel %vm730_vm0, %v4486_v11, %v227_v56 }
 0x1c2   :  { %v918_v12 = vsel %vm877_vm3, %v869_v55, %v667_v62 }
 0x1c3   :  { %3724 = vmatprep.mubr.msk.f32.mxu0 %vm940_vm4, %v918_v12 }
 0x1c4   :  { %v229_v10 = vpop.permute.xlu1 %228 }
 0x1c5   :  { %v669_v59 = vpop.permute.xlu0 %668  ;;  %v774_v47 = vsel %vm730_vm0, %v4498_v46, %v229_v10 }
 0x1c6   :  { %v919_v58 = vsel %vm877_vm3, %v870_v27, %v669_v59 }
 0x1c7   :  { %3725 = vmatmul.mubr.msk.f32.gmra.mxu0 %vm940_vm4, %v919_v58  ;;  %v3690_v50 = vpop.f32.mrf.mxu0 }
 0x1c8   :  { %v377_v14 = vpop.permute.xlu1 %376  ;;  %v1237_v35 = vadd.f32 %v3690_v50, %v4846_v23 }
 0x1c9   :  { %v375_v20 = vpop.permute.xlu0 %374  ;;  %v823_v44 = vsel %vm779_vm1, %v774_v47, %v377_v14  ;;  %v1231_v43 = vpop.f32.mrf.mxu0 }
 0x1ca   :  { %v822_v9 = vsel %vm779_vm1, %v773_v13, %v375_v20  ;;  %v1232_v63 = vadd.f32 %v1231_v43, %v4846_v23  ;;  %v1407_v62 = vmax.f32 %v1237_v35, 0.0 }
 0x1cc   :  { %v525_v21 = vpop.permute.xlu1 %524  ;;  %v1406_v3 = vmax.f32 %v1232_v63, 0.0 }
 0x1cd   :  { %v523_v32 = vpop.permute.xlu0 %522  ;;  %v872_v25 = vsel %vm828_vm2, %v823_v44, %v525_v21 }
 0x1ce   :  { %v871_v22 = vsel %vm828_vm2, %v822_v9, %v523_v32 }
 0x1d0   :  { %v231_v19 = vpop.permute.xlu1 %230 }
 0x1d1   :  { %v671_v16 = vpop.permute.xlu0 %670  ;;  %v775_v46 = vsel %vm730_vm0, %v4524_v2, %v231_v19 }
 0x1d2   :  { %v920_v7 = vsel %vm877_vm3, %v871_v22, %v671_v16 }
 0x1d3   :  { %3727 = vmatprep.mubr.msk.f32.mxu0 %vm940_vm4, %v920_v7 }
 0x1d4   :  { %v233_v36 = vpop.permute.xlu1 %232 }
 0x1d5   :  { %v673_v37 = vpop.permute.xlu0 %672  ;;  %v776_v49 = vsel %vm730_vm0, %v4536_v6, %v233_v36 }
 0x1d6   :  { %v921_v11 = vsel %vm877_vm3, %v872_v25, %v673_v37 }
 0x1d7   :  { %3728 = vmatmul.mubr.msk.f32.gmra.mxu0 %vm940_vm4, %v921_v11  ;;  %v3693_v48 = vpop.f32.mrf.mxu0 }
 0x1d8   :  { %v381_v38 = vpop.permute.xlu1 %380  ;;  %v1247_v7 = vadd.f32 %v3693_v48, %v4846_v23 }
 0x1d9   :  { %v379_v40 = vpop.permute.xlu0 %378  ;;  %v825_v30 = vsel %vm779_vm1, %v776_v49, %v381_v38  ;;  %v1241_v8 = vpop.f32.mrf.mxu0 }
 0x1da   :  { %v824_v24 = vsel %vm779_vm1, %v775_v46, %v379_v40  ;;  %v1242_v44 = vadd.f32 %v1241_v8, %v4846_v23  ;;  %v1409_v37 = vmax.f32 %v1247_v7, 0.0 }
 0x1dc   :  { %v529_v51 = vpop.permute.xlu1 %528  ;;  %v1408_v40 = vmax.f32 %v1242_v44, 0.0 }
 0x1dd   :  { %v527_v42 = vpop.permute.xlu0 %526  ;;  %v874_v26 = vsel %vm828_vm2, %v825_v30, %v529_v51 }
 0x1de   :  { %v873_v52 = vsel %vm828_vm2, %v824_v24, %v527_v42 }
 0x1e0   :  { %v235_v53 = vpop.permute.xlu1 %234 }
 0x1e1   :  { %v675_v34 = vpop.permute.xlu0 %674  ;;  %v777_v14 = vsel %vm730_vm0, %v4562_v15, %v235_v53 }
 0x1e2   :  { %v922_v4 = vsel %vm877_vm3, %v873_v52, %v675_v34 }
 0x1e3   :  { %3730 = vmatprep.mubr.msk.f32.mxu0 %vm940_vm4, %v922_v4 }
 0x1e4   :  { %v237_v2 = vpop.permute.xlu1 %236 }
 0x1e5   :  { %v677_v39 = vpop.permute.xlu0 %676  ;;  %v778_v20 = vsel %vm730_vm0, %v4574_v45, %v237_v2 }
 0x1e6   :  { %v923_v0 = vsel %vm877_vm3, %v874_v26, %v677_v39 }
 0x1e7   :  { %3731 = vmatmul.mubr.msk.f32.gmra.mxu0 %vm940_vm4, %v923_v0  ;;  %v3696_v5 = vpop.f32.mrf.mxu0 }
 0x1e8   :  { %v1257_v6 = vadd.f32 %v3696_v5, %v4846_v23  ;;  %v385_v60 = vpop.permute.xlu1 %384 }
 0x1e9   :  { %v383_v55 = vpop.permute.xlu0 %382  ;;  %v1251_v56 = vpop.f32.mrf.mxu0  ;;  %v827_v32 = vsel %vm779_vm1, %v778_v20, %v385_v60 }
 0x1ea   :  { %v1411_v12 = vmax.f32 %v1257_v6, 0.0  ;;  %v1252_v61 = vadd.f32 %v1251_v56, %v4846_v23  ;;  %v826_v13 = vsel %vm779_vm1, %v777_v14, %v383_v55 }
 0x1ec   :  { %v5000_v27 = vmax.f32 %v1407_v62, %v1411_v12  ;;  %v1410_v10 = vmax.f32 %v1252_v61, 0.0  ;;  %v533_v59 = vpop.permute.xlu1 %532 }
 0x1ed   :  { %v531_v58 = vpop.permute.xlu0 %530  ;;  %v876_v9 = vsel %vm828_vm2, %v827_v32, %v533_v59 }
 0x1ee   :  { %v5006_v21 = vmax.f32 %v1406_v3, %v1410_v10  ;;  %1504 = vrot.lane.b32.xlu1 %v5000_v27, %s3910_s0  ;;  %v875_v22 = vsel %vm828_vm2, %v826_v13, %v531_v58 }
 0x1f0   :  { %1502 = vrot.lane.b32.xlu0 %v5006_v21, %s3910_s0  ;;  %v681_v15 = vpop.permute.xlu1 %680 }
 0x1f1   :  { %v679_v19 = vpop.permute.xlu0 %678  ;;  %v925_v45 = vsel %vm877_vm3, %v876_v9, %v681_v15 }
 0x1f2   :  { %v924_v16 = vsel %vm877_vm3, %v875_v22, %v679_v19 }
 0x1f3   :  { %3733 = vmatprep.mubr.msk.f32.mxu0 %vm940_vm4, %v924_v16 }
 0x1f4   :  { %3734 = vmatmul.mubr.msk.f32.gmra.mxu0 %vm940_vm4, %v925_v45 }
 0x1f7   :  { %v3699_v47 = vpop.f32.mrf.mxu0 }
 0x1f8   :  { %v1267_v25 = vadd.f32 %v3699_v47, %v4846_v23 }
 0x1f9   :  { %v1261_v36 = vpop.f32.mrf.mxu0 }
 0x1fa   :  { %v1413_v11 = vmax.f32 %v1267_v25, 0.0  ;;  %v1262_v38 = vadd.f32 %v1261_v36, %v4846_v23 }
 0x1fc   :  { %v5024_v50 = vmax.f32 %v1409_v37, %v1413_v11  ;;  %v1412_v51 = vmax.f32 %v1262_v38, 0.0 }
 0x1fe   :  { %v5026_v42 = vmax.f32 %v1408_v40, %v1412_v51  ;;  %1508 = vrot.lane.b32.xlu1 %v5024_v50, %s3910_s0 }
 0x200   :  { %1506 = vrot.lane.b32.xlu0 %v5026_v42, %s3910_s0 }
 0x207   :  { %v3702_v46 = vpop.f32.mrf.mxu0 }
 0x208   :  { %v1277_v53 = vadd.f32 %v3702_v46, %v4846_v23 }
 0x209   :  { %v1271_v43 = vpop.f32.mrf.mxu0 }
 0x20a   :  { %v1272_v48 = vadd.f32 %v1271_v43, %v4846_v23  ;;  %v1415_v30 = vmax.f32 %v1277_v53, 0.0 }
 0x20c   :  { %v1414_v39 = vmax.f32 %v1272_v48, 0.0 }
 0x217   :  { %v3705_v24 = vpop.f32.mrf.mxu0 }
 0x218   :  { %v1287_v5 = vadd.f32 %v3705_v24, %v4846_v23 }
 0x219   :  { %v1281_v52 = vpop.f32.mrf.mxu0 }
 0x21a   :  { %v1282_v6 = vadd.f32 %v1281_v52, %v4846_v23  ;;  %v1417_v56 = vmax.f32 %v1287_v5, 0.0 }
 0x21c   :  { %v1416_v61 = vmax.f32 %v1282_v6, 0.0 }
 0x227   :  { %v3708_v34 = vpop.f32.mrf.mxu0 }
 0x228   :  { %v1297_v4 = vadd.f32 %v3708_v34, %v4846_v23 }
 0x229   :  { %v1291_v49 = vpop.f32.mrf.mxu0 }
 0x22a   :  { %v1419_v26 = vmax.f32 %v1297_v4, 0.0  ;;  %v1292_v2 = vadd.f32 %v1291_v49, %v4846_v23 }
 0x22c   :  { %v5036_v8 = vmax.f32 %v1415_v30, %v1419_v26  ;;  %v1418_v0 = vmax.f32 %v1292_v2, 0.0 }
 0x22e   :  { %v5038_v35 = vmax.f32 %v1414_v39, %v1418_v0  ;;  %1512 = vrot.lane.b32.xlu1 %v5036_v8, %s3910_s0 }
 0x230   :  { %1510 = vrot.lane.b32.xlu0 %v5038_v35, %s3910_s0 }
 0x237   :  { %v3711_v63 = vpop.f32.mrf.mxu0 }
 0x238   :  { %v1307_v60 = vadd.f32 %v3711_v63, %v4846_v23 }
 0x239   :  { %v1301_v55 = vpop.f32.mrf.mxu0 }
 0x23a   :  { %v1421_v62 = vmax.f32 %v1307_v60, 0.0  ;;  %v1302_v12 = vadd.f32 %v1301_v55, %v4846_v23 }
 0x23c   :  { %v5048_v3 = vmax.f32 %v1417_v56, %v1421_v62  ;;  %v1420_v10 = vmax.f32 %v1302_v12, 0.0 }
 0x23e   :  { %v5050_v59 = vmax.f32 %v1416_v61, %v1420_v10  ;;  %1516 = vrot.lane.b32.xlu1 %v5048_v3, %s3910_s0 }
 0x240   :  { %1514 = vrot.lane.b32.xlu0 %v5050_v59, %s3910_s0 }
 0x247   :  { %v3714_v58 = vpop.f32.mrf.mxu0 }
 0x248   :  { %v1317_v13 = vadd.f32 %v3714_v58, %v4846_v23 }
 0x249   :  { %v1311_v14 = vpop.f32.mrf.mxu0 }
 0x24a   :  { %v1312_v22 = vadd.f32 %v1311_v14, %v4846_v23  ;;  %v1423_v45 = vmax.f32 %v1317_v13, 0.0 }
 0x24c   :  { %v1422_v47 = vmax.f32 %v1312_v22, 0.0 }
 0x257   :  { %v3717_v20 = vpop.f32.mrf.mxu0 }
 0x258   :  { %v1327_v37 = vadd.f32 %v3717_v20, %v4846_v23 }
 0x259   :  { %v1321_v32 = vpop.f32.mrf.mxu0 }
 0x25a   :  { %v1322_v38 = vadd.f32 %v1321_v32, %v4846_v23  ;;  %v1425_v46 = vmax.f32 %v1327_v37, 0.0 }
 0x25c   :  { %v1424_v52 = vmax.f32 %v1322_v38, 0.0 }
 0x267   :  { %v3720_v9 = vpop.f32.mrf.mxu0 }
 0x268   :  { %v1337_v15 = vadd.f32 %v3720_v9, %v4846_v23 }
 0x269   :  { %v1331_v19 = vpop.f32.mrf.mxu0 }
 0x26a   :  { %v1427_v16 = vmax.f32 %v1337_v15, 0.0  ;;  %v1332_v7 = vadd.f32 %v1331_v19, %v4846_v23 }
 0x26c   :  { %v5060_v44 = vmax.f32 %v1423_v45, %v1427_v16  ;;  %v1426_v25 = vmax.f32 %v1332_v7, 0.0  ;;  %v1489_v16 = vpop.permute.xlu1 %1488 }
 0x26e   :  { %v5062_v36 = vmax.f32 %v1422_v47, %v1426_v25  ;;  %1520 = vrot.lane.b32.xlu1 %v5060_v44, %s3910_s0  ;;  %v5103_v47 = vmax.f32 %v4875_v1, %v1489_v16 }
 0x270   :  { %1518 = vrot.lane.b32.xlu0 %v5062_v36, %s3910_s0  ;;  %v1493_v37 = vpop.permute.xlu1 %1492 }
 0x274   :  { %v1497_v38 = vpop.permute.xlu1 %1496 }
 0x277   :  { %v3723_v11 = vpop.f32.mrf.mxu0 }
 0x278   :  { %v1347_v40 = vadd.f32 %v3723_v11, %v4846_v23  ;;  %v5134_v11 = vmax.f32 %v4889_v17, %v1493_v37 }
 0x279   :  { %v1341_v51 = vpop.f32.mrf.mxu0 }
 0x27a   :  { %v1429_v43 = vmax.f32 %v1347_v40, 0.0  ;;  %v1342_v24 = vadd.f32 %v1341_v51, %v4846_v23  ;;  %v5158_v40 = vmax.f32 %v4928_v28, %v1497_v38  ;;  %v1501_v51 = vpop.permute.xlu1 %1500 }
 0x27c   :  { %v5072_v53 = vmax.f32 %v1425_v46, %v1429_v43  ;;  %v1428_v34 = vmax.f32 %v1342_v24, 0.0  ;;  %v5184_v46 = vmax.f32 %v4952_v29, %v1501_v51 }
 0x27e   :  { %v5074_v48 = vmax.f32 %v1424_v52, %v1428_v34  ;;  %1524 = vrot.lane.b32.xlu1 %v5072_v53, %s3910_s0  ;;  %v1505_v43 = vpop.permute.xlu1 %1504 }
 0x27f   :  { %v5210_v24 = vmax.f32 %v5000_v27, %v1505_v43 }
 0x280   :  { %1522 = vrot.lane.b32.xlu0 %v5074_v48, %s3910_s0 }
 0x287   :  { %v3726_v4 = vpop.f32.mrf.mxu0 }
 0x288   :  { %v1357_v2 = vadd.f32 %v3726_v4, %v4846_v23 }
 0x289   :  { %v1351_v49 = vpop.f32.mrf.mxu0 }
 0x28a   :  { %v1352_v0 = vadd.f32 %v1351_v49, %v4846_v23  ;;  %v1431_v6 = vmax.f32 %v1357_v2, 0.0 }
 0x28c   :  { %v1430_v56 = vmax.f32 %v1352_v0, 0.0 }
 0x297   :  { %v3729_v30 = vpop.f32.mrf.mxu0 }
 0x298   :  { %v1367_v10 = vadd.f32 %v3729_v30, %v4846_v23 }
 0x299   :  { %v1361_v26 = vpop.f32.mrf.mxu0 }
 0x29a   :  { %v1362_v14 = vadd.f32 %v1361_v26, %v4846_v23  ;;  %v1433_v13 = vmax.f32 %v1367_v10, 0.0 }
 0x29c   :  { %v1432_v15 = vmax.f32 %v1362_v14, 0.0 }
 0x2a7   :  { %v3732_v39 = vpop.f32.mrf.mxu0 }
 0x2a8   :  { %v1377_v5 = vadd.f32 %v3732_v39, %v4846_v23 }
 0x2a9   :  { %v1371_v63 = vpop.f32.mrf.mxu0 }
 0x2aa   :  { %v1435_v60 = vmax.f32 %v1377_v5, 0.0  ;;  %v1372_v55 = vadd.f32 %v1371_v63, %v4846_v23 }
 0x2ac   :  { %v5084_v62 = vmax.f32 %v1431_v6, %v1435_v60  ;;  %v1434_v12 = vmax.f32 %v1372_v55, 0.0 }
 0x2ae   :  { %v5086_v61 = vmax.f32 %v1430_v56, %v1434_v12  ;;  %1528 = vrot.lane.b32.xlu1 %v5084_v62, %s3910_s0 }
 0x2b0   :  { %1526 = vrot.lane.b32.xlu0 %v5086_v61, %s3910_s0 }
 0x2b4   :  { %v3735_v58 = vpop.f32.mrf.mxu0 }
 0x2b5   :  { %v1387_v20 = vadd.f32 %v3735_v58, %v4846_v23 }
 0x2b6   :  { %v1381_v32 = vpop.f32.mrf.mxu0 }
 0x2b7   :  { %v1437_v9 = vmax.f32 %v1387_v20, 0.0  ;;  %v1382_v22 = vadd.f32 %v1381_v32, %v4846_v23  ;;  %v1487_v23 = vpop.permute.xlu0 %1486 }
 0x2b8   :  { %v5112_v25 = vmax.f32 %v4878_v54, %v1487_v23 }
 0x2b9   :  { %v5096_v19 = vmax.f32 %v1433_v13, %v1437_v9  ;;  %v1436_v45 = vmax.f32 %v1382_v22, 0.0 }
 0x2bb   :  { %v5098_v7 = vmax.f32 %v1432_v15, %v1436_v45  ;;  %1532 = vrot.lane.b32.xlu1 %v5096_v19, %s3910_s0  ;;  %v1491_v1 = vpop.permute.xlu0 %1490 }
 0x2bc   :  { %v5125_v54 = vmax.f32 %v4892_v18, %v1491_v1 }
 0x2bd   :  { %1530 = vrot.lane.b32.xlu0 %v5098_v7, %s3910_s0 }
 0x2bf   :  { %1608 = vrot.lane.b32.xlu1 %v5103_v47, %s3910_s0  ;;  %v1495_v18 = vpop.permute.xlu0 %1494 }
 0x2c0   :  { %v5149_v17 = vmax.f32 %v4932_v33, %v1495_v18 }
 0x2c1   :  { %1752 = vrot.lane.b32.xlu0 %v5103_v47, %s3911_s16 }
 0x2c3   :  { %1680 = vrot.lane.b32.xlu1 %v5103_v47, %s3912_s17  ;;  %v1499_v28 = vpop.permute.xlu0 %1498 }
 0x2c4   :  { %v5175_v33 = vmax.f32 %v4956_v31, %v1499_v28 }
 0x2c5   :  { %1606 = vrot.lane.b32.xlu0 %v5112_v25, %s3910_s0 }
 0x2c7   :  { %1824 = vrot.lane.b32.xlu1 %v5103_v47, %s3913_s1  ;;  %v1503_v29 = vpop.permute.xlu0 %1502 }
 0x2c8   :  { %v5201_v31 = vmax.f32 %v5006_v21, %v1503_v29  ;;  %v1509_v21 = vpop.permute.xlu1 %1508 }
 0x2c9   :  { %1678 = vrot.lane.b32.xlu0 %v5112_v25, %s3912_s17  ;;  %v5236_v26 = vmax.f32 %v5024_v50, %v1509_v21 }
 0x2cb   :  { %1750 = vrot.lane.b32.xlu1 %v5112_v25, %s3911_s16  ;;  %v1507_v52 = vpop.permute.xlu0 %1506  ;;  %7037 = vst [vmem:[#allocation8_spill] sm:$0xff] %v5236_v26 }
 0x2cc   :  { %v1513_v27 = vpop.permute.xlu1 %1512  ;;  %v5227_v34 = vmax.f32 %v5026_v42, %v1507_v52 }
 0x2cd   :  { %1822 = vrot.lane.b32.xlu0 %v5112_v25, %s3913_s1  ;;  %v5280_v12 = vmax.f32 %v5036_v8, %v1513_v27 }
 0x2ce   :  { %7036 = vst [vmem:[#allocation7_spill] sm:$0xff] %v5227_v34 }
 0x2cf   :  { %1682 = vrot.lane.b32.xlu1 %v5125_v54, %s3912_s17  ;;  %v1511_v4 = vpop.permute.xlu0 %1510  ;;  %7039 = vst [vmem:[#allocation10_spill] sm:$0xff] %v5280_v12 }
 0x2d0   :  { %v1517_v49 = vpop.permute.xlu1 %1516  ;;  %v5265_v6 = vmax.f32 %v5038_v35, %v1511_v4 }
 0x2d1   :  { %1610 = vrot.lane.b32.xlu0 %v5125_v54, %s3910_s0  ;;  %v5326_v45 = vmax.f32 %v5048_v3, %v1517_v49 }
 0x2d2   :  { %7038 = vst [vmem:[#allocation9_spill] sm:$0xff] %v5265_v6 }
 0x2d3   :  { %1754 = vrot.lane.b32.xlu1 %v5125_v54, %s3911_s16  ;;  %v1515_v30 = vpop.permute.xlu0 %1514  ;;  %7041 = vst [vmem:[#allocation12_spill] sm:$0xff] %v5326_v45 }
 0x2d4   :  { %v5311_v13 = vmax.f32 %v5050_v59, %v1515_v30 }
 0x2d5   :  { %1612 = vrot.lane.b32.xlu0 %v5134_v11, %s3910_s0 }
 0x2d6   :  { %7040 = vst [vmem:[#allocation11_spill] sm:$0xff] %v5311_v13 }
 0x2d7   :  { %1896 = vrot.lane.b32.xlu1 %v5103_v47, %s3914_s18 }
 0x2d9   :  { %1894 = vrot.lane.b32.xlu0 %v5112_v25, %s3914_s18 }
 0x2db   :  { %1826 = vrot.lane.b32.xlu1 %v5125_v54, %s3913_s1 }
 0x2dd   :  { %1684 = vrot.lane.b32.xlu0 %v5134_v11, %s3912_s17 }
 0x2df   :  { %1756 = vrot.lane.b32.xlu1 %v5134_v11, %s3911_s16 }
 0x2e0   :  { %v5238_v2 = vpop.permute.xlu1 %1520 }
 0x2e1   :  { %1614 = vrot.lane.b32.xlu0 %v5149_v17, %s3910_s0  ;;  %v5373_v43 = vmax.f32 %v5060_v44, %v5238_v2 }
 0x2e2   :  { %v1519_v42 = vpop.permute.xlu0 %1518 }
 0x2e3   :  { %1686 = vrot.lane.b32.xlu1 %v5149_v17, %s3912_s17  ;;  %v5357_v38 = vmax.f32 %v5062_v36, %v1519_v42  ;;  %7043 = vst [vmem:[#allocation14_spill] sm:$0xff] %v5373_v43 }
 0x2e5   :  { %1898 = vrot.lane.b32.xlu0 %v5125_v54, %s3914_s18  ;;  %7042 = vst [vmem:[#allocation13_spill] sm:$0xff] %v5357_v38 }
 0x2e7   :  { %1616 = vrot.lane.b32.xlu1 %v5158_v40, %s3910_s0 }
 0x2e9   :  { %1828 = vrot.lane.b32.xlu0 %v5134_v11, %s3913_s1 }
 0x2eb   :  { %1900 = vrot.lane.b32.xlu1 %v5134_v11, %s3914_s18 }
 0x2ed   :  { %1758 = vrot.lane.b32.xlu0 %v5149_v17, %s3911_s16 }
 0x2ef   :  { %1830 = vrot.lane.b32.xlu1 %v5149_v17, %s3913_s1 }
 0x2f0   :  { %v5244_v39 = vpop.permute.xlu1 %1524 }
 0x2f1   :  { %1688 = vrot.lane.b32.xlu0 %v5158_v40, %s3912_s17  ;;  %v5421_v41 = vmax.f32 %v5072_v53, %v5244_v39 }
 0x2f2   :  { %v5248_v0 = vpop.permute.xlu0 %1522 }
 0x2f3   :  { %1760 = vrot.lane.b32.xlu1 %v5158_v40, %s3911_s16  ;;  %v5405_v30 = vmax.f32 %v5074_v48, %v5248_v0  ;;  %7045 = vst [vmem:[#allocation16_spill] sm:$0xff] %v5421_v41 }
 0x2f5   :  { %1618 = vrot.lane.b32.xlu0 %v5175_v33, %s3910_s0  ;;  %7044 = vst [vmem:[#allocation15_spill] sm:$0xff] %v5405_v30 }
 0x2f7   :  { %1690 = vrot.lane.b32.xlu1 %v5175_v33, %s3912_s17 }
 0x2f9   :  { %1902 = vrot.lane.b32.xlu0 %v5149_v17, %s3914_s18 }
 0x2fb   :  { %1620 = vrot.lane.b32.xlu1 %v5184_v46, %s3910_s0 }
 0x2fd   :  { %1832 = vrot.lane.b32.xlu0 %v5158_v40, %s3913_s1 }
 0x2ff   :  { %1904 = vrot.lane.b32.xlu1 %v5158_v40, %s3914_s18 }
 0x301   :  { %1762 = vrot.lane.b32.xlu0 %v5175_v33, %s3911_s16 }
 0x303   :  { %1834 = vrot.lane.b32.xlu1 %v5175_v33, %s3913_s1 }
 0x305   :  { %1692 = vrot.lane.b32.xlu0 %v5184_v46, %s3912_s17 }
 0x307   :  { %1764 = vrot.lane.b32.xlu1 %v5184_v46, %s3911_s16 }
 0x309   :  { %1622 = vrot.lane.b32.xlu0 %v5201_v31, %s3910_s0 }
 0x30b   :  { %1694 = vrot.lane.b32.xlu1 %v5201_v31, %s3912_s17 }
 0x30d   :  { %1906 = vrot.lane.b32.xlu0 %v5175_v33, %s3914_s18 }
 0x30f   :  { %1624 = vrot.lane.b32.xlu1 %v5210_v24, %s3910_s0 }
 0x311   :  { %1836 = vrot.lane.b32.xlu0 %v5184_v46, %s3913_s1 }
 0x313   :  { %1908 = vrot.lane.b32.xlu1 %v5184_v46, %s3914_s18 }
 0x315   :  { %1766 = vrot.lane.b32.xlu0 %v5201_v31, %s3911_s16 }
 0x317   :  { %1838 = vrot.lane.b32.xlu1 %v5201_v31, %s3913_s1 }
 0x319   :  { %1696 = vrot.lane.b32.xlu0 %v5210_v24, %s3912_s17 }
 0x31b   :  { %1768 = vrot.lane.b32.xlu1 %v5210_v24, %s3911_s16 }
 0x31d   :  { %1626 = vrot.lane.b32.xlu0 %v5227_v34, %s3910_s0 }
 0x31f   :  { %1698 = vrot.lane.b32.xlu1 %v5227_v34, %s3912_s17 }
 0x320   :  { %v5252_v50 = vpop.permute.xlu1 %1528 }
 0x321   :  { %1910 = vrot.lane.b32.xlu0 %v5201_v31, %s3914_s18 }
 0x322   :  { %v5256_v5 = vpop.permute.xlu0 %1526 }
 0x323   :  { %1628 = vrot.lane.b32.xlu1 %v5236_v26, %s3910_s0 }
 0x325   :  { %1840 = vrot.lane.b32.xlu0 %v5210_v24, %s3913_s1 }
 0x327   :  { %1912 = vrot.lane.b32.xlu1 %v5210_v24, %s3914_s18 }
 0x329   :  { %1770 = vrot.lane.b32.xlu0 %v5227_v34, %s3911_s16 }
 0x32b   :  { %1842 = vrot.lane.b32.xlu1 %v5227_v34, %s3913_s1 }
 0x32d   :  { %v5260_v63 = vpop.permute.xlu1 %1532  ;;  %1700 = vrot.lane.b32.xlu0 %v5236_v26, %s3912_s17 }
 0x32f   :  { %1772 = vrot.lane.b32.xlu1 %v5236_v26, %s3911_s16  ;;  %v5269_v60 = vpop.permute.xlu0 %1530 }
 0x331   :  { %v5271_v55 = vpop.permute.xlu1 %1608  ;;  %1630 = vrot.lane.b32.xlu0 %v5265_v6, %s3910_s0 }
 0x333   :  { %1702 = vrot.lane.b32.xlu1 %v5265_v6, %s3912_s17  ;;  %v5277_v56 = vpop.permute.xlu0 %1752 }
 0x335   :  { %v5282_v35 = vpop.permute.xlu1 %1680  ;;  %1914 = vrot.lane.b32.xlu0 %v5227_v34, %s3914_s18  ;;  %v5469_v34 = vmax.f32 %v5084_v62, %v5252_v50 }
 0x337   :  { %1632 = vrot.lane.b32.xlu1 %v5280_v12, %s3910_s0  ;;  %v5288_v10 = vpop.permute.xlu0 %1606  ;;  %7048 = vst [vmem:[#allocation19_spill] sm:$0xff] %v5469_v34 }
 0x339   :  { %v5290_v58 = vpop.permute.xlu1 %1824  ;;  %1844 = vrot.lane.b32.xlu0 %v5236_v26, %s3913_s1 }
 0x33b   :  { %1916 = vrot.lane.b32.xlu1 %v5236_v26, %s3914_s18  ;;  %v5296_v8 = vpop.permute.xlu0 %1678 }
 0x33d   :  { %v5298_v14 = vpop.permute.xlu1 %1750  ;;  %1774 = vrot.lane.b32.xlu0 %v5265_v6, %s3911_s16 }
 0x33f   :  { %1846 = vrot.lane.b32.xlu1 %v5265_v6, %s3913_s1  ;;  %v5304_v20 = vpop.permute.xlu0 %1822 }
 0x341   :  { %v5306_v32 = vpop.permute.xlu1 %1682  ;;  %1704 = vrot.lane.b32.xlu0 %v5280_v12, %s3912_s17 }
 0x343   :  { %1776 = vrot.lane.b32.xlu1 %v5280_v12, %s3911_s16  ;;  %v5315_v9 = vpop.permute.xlu0 %1610 }
 0x345   :  { %v5317_v22 = vpop.permute.xlu1 %1754  ;;  %1634 = vrot.lane.b32.xlu0 %v5311_v13, %s3910_s0 }
 0x347   :  { %1706 = vrot.lane.b32.xlu1 %v5311_v13, %s3912_s17  ;;  %v5323_v15 = vpop.permute.xlu0 %1612 }
 0x349   :  { %v5328_v59 = vpop.permute.xlu1 %1896  ;;  %1918 = vrot.lane.b32.xlu0 %v5265_v6, %s3914_s18 }
 0x34b   :  { %1636 = vrot.lane.b32.xlu1 %v5326_v45, %s3910_s0  ;;  %v5334_v16 = vpop.permute.xlu0 %1894 }
 0x34d   :  { %v5336_v23 = vpop.permute.xlu1 %1826  ;;  %1848 = vrot.lane.b32.xlu0 %v5280_v12, %s3913_s1 }
 0x34f   :  { %1920 = vrot.lane.b32.xlu1 %v5280_v12, %s3914_s18  ;;  %v5342_v3 = vpop.permute.xlu0 %1684 }
 0x351   :  { %v5344_v1 = vpop.permute.xlu1 %1756  ;;  %1778 = vrot.lane.b32.xlu0 %v5311_v13, %s3911_s16 }
 0x353   :  { %1850 = vrot.lane.b32.xlu1 %v5311_v13, %s3913_s1  ;;  %v5350_v37 = vpop.permute.xlu0 %1614 }
 0x355   :  { %v5352_v18 = vpop.permute.xlu1 %1686  ;;  %1708 = vrot.lane.b32.xlu0 %v5326_v45, %s3912_s17 }
 0x357   :  { %1780 = vrot.lane.b32.xlu1 %v5326_v45, %s3911_s16  ;;  %v5361_v28 = vpop.permute.xlu0 %1898 }
 0x359   :  { %v5363_v51 = vpop.permute.xlu1 %1616  ;;  %1638 = vrot.lane.b32.xlu0 %v5357_v38, %s3910_s0 }
 0x35b   :  { %1710 = vrot.lane.b32.xlu1 %v5357_v38, %s3912_s17  ;;  %v5369_v29 = vpop.permute.xlu0 %1828 }
 0x35d   :  { %v5375_v36 = vpop.permute.xlu1 %1900  ;;  %1922 = vrot.lane.b32.xlu0 %v5311_v13, %s3914_s18 }
 0x35f   :  { %1640 = vrot.lane.b32.xlu1 %v5373_v43, %s3910_s0  ;;  %v5381_v21 = vpop.permute.xlu0 %1758 }
 0x361   :  { %v5383_v52 = vpop.permute.xlu1 %1830  ;;  %1852 = vrot.lane.b32.xlu0 %v5326_v45, %s3913_s1 }
 0x363   :  { %1924 = vrot.lane.b32.xlu1 %v5326_v45, %s3914_s18  ;;  %v5389_v44 = vpop.permute.xlu0 %1688 }
 0x365   :  { %v5391_v27 = vpop.permute.xlu1 %1760  ;;  %1782 = vrot.lane.b32.xlu0 %v5357_v38, %s3911_s16 }
 0x367   :  { %1854 = vrot.lane.b32.xlu1 %v5357_v38, %s3913_s1  ;;  %v5397_v4 = vpop.permute.xlu0 %1618 }
 0x369   :  { %v5399_v49 = vpop.permute.xlu1 %1690  ;;  %1712 = vrot.lane.b32.xlu0 %v5373_v43, %s3912_s17 }
 0x36b   :  { %1784 = vrot.lane.b32.xlu1 %v5373_v43, %s3911_s16  ;;  %v5409_v2 = vpop.permute.xlu0 %1902 }
 0x36d   :  { %v5411_v42 = vpop.permute.xlu1 %1620  ;;  %1642 = vrot.lane.b32.xlu0 %v5405_v30, %s3910_s0 }
 0x36f   :  { %1714 = vrot.lane.b32.xlu1 %v5405_v30, %s3912_s17  ;;  %v5417_v57 = vpop.permute.xlu0 %1832 }
 0x371   :  { %v5423_v48 = vpop.permute.xlu1 %1904  ;;  %1926 = vrot.lane.b32.xlu0 %v5357_v38, %s3914_s18 }
 0x373   :  { %1644 = vrot.lane.b32.xlu1 %v5421_v41, %s3910_s0  ;;  %v5429_v0 = vpop.permute.xlu0 %1762 }
 0x375   :  { %v5431_v45 = vpop.permute.xlu1 %1834  ;;  %1856 = vrot.lane.b32.xlu0 %v5373_v43, %s3913_s1 }
 0x377   :  { %1928 = vrot.lane.b32.xlu1 %v5373_v43, %s3914_s18  ;;  %v5437_v53 = vpop.permute.xlu0 %1692  ;;  %v5453_v43 = vmax.f32 %v5086_v61, %v5256_v5 }
 0x379   :  { %v5439_v39 = vpop.permute.xlu1 %1764  ;;  %1786 = vrot.lane.b32.xlu0 %v5405_v30, %s3911_s16  ;;  %7046 = vst [vmem:[#allocation17_spill] sm:$0xff] %v5453_v43 }
 0x37b   :  { %1858 = vrot.lane.b32.xlu1 %v5405_v30, %s3913_s1  ;;  %v5445_v38 = vpop.permute.xlu0 %1622 }
 0x37d   :  { %v5447_v13 = vpop.permute.xlu1 %1694  ;;  %1716 = vrot.lane.b32.xlu0 %v5421_v41, %s3912_s17 }
 0x37f   :  { %1788 = vrot.lane.b32.xlu1 %v5421_v41, %s3911_s16  ;;  %v5457_v12 = vpop.permute.xlu0 %1906 }
 0x380   :  { %7047 = vst [vmem:[#allocation18_spill] sm:$0xff] %v5457_v12 }
 0x381   :  { %v5459_v6 = vpop.permute.xlu1 %1624  ;;  %1646 = vrot.lane.b32.xlu0 %v5453_v43, %s3910_s0 }
 0x383   :  { %1718 = vrot.lane.b32.xlu1 %v5453_v43, %s3912_s17  ;;  %v5465_v26 = vpop.permute.xlu0 %1836 }
 0x385   :  { %v5471_v61 = vpop.permute.xlu1 %1908  ;;  %1930 = vrot.lane.b32.xlu0 %v5405_v30, %s3914_s18 }
 0x386   :  { %7049 = vst [vmem:[#allocation20_spill] sm:$0xff] %v5471_v61 }
 0x387   :  { %1648 = vrot.lane.b32.xlu1 %v5469_v34, %s3910_s0  ;;  %v5477_v5 = vpop.permute.xlu0 %1766 }
 0x389   :  { %v5479_v12 = vpop.permute.xlu1 %1838  ;;  %1860 = vrot.lane.b32.xlu0 %v5421_v41, %s3913_s1 }
 0x38a   :  { %7050 = vst [vmem:[#allocation21_spill] sm:$0xff] %v5479_v12 }
 0x38b   :  { %1932 = vrot.lane.b32.xlu1 %v5421_v41, %s3914_s18  ;;  %v5485_v62 = vpop.permute.xlu0 %1696  ;;  %v5501_v41 = vmax.f32 %v5098_v7, %v5269_v60 }
 0x38d   :  { %v5487_v50 = vpop.permute.xlu1 %1768  ;;  %1790 = vrot.lane.b32.xlu0 %v5453_v43, %s3911_s16  ;;  %7054 = vst [vmem:[#allocation25_spill] sm:$0xff] %v5501_v41 }
 0x38e   :  { %7051 = vst [vmem:[#allocation22_spill] sm:$0xff] %v5487_v50 }
 0x38f   :  { %1862 = vrot.lane.b32.xlu1 %v5453_v43, %s3913_s1  ;;  %v5493_v30 = vpop.permute.xlu0 %1626 }
 0x390   :  { %7052 = vst [vmem:[#allocation23_spill] sm:$0xff] %v5493_v30  ;;  %v5517_v30 = vmax.f32 %v5096_v19, %v5260_v63 }
 0x391   :  { %v5495_v61 = vpop.permute.xlu1 %1698  ;;  %1720 = vrot.lane.b32.xlu0 %v5469_v34, %s3912_s17 }
 0x392   :  { %7053 = vst [vmem:[#allocation24_spill] sm:$0xff] %v5495_v61  ;;  %7058 = vst [vmem:[#allocation29_spill] sm:$0xff] %v5517_v30 }
 0x393   :  { %1792 = vrot.lane.b32.xlu1 %v5469_v34, %s3911_s16  ;;  %v5505_v12 = vpop.permute.xlu0 %1910 }
 0x394   :  { %7055 = vst [vmem:[#allocation26_spill] sm:$0xff] %v5505_v12 }
 0x395   :  { %v5507_v50 = vpop.permute.xlu1 %1628  ;;  %1650 = vrot.lane.b32.xlu0 %v5501_v41, %s3910_s0 }
 0x396   :  { %7056 = vst [vmem:[#allocation27_spill] sm:$0xff] %v5507_v50 }
 0x397   :  { %1722 = vrot.lane.b32.xlu1 %v5501_v41, %s3912_s17  ;;  %v5513_v61 = vpop.permute.xlu0 %1840 }
 0x398   :  { %7057 = vst [vmem:[#allocation28_spill] sm:$0xff] %v5513_v61 }
 0x399   :  { %v5519_v7 = vpop.permute.xlu1 %1912  ;;  %1934 = vrot.lane.b32.xlu0 %v5453_v43, %s3914_s18 }
 0x39a   :  { %7059 = vst [vmem:[#allocation30_spill] sm:$0xff] %v5519_v7 }
 0x39b   :  { %1652 = vrot.lane.b32.xlu1 %v5517_v30, %s3910_s0  ;;  %v5525_v60 = vpop.permute.xlu0 %1770 }
 0x39c   :  { %7060 = vst [vmem:[#allocation31_spill] sm:$0xff] %v5525_v60 }
 0x39d   :  { %v5527_v12 = vpop.permute.xlu1 %1842  ;;  %1864 = vrot.lane.b32.xlu0 %v5469_v34, %s3913_s1 }
 0x39e   :  { %7061 = vst [vmem:[#allocation32_spill] sm:$0xff] %v5527_v12 }
 0x39f   :  { %1936 = vrot.lane.b32.xlu1 %v5469_v34, %s3914_s18  ;;  %v5533_v19 = vpop.permute.xlu0 %1700 }
 0x3a0   :  { %7062 = vst [vmem:[#allocation33_spill] sm:$0xff] %v5533_v19 }
 0x3a1   :  { %v5535_v63 = vpop.permute.xlu1 %1772  ;;  %1794 = vrot.lane.b32.xlu0 %v5501_v41, %s3911_s16 }
 0x3a2   :  { %7063 = vst [vmem:[#allocation34_spill] sm:$0xff] %v5535_v63 }
 0x3a3   :  { %1866 = vrot.lane.b32.xlu1 %v5501_v41, %s3913_s1  ;;  %v5541_v43 = vpop.permute.xlu0 %1630 }
 0x3a4   :  { %7064 = vst [vmem:[#allocation35_spill] sm:$0xff] %v5541_v43 }
 0x3a5   :  { %v5543_v7 = vpop.permute.xlu1 %1702  ;;  %1724 = vrot.lane.b32.xlu0 %v5517_v30, %s3912_s17 }
 0x3a6   :  { %7065 = vst [vmem:[#allocation36_spill] sm:$0xff] %v5543_v7 }
 0x3a7   :  { %1938 = vrot.lane.b32.xlu1 %v5501_v41, %s3914_s18  ;;  %v5549_v34 = vpop.permute.xlu0 %1914 }
 0x3a8   :  { %7066 = vst [vmem:[#allocation37_spill] sm:$0xff] %v5549_v34 }
 0x3a9   :  { %v5551_v12 = vpop.permute.xlu1 %1632  ;;  %1796 = vrot.lane.b32.xlu0 %v5517_v30, %s3911_s16 }
 0x3aa   :  { %7067 = vst [vmem:[#allocation38_spill] sm:$0xff] %v5551_v12 }
 0x3ab   :  { %1940 = vrot.lane.b32.xlu1 %v5517_v30, %s3914_s18  ;;  %v5557_v63 = vpop.permute.xlu0 %1844 }
 0x3ac   :  { %7068 = vst [vmem:[#allocation39_spill] sm:$0xff] %v5557_v63 }
 0x3ad   :  { %v5559_v43 = vpop.permute.xlu1 %1916  ;;  %1868 = vrot.lane.b32.xlu0 %v5517_v30, %s3913_s1 }
 0x3ae   :  { %7069 = vst [vmem:[#allocation40_spill] sm:$0xff] %v5559_v43 }
 0x3af   :  { %v5563_v7 = vpop.permute.xlu0 %1774 }
 0x3b0   :  { %7070 = vst [vmem:[#allocation41_spill] sm:$0xff] %v5563_v7 }
 0x3b1   :  { %v5565_v41 = vpop.permute.xlu1 %1846 }
 0x3b2   :  { %7071 = vst [vmem:[#allocation42_spill] sm:$0xff] %v5565_v41 }
 0x3b3   :  { %v5567_v34 = vpop.permute.xlu0 %1704 }
 0x3b4   :  { %7072 = vst [vmem:[#allocation43_spill] sm:$0xff] %v5567_v34 }
 0x3b5   :  { %v5569_v12 = vpop.permute.xlu1 %1776 }
 0x3b6   :  { %7073 = vst [vmem:[#allocation44_spill] sm:$0xff] %v5569_v12 }
 0x3b7   :  { %v5571_v60 = vpop.permute.xlu0 %1634 }
 0x3b8   :  { %7074 = vst [vmem:[#allocation45_spill] sm:$0xff] %v5571_v60 }
 0x3b9   :  { %v5573_v19 = vpop.permute.xlu1 %1706 }
 0x3ba   :  { %7075 = vst [vmem:[#allocation46_spill] sm:$0xff] %v5573_v19 }
 0x3bb   :  { %v5575_v61 = vpop.permute.xlu0 %1918 }
 0x3bc   :  { %7076 = vst [vmem:[#allocation47_spill] sm:$0xff] %v5575_v61 }
 0x3bd   :  { %v5577_v63 = vpop.permute.xlu1 %1636 }
 0x3be   :  { %7077 = vst [vmem:[#allocation48_spill] sm:$0xff] %v5577_v63 }
 0x3bf   :  { %v5579_v43 = vpop.permute.xlu0 %1848 }
 0x3c0   :  { %7078 = vst [vmem:[#allocation49_spill] sm:$0xff] %v5579_v43 }
 0x3c1   :  { %v5581_v50 = vpop.permute.xlu1 %1920 }
 0x3c2   :  { %7079 = vst [vmem:[#allocation50_spill] sm:$0xff] %v5581_v50 }
 0x3c3   :  { %v5583_v30 = vpop.permute.xlu0 %1778 }
 0x3c4   :  { %7080 = vst [vmem:[#allocation51_spill] sm:$0xff] %v5583_v30 }
 0x3c5   :  { %v5585_v7 = vpop.permute.xlu1 %1850 }
 0x3c6   :  { %7081 = vst [vmem:[#allocation52_spill] sm:$0xff] %v5585_v7 }
 0x3c7   :  { %v5587_v41 = vpop.permute.xlu0 %1708 }
 0x3c8   :  { %7082 = vst [vmem:[#allocation53_spill] sm:$0xff] %v5587_v41 }
 0x3c9   :  { %v5589_v34 = vpop.permute.xlu1 %1780 }
 0x3ca   :  { %7083 = vst [vmem:[#allocation54_spill] sm:$0xff] %v5589_v34 }
 0x3cb   :  { %v5591_v12 = vpop.permute.xlu0 %1638 }
 0x3cc   :  { %7084 = vst [vmem:[#allocation55_spill] sm:$0xff] %v5591_v12 }
 0x3cd   :  { %v5593_v60 = vpop.permute.xlu1 %1710 }
 0x3cf   :  { %v5595_v19 = vpop.permute.xlu0 %1922 }
 0x3d1   :  { %v5597_v61 = vpop.permute.xlu1 %1640 }
 0x3d2   :  { %7085 = vst [vmem:[#allocation56_spill] sm:$0xff] %v5597_v61  ;;  %v1967_v61 = vsel %vm1966_vm5, %v5112_v25, %v5288_v10  ;;  %v1968_v25 = vsel %vm1966_vm5, %v5103_v47, %v5271_v55  ;;  %v1971_v55 = vsel %vm1966_vm5, %v5149_v17, %v5350_v37 }
 0x3d3   :  { %v5599_v63 = vpop.permute.xlu0 %1852 }
 0x3d4   :  { %7086 = vst [vmem:[#allocation57_spill] sm:$0xff] %v5599_v63 }
 0x3d5   :  { %v5601_v43 = vpop.permute.xlu1 %1924 }
 0x3d6   :  { %7087 = vst [vmem:[#allocation58_spill] sm:$0xff] %v5601_v43  ;;  %v1991_v43 = vsel %vm730_vm0, %v1967_v61, %v5296_v8 }
 0x3d7   :  { %v5603_v50 = vpop.permute.xlu0 %1782  ;;  %v2016_v10 = vsel %vm2015_vm6, %v1991_v43, %v5298_v14 }
 0x3d9   :  { %v5605_v30 = vpop.permute.xlu1 %1854 }
 0x3da   :  { %7088 = vst [vmem:[#allocation59_spill] sm:$0xff] %v5605_v30  ;;  %v1969_v30 = vsel %vm1966_vm5, %v5125_v54, %v5315_v9  ;;  %v1992_v54 = vsel %vm730_vm0, %v1968_v25, %v5282_v35 }
 0x3db   :  { %v5607_v7 = vpop.permute.xlu0 %1712  ;;  %v1993_v9 = vsel %vm730_vm0, %v1969_v30, %v5306_v32  ;;  %v1974_v30 = vsel %vm1966_vm5, %v5184_v46, %v5411_v42 }
 0x3dc   :  { %7089 = vst [vmem:[#allocation60_spill] sm:$0xff] %v5607_v7  ;;  %v2018_v35 = vsel %vm2015_vm6, %v1993_v9, %v5317_v22  ;;  %v1995_v22 = vsel %vm730_vm0, %v1971_v55, %v5352_v18  ;;  %v1973_v18 = vsel %vm1966_vm5, %v5175_v33, %v5397_v4 }
 0x3dd   :  { %v5609_v41 = vpop.permute.xlu1 %1784  ;;  %v2042_v17 = vsel %vm779_vm1, %v2018_v35, %v5336_v23  ;;  %v2020_v23 = vsel %vm2015_vm6, %v1995_v22, %v5381_v21  ;;  %v7095_v35 = vld [vmem:[#allocation20_spill] sm:$0xff] }
 0x3df   :  { %v5611_v34 = vpop.permute.xlu0 %1642 }
 0x3e1   :  { %v5613_v12 = vpop.permute.xlu1 %1714 }
 0x3e2   :  { %7090 = vst [vmem:[#allocation61_spill] sm:$0xff] %v5613_v12  ;;  %v1970_v12 = vsel %vm1966_vm5, %v5134_v11, %v5323_v15  ;;  %v2040_v11 = vsel %vm779_vm1, %v2016_v10, %v5304_v20 }
 0x3e3   :  { %v5618_v63 = vpop.permute.xlu0 %1926  ;;  %v1994_v8 = vsel %vm730_vm0, %v1970_v12, %v5342_v3  ;;  %v2017_v12 = vsel %vm2015_vm6, %v1992_v54, %v5277_v56  ;;  %v5658_v14 = vsel %vm2064_vm7, %v2040_v11, %v5334_v16  ;;  %v5676_v16 = vsel %vm2064_vm7, %v2042_v17, %v5361_v28  ;;  %v7092_v54 = vld [vmem:[#allocation18_spill] sm:$0xff]  ;;  %v7098_v17 = vld [vmem:[#allocation8_spill] sm:$0xff] }
 0x3e4   :  { %7091 = vst [vmem:[#allocation62_spill] sm:$0xff] %v5618_v63  ;;  %v2019_v47 = vsel %vm2015_vm6, %v1994_v8, %v5344_v1  ;;  %v2041_v15 = vsel %vm779_vm1, %v2017_v12, %v5290_v58  ;;  %v2089_v1 = vsel %vm828_vm2, %v5658_v14, 0.0  ;;  %v1972_v58 = vsel %vm1966_vm5, %v5158_v40, %v5363_v51 }
 0x3e5   :  { %v5625_v7 = vpop.permute.xlu1 %1644  ;;  %v2043_v20 = vsel %vm779_vm1, %v2019_v47, %v5369_v29  ;;  %v5670_v56 = vsel %vm2064_vm7, %v2041_v15, %v5328_v59  ;;  %v1996_v37 = vsel %vm730_vm0, %v1972_v58, %v5389_v44  ;;  %v2092_v40 = vsel %vm828_vm2, %v5676_v16, 0.0  ;;  %v7093_v47 = vld [vmem:[#allocation23_spill] sm:$0xff] }
 0x3e6   :  { %v5687_v59 = vsel %vm2064_vm7, %v2043_v20, %v5375_v36  ;;  %v2090_v29 = vsel %vm828_vm2, %v5670_v56, 0.0  ;;  %v2044_v36 = vsel %vm779_vm1, %v2020_v23, %v5383_v52  ;;  %v2021_v33 = vsel %vm2015_vm6, %v1996_v37, %v5391_v27  ;;  %v7096_v20 = vld [vmem:[#allocation22_spill] sm:$0xff]  ;;  %v7097_v15 = vld [vmem:[#allocation27_spill] sm:$0xff]  ;;  %v7100_v23 = vld [vmem:[#allocation24_spill] sm:$0xff] }
 0x3e7   :  { %v5637_v61 = vpop.permute.xlu0 %1856  ;;  %v2091_v51 = vadd.f32 %v2090_v29, %v2089_v1  ;;  %v2094_v43 = vsel %vm828_vm2, %v5687_v59, 0.0  ;;  %v1997_v44 = vsel %vm730_vm0, %v1973_v18, %v5399_v49  ;;  %v5714_v4 = vsel %vm2064_vm7, %v2044_v36, %v5409_v2  ;;  %v7099_v1 = vld [vmem:[#allocation21_spill] sm:$0xff]  ;;  %v7101_v18 = vld [vmem:[#allocation28_spill] sm:$0xff] }
 0x3e8   :  { %v2045_v52 = vsel %vm779_vm1, %v2021_v33, %v5417_v57  ;;  %v2022_v10 = vsel %vm2015_vm6, %v1997_v44, %v5429_v0  ;;  %v1998_v27 = vsel %vm730_vm0, %v1974_v30, %v5437_v53  ;;  %v1975_v49 = vsel %vm1966_vm5, %v5201_v31, %v5445_v38  ;;  %v7103_v33 = vld [vmem:[#allocation26_spill] sm:$0xff]  ;;  %v7104_v30 = vld [vmem:[#allocation31_spill] sm:$0xff] }
 0x3e9   :  { %v5643_v63 = vpop.permute.xlu1 %1928  ;;  %v2093_v25 = vadd.f32 %v2092_v40, %v2091_v51  ;;  %v2096_v46 = vsel %vm828_vm2, %v5714_v4, 0.0  ;;  %v5736_v57 = vsel %vm2064_vm7, %v2045_v52, %v5423_v48  ;;  %v2046_v0 = vsel %vm779_vm1, %v2022_v10, %v5431_v45  ;;  %v7102_v40 = vld [vmem:[#allocation33_spill] sm:$0xff]  ;;  %v7105_v52 = vld [vmem:[#allocation35_spill] sm:$0xff] }
 0x3ea   :  { %v2023_v53 = vsel %vm2015_vm6, %v1998_v27, %v5439_v39  ;;  %v1976_v31 = vsel %vm1966_vm5, %v5210_v24, %v5459_v6  ;;  %v1999_v38 = vsel %vm730_vm0, %v1975_v49, %v5447_v13  ;;  %v5749_v9 = vsel %vm2064_vm7, %v2046_v0, %v7092_v54  ;;  %v7094_v24 = vld [vmem:[#allocation7_spill] sm:$0xff]  ;;  %v7106_v10 = vld [vmem:[#allocation9_spill] sm:$0xff] }
 0x3eb   :  { %v5662_v32 = vpop.permute.xlu0 %1786  ;;  %v2095_v2 = vadd.f32 %v2094_v43, %v2093_v25  ;;  %v2047_v48 = vsel %vm779_vm1, %v2023_v53, %v5465_v26  ;;  %v2000_v45 = vsel %vm730_vm0, %v1976_v31, %v5485_v62  ;;  %v2024_v39 = vsel %vm2015_vm6, %v1999_v38, %v5477_v5  ;;  %v7109_v38 = vld [vmem:[#allocation30_spill] sm:$0xff] }
 0x3ec   :  { %v1977_v6 = vsel %vm1966_vm5, %v7094_v24, %v7093_v47  ;;  %v2098_v55 = vsel %vm828_vm2, %v5736_v57, 0.0  ;;  %v2100_v26 = vsel %vm828_vm2, %v5749_v9, 0.0  ;;  %v5770_v62 = vsel %vm2064_vm7, %v2047_v48, %v7095_v35  ;;  %v7110_v48 = vld [vmem:[#allocation34_spill] sm:$0xff] }
 0x3ed   :  { %v5678_v3 = vpop.permute.xlu1 %1858  ;;  %v2097_v13 = vadd.f32 %v2096_v46, %v2095_v2  ;;  %v2025_v5 = vsel %vm2015_vm6, %v2000_v45, %v7096_v20  ;;  %v1978_v22 = vsel %vm1966_vm5, %v7098_v17, %v7097_v15  ;;  %v2048_v58 = vsel %vm779_vm1, %v2024_v39, %v7099_v1  ;;  %v7107_v2 = vld [vmem:[#allocation38_spill] sm:$0xff]  ;;  %v7111_v39 = vld [vmem:[#allocation43_spill] sm:$0xff]  ;;  %v7115_v17 = vld [vmem:[#allocation37_spill] sm:$0xff] }
 0x3ee   :  { %v2001_v37 = vsel %vm730_vm0, %v1977_v6, %v7100_v23  ;;  %v2049_v29 = vsel %vm779_vm1, %v2025_v5, %v7101_v18  ;;  %v2002_v51 = vsel %vm730_vm0, %v1978_v22, %v7102_v40  ;;  %v5789_v44 = vsel %vm2064_vm7, %v2048_v58, %v7103_v33  ;;  %v7108_v46 = vld [vmem:[#allocation10_spill] sm:$0xff]  ;;  %v7112_v6 = vld [vmem:[#allocation32_spill] sm:$0xff]  ;;  %v7116_v1 = vld [vmem:[#allocation41_spill] sm:$0xff] }
 0x3ef   :  { %v5696_v28 = vpop.permute.xlu0 %1716  ;;  %v2099_v36 = vadd.f32 %v2098_v55, %v2097_v13  ;;  %v2026_v25 = vsel %vm2015_vm6, %v2001_v37, %v7104_v30  ;;  %v1979_v27 = vsel %vm1966_vm5, %v7106_v10, %v7105_v52  ;;  %v2102_v49 = vsel %vm828_vm2, %v5770_v62, 0.0  ;;  %v7113_v55 = vld [vmem:[#allocation36_spill] sm:$0xff]  ;;  %v7119_v40 = vld [vmem:[#allocation11_spill] sm:$0xff]  ;;  %v7121_v52 = vld [vmem:[#allocation49_spill] sm:$0xff] }
 0x3f0   :  { %v1980_v0 = vsel %vm1966_vm5, %v7108_v46, %v7107_v2  ;;  %v5805_v54 = vsel %vm2064_vm7, %v2049_v29, %v7109_v38  ;;  %v2027_v45 = vsel %vm2015_vm6, %v2002_v51, %v7110_v48  ;;  %v2104_v24 = vsel %vm828_vm2, %v5789_v44, 0.0  ;;  %v7117_v37 = vld [vmem:[#allocation44_spill] sm:$0xff]  ;;  %v7118_v29 = vld [vmem:[#allocation45_spill] sm:$0xff]  ;;  %v7124_v48 = vld [vmem:[#allocation47_spill] sm:$0xff] }
 0x3f1   :  { %v5706_v21 = vpop.permute.xlu1 %1788  ;;  %v2101_v31 = vadd.f32 %v2100_v26, %v2099_v36  ;;  %v2004_v47 = vsel %vm730_vm0, %v1980_v0, %v7111_v39  ;;  %v2050_v13 = vsel %vm779_vm1, %v2026_v25, %v7112_v6  ;;  %v2003_v35 = vsel %vm730_vm0, %v1979_v27, %v7113_v55  ;;  %v7114_v26 = vld [vmem:[#allocation39_spill] sm:$0xff]  ;;  %v7120_v30 = vld [vmem:[#allocation40_spill] sm:$0xff] }
 0x3f2   :  { %v2051_v20 = vsel %vm779_vm1, %v2027_v45, %v7114_v26  ;;  %v5823_v22 = vsel %vm2064_vm7, %v2050_v13, %v7115_v17  ;;  %v2028_v58 = vsel %vm2015_vm6, %v2003_v35, %v7116_v1  ;;  %v2106_v23 = vsel %vm828_vm2, %v5805_v54, 0.0  ;;  %v7127_v13 = vld [vmem:[#allocation50_spill] sm:$0xff]  ;;  %v7128_v35 = vld [vmem:[#allocation51_spill] sm:$0xff]  ;;  %v7129_v17 = vld [vmem:[#allocation53_spill] sm:$0xff] }
 0x3f3   :  { %v5725_v8 = vpop.permute.xlu0 %1646  ;;  %v2103_v15 = vadd.f32 %v2102_v49, %v2101_v31  ;;  %v2029_v18 = vsel %vm2015_vm6, %v2004_v47, %v7117_v37  ;;  %v1981_v51 = vsel %vm1966_vm5, %v7119_v40, %v7118_v29  ;;  %v5838_v25 = vsel %vm2064_vm7, %v2051_v20, %v7120_v30  ;;  %v7122_v49 = vld [vmem:[#allocation42_spill] sm:$0xff]  ;;  %v7125_v47 = vld [vmem:[#allocation48_spill] sm:$0xff] }
 0x3f4   :  { %v2053_v10 = vsel %vm779_vm1, %v2029_v18, %v7121_v52  ;;  %v2108_v27 = vsel %vm828_vm2, %v5823_v22, 0.0  ;;  %v2052_v2 = vsel %vm779_vm1, %v2028_v58, %v7122_v49  ;;  %v7123_v31 = vld [vmem:[#allocation46_spill] sm:$0xff]  ;;  %v2110_v39 = vsel %vm828_vm2, %v5838_v25, 0.0  ;;  %v7130_v58 = vld [vmem:[#allocation55_spill] sm:$0xff] }
 0x3f5   :  { %v5732_v42 = vpop.permute.xlu1 %1718  ;;  %v2105_v33 = vadd.f32 %v2104_v24, %v2103_v15  ;;  %v2005_v38 = vsel %vm730_vm0, %v1981_v51, %v7123_v31  ;;  %v5850_v45 = vsel %vm2064_vm7, %v2052_v2, %v7124_v48  ;;  %v7126_v24 = vld [vmem:[#allocation12_spill] sm:$0xff]  ;;  %v5859_v55 = vsel %vm2064_vm7, %v2053_v10, %v7127_v13  ;;  %v7133_v52 = vld [vmem:[#allocation54_spill] sm:$0xff] }
 0x3f6   :  { %v1982_v6 = vsel %vm1966_vm5, %v7126_v24, %v7125_v47  ;;  %v2030_v26 = vsel %vm2015_vm6, %v2005_v38, %v7128_v35  ;;  %v2112_v18 = vsel %vm828_vm2, %v5850_v45, 0.0  ;;  %v2114_v51 = vsel %vm828_vm2, %v5859_v55, 0.0  ;;  %v7134_v2 = vld [vmem:[#allocation56_spill] sm:$0xff] }
 0x3f7   :  { %v5755_v11 = vpop.permute.xlu0 %1930  ;;  %v2107_v0 = vadd.f32 %v2106_v23, %v2105_v33  ;;  %v2006_v1 = vsel %vm730_vm0, %v1982_v6, %v7129_v17  ;;  %v7131_v23 = vld [vmem:[#allocation13_spill] sm:$0xff]  ;;  %v7132_v33 = vld [vmem:[#allocation52_spill] sm:$0xff]  ;;  %v7139_v17 = vld [vmem:[#allocation58_spill] sm:$0xff] }
 0x3f8   :  { %v1983_v37 = vsel %vm1966_vm5, %v7131_v23, %v7130_v58  ;;  %v2054_v30 = vsel %vm779_vm1, %v2030_v26, %v7132_v33  ;;  %v2031_v10 = vsel %vm2015_vm6, %v2006_v1, %v7133_v52  ;;  %v7137_v6 = vld [vmem:[#allocation60_spill] sm:$0xff]  ;;  %v7140_v58 = vld [vmem:[#allocation59_spill] sm:$0xff]  ;;  %v7143_v33 = vld [vmem:[#allocation62_spill] sm:$0xff] }
 0x3f9   :  { %v5764_v12 = vpop.permute.xlu1 %1648  ;;  %v2109_v15 = vadd.f32 %v2108_v27, %v2107_v0  ;;  %v2007_v27 = vsel %vm730_vm0, %v1983_v37, %v5593_v60  ;;  %v5880_v49 = vsel %vm2064_vm7, %v2054_v30, %v5595_v19  ;;  %v7135_v0 = vld [vmem:[#allocation14_spill] sm:$0xff]  ;;  %v7138_v60 = vld [vmem:[#allocation15_spill] sm:$0xff]  ;;  %v7141_v37 = vld [vmem:[#allocation16_spill] sm:$0xff] }
 0x3fa   :  { %v1984_v31 = vsel %vm1966_vm5, %v7135_v0, %v7134_v2  ;;  %v2032_v24 = vsel %vm2015_vm6, %v2007_v27, %v5603_v50  ;;  %v1985_v19 = vsel %vm1966_vm5, %v7138_v60, %v5611_v34  ;;  %v7144_v27 = vld [vmem:[#allocation17_spill] sm:$0xff] }
 0x3fb   :  { %v5785_v43 = vpop.permute.xlu0 %1860  ;;  %v2111_v40 = vadd.f32 %v2110_v39, %v2109_v15  ;;  %v7136_v39 = vld [vmem:[#allocation57_spill] sm:$0xff]  ;;  %v2008_v13 = vsel %vm730_vm0, %v1984_v31, %v7137_v6  ;;  %v2116_v15 = vsel %vm828_vm2, %v5880_v49, 0.0  ;;  %v2056_v23 = vsel %vm779_vm1, %v2032_v24, %v7140_v58 }
 0x3fc   :  { %v2055_v47 = vsel %vm779_vm1, %v2031_v10, %v7136_v39  ;;  %v2033_v50 = vsel %vm2015_vm6, %v2008_v13, %v5609_v41  ;;  %v5911_v30 = vsel %vm2064_vm7, %v2056_v23, %v7143_v33  ;;  %v7146_v60 = vld [vmem:[#allocation25_spill] sm:$0xff] }
 0x3fd   :  { %v5801_v53 = vpop.permute.xlu1 %1932  ;;  %v2113_v48 = vadd.f32 %v2112_v18, %v2111_v40  ;;  %v5898_v1 = vsel %vm2064_vm7, %v2055_v47, %v7139_v17  ;;  %v1986_v18 = vsel %vm1966_vm5, %v7141_v37, %v5625_v7  ;;  %v7142_v40 = vld [vmem:[#allocation61_spill] sm:$0xff]  ;;  %v2057_v52 = vsel %vm779_vm1, %v2033_v50, %v5637_v61 }
 0x3fe   :  { %v2010_v10 = vsel %vm730_vm0, %v1986_v18, %v5696_v28  ;;  %v1987_v7 = vsel %vm1966_vm5, %v7144_v27, %v5725_v8  ;;  %v2118_v31 = vsel %vm828_vm2, %v5898_v1, 0.0  ;;  %v5928_v61 = vsel %vm2064_vm7, %v2057_v52, %v5643_v63 }
 0x3ff   :  { %v5819_v5 = vpop.permute.xlu0 %1790  ;;  %v2115_v26 = vadd.f32 %v2114_v51, %v2113_v48  ;;  %v2009_v51 = vsel %vm730_vm0, %v1985_v19, %v7142_v40  ;;  %v2120_v48 = vsel %vm828_vm2, %v5911_v30, 0.0  ;;  %v2035_v28 = vsel %vm2015_vm6, %v2010_v10, %v5706_v21 }
 0x400   :  { %v2034_v41 = vsel %vm2015_vm6, %v2009_v51, %v5662_v32  ;;  %v7145_v32 = vld [vmem:[#allocation19_spill] sm:$0xff]  ;;  %v2011_v24 = vsel %vm730_vm0, %v1987_v7, %v5732_v42  ;;  %v2059_v6 = vsel %vm779_vm1, %v2035_v28, %v5785_v43  ;;  %v2122_v42 = vsel %vm828_vm2, %v5928_v61, 0.0 }
 0x401   :  { %v5834_v36 = vpop.permute.xlu1 %1862  ;;  %v2117_v0 = vadd.f32 %v2116_v15, %v2115_v26  ;;  %v1988_v39 = vsel %vm1966_vm5, %v7145_v32, %v5764_v12  ;;  %v2058_v47 = vsel %vm779_vm1, %v2034_v41, %v5678_v3  ;;  %v2036_v12 = vsel %vm2015_vm6, %v2011_v24, %v5819_v5  ;;  %v7147_v41 = vld [vmem:[#allocation29_spill] sm:$0xff] }
 0x402   :  { %v5944_v21 = vsel %vm2064_vm7, %v2058_v47, %v5755_v11  ;;  %v5954_v43 = vsel %vm2064_vm7, %v2059_v6, %v5801_v53  ;;  %v2060_v5 = vsel %vm779_vm1, %v2036_v12, %v5834_v36 }
 0x403   :  { %v1721_v46 = vpop.permute.xlu0 %1720  ;;  %v2119_v13 = vadd.f32 %v2118_v31, %v2117_v0  ;;  %v2124_v11 = vsel %vm828_vm2, %v5944_v21, 0.0 }
 0x404   :  { %v2012_v63 = vsel %vm730_vm0, %v1988_v39, %v1721_v46 }
 0x405   :  { %v1793_v20 = vpop.permute.xlu1 %1792  ;;  %v2121_v26 = vadd.f32 %v2120_v48, %v2119_v13 }
 0x406   :  { %v2037_v46 = vsel %vm2015_vm6, %v2012_v63, %v1793_v20  ;;  %v2126_v20 = vsel %vm828_vm2, %v5954_v43, 0.0 }
 0x407   :  { %v1651_v29 = vpop.permute.xlu0 %1650  ;;  %v2123_v58 = vadd.f32 %v2122_v42, %v2121_v26 }
 0x408   :  { %v1989_v19 = vsel %vm1966_vm5, %v7146_v60, %v1651_v29 }
 0x409   :  { %v1723_v38 = vpop.permute.xlu1 %1722  ;;  %v2125_v37 = vadd.f32 %v2124_v11, %v2123_v58 }
 0x40a   :  { %v2013_v29 = vsel %vm730_vm0, %v1989_v19, %v1723_v38 }
 0x40b   :  { %v1935_v35 = vpop.permute.xlu0 %1934  ;;  %v2127_v51 = vadd.f32 %v2126_v20, %v2125_v37 }
 0x40c   :  { %v5964_v23 = vsel %vm2064_vm7, %v2060_v5, %v1935_v35 }
 0x40d   :  { %v1653_v34 = vpop.permute.xlu1 %1652  ;;  %v2128_v36 = vsel %vm828_vm2, %v5964_v23, 0.0 }
 0x40e   :  { %v2129_v10 = vadd.f32 %v2128_v36, %v2127_v51  ;;  %v1990_v27 = vsel %vm1966_vm5, %v7147_v41, %v1653_v34 }
 0x40f   :  { %v1865_v2 = vpop.permute.xlu0 %1864 }
 0x410   :  { %v2061_v17 = vsel %vm779_vm1, %v2037_v46, %v1865_v2 }
 0x411   :  { %v1937_v8 = vpop.permute.xlu1 %1936 }
 0x412   :  { %v5970_v18 = vsel %vm2064_vm7, %v2061_v17, %v1937_v8 }
 0x413   :  { %v1795_v3 = vpop.permute.xlu0 %1794  ;;  %v2130_v52 = vsel %vm828_vm2, %v5970_v18, 0.0 }
 0x414   :  { %v2038_v53 = vsel %vm2015_vm6, %v2013_v29, %v1795_v3  ;;  %v2131_v0 = vadd.f32 %v2130_v52, %v2129_v10  ;;  %v7148_v10 = vld [vmem:[#allocation6_spill] sm:$0xff] }
 0x415   :  { %v1867_v15 = vpop.permute.xlu1 %1866 }
 0x416   :  { %v2062_v38 = vsel %vm779_vm1, %v2038_v53, %v1867_v15 }
 0x417   :  { %v1725_v50 = vpop.permute.xlu0 %1724 }
 0x418   :  { %v2014_v7 = vsel %vm730_vm0, %v1990_v27, %v1725_v50 }
 0x419   :  { %v1939_v40 = vpop.permute.xlu1 %1938 }
 0x41a   :  { %v5976_v35 = vsel %vm2064_vm7, %v2062_v38, %v1939_v40 }
 0x41b   :  { %v1797_v33 = vpop.permute.xlu0 %1796  ;;  %v2132_v2 = vsel %vm828_vm2, %v5976_v35, 0.0 }
 0x41c   :  { %v2039_v31 = vsel %vm2015_vm6, %v2014_v7, %v1797_v33  ;;  %v2133_v39 = vadd.f32 %v2132_v2, %v2131_v0 }
 0x41d   :  { %v1941_v28 = vpop.permute.xlu1 %1940 }
 0x41f   :  { %v1869_v48 = vpop.permute.xlu0 %1868 }
 0x420   :  { %v2063_v32 = vsel %vm779_vm1, %v2039_v31, %v1869_v48 }
 0x421   :  { %v5988_v8 = vsel %vm2064_vm7, %v2063_v32, %v1941_v28 }
 0x422   :  { %v2134_v47 = vsel %vm828_vm2, %v5988_v8, 0.0 }
 0x423   :  { %v2135_v34 = vadd.f32 %v2134_v47, %v2133_v39 }
 0x425   :  { %v2136_v24 = vrot.slane %v2135_v34, 4 }
 0x427   :  { %v2137_v6 = vadd.f32 %v2136_v24, %v2135_v34 }
 0x429   :  { %v2138_v63 = vrot.slane %v2137_v6, 2 }
 0x42b   :  { %v2139_v13 = vadd.f32 %v2138_v63, %v2137_v6 }
 0x42d   :  { %v2140_v12 = vrot.slane %v2139_v13, 1 }
 0x42f   :  { %v2141_v60 = vadd.f32 %v2140_v12, %v2139_v13 }
 0x431   :  { %2147 = vrot.lane.b32.xlu1 %v2141_v60, %s3912_s17  ;;  %2143 = vrot.lane.b32.xlu0 %v2141_v60, %s3910_s0 }
 0x435   :  { %2155 = vrot.lane.b32.xlu1 %v2141_v60, %s3913_s1  ;;  %2151 = vrot.lane.b32.xlu0 %v2141_v60, %s3911_s16 }
 0x439   :  { %2159 = vrot.lane.b32.xlu0 %v2141_v60, %s3914_s18 }
 0x4a3   :  { %v2148_v19 = vpop.permute.xlu1 %2147  ;;  %v2144_v3 = vpop.permute.xlu0 %2143 }
 0x4a4   :  { %v2146_v42 = vadd.f32 %v2144_v3, %v2141_v60 }
 0x4a6   :  { %v2150_v26 = vadd.f32 %v2148_v19, %v2146_v42 }
 0x4a7   :  { %v2152_v46 = vpop.permute.xlu0 %2151  ;;  %v2156_v11 = vpop.permute.xlu1 %2155 }
 0x4a8   :  { %v2154_v15 = vadd.f32 %v2152_v46, %v2150_v26 }
 0x4aa   :  { %v2158_v5 = vadd.f32 %v2156_v11, %v2154_v15 }
 0x4ab   :  { %v2160_v29 = vpop.permute.xlu0 %2159 }
 0x4ac   :  { %v2162_v17 = vadd.f32 %v2160_v29, %v2158_v5 }
 0x4ae   :  { %v2163_v58 = vmul.f32 0.00086805556, %v2162_v17 }
 0x4b0   :  { %2168 = vrot.lane.b32.xlu0 %v2163_v58, %s3907_s29  ;;  %2165 = vrot.lane.b32.xlu1 %v2163_v58, %s3915_s19 }
 0x4b4   :  { %2174 = vrot.lane.b32.xlu0 %v2163_v58, %s3906_s28  ;;  %2171 = vrot.lane.b32.xlu1 %v2163_v58, %s3916_s20 }
 0x4b8   :  { %2177 = vrot.lane.b32.xlu1 %v2163_v58, %s3917_s21 }
 0x522   :  { %v2169_v53 = vpop.permute.xlu0 %2168  ;;  %v2166_v50 = vpop.permute.xlu1 %2165 }
 0x523   :  { %v2180_v20 = vsel %vm1966_vm5, %v2163_v58, %v2166_v50 }
 0x524   :  { %v2181_v37 = vsel %vm730_vm0, %v2180_v20, %v2169_v53 }
 0x526   :  { %v2172_v40 = vpop.permute.xlu1 %2171  ;;  %v2175_v36 = vpop.permute.xlu0 %2174 }
 0x527   :  { %v2182_v38 = vsel %vm2015_vm6, %v2181_v37, %v2172_v40 }
 0x528   :  { %v2183_v51 = vsel %vm779_vm1, %v2182_v38, %v2175_v36 }
 0x52a   :  { %v2178_v33 = vpop.permute.xlu1 %2177 }
 0x52b   :  { %v2184_v52 = vsel %vm2064_vm7, %v2183_v51, %v2178_v33 }
 0x52c   :  { %v6008_v41 = vrot.slane %v2184_v52, %v7148_v10 }
 0x52e   :  { %v6012_v27 = vsub.f32 %v5658_v14, %v6008_v41  ;;  %v6016_v7 = vsub.f32 %v5670_v56, %v6008_v41  ;;  %v6020_v2 = vsub.f32 %v5676_v16, %v6008_v41  ;;  %v6024_v0 = vsub.f32 %v5687_v59, %v6008_v41 }
 0x52f   :  { %v6032_v14 = vsub.f32 %v5714_v4, %v6008_v41  ;;  %v6038_v16 = vsub.f32 %v5736_v57, %v6008_v41  ;;  %v6046_v47 = vsub.f32 %v5749_v9, %v6008_v41  ;;  %v6053_v57 = vsub.f32 %v5770_v62, %v6008_v41 }
 0x530   :  { %v2213_v31 = vmul.f32 %v6012_v27, %v6012_v27  ;;  %v2214_v48 = vmul.f32 %v6016_v7, %v6016_v7  ;;  %v2215_v56 = vmul.f32 %v6020_v2, %v6020_v2  ;;  %v2216_v59 = vmul.f32 %v6024_v0, %v6024_v0 }
 0x531   :  { %v2217_v4 = vmul.f32 %v6032_v14, %v6032_v14  ;;  %v2218_v6 = vmul.f32 %v6038_v16, %v6038_v16  ;;  %v6060_v9 = vsub.f32 %v5789_v44, %v6008_v41  ;;  %v2219_v12 = vmul.f32 %v6046_v47, %v6046_v47 }
 0x532   :  { %v2237_v28 = vsel %vm828_vm2, %v2213_v31, 0.0  ;;  %v2238_v32 = vsel %vm828_vm2, %v2214_v48, 0.0  ;;  %v2240_v34 = vsel %vm828_vm2, %v2215_v56, 0.0  ;;  %v2242_v63 = vsel %vm828_vm2, %v2216_v59, 0.0 }
 0x533   :  { %v2239_v39 = vadd.f32 %v2238_v32, %v2237_v28  ;;  %v2244_v60 = vsel %vm828_vm2, %v2217_v4, 0.0  ;;  %v6067_v62 = vsub.f32 %v5805_v54, %v6008_v41  ;;  %v2220_v3 = vmul.f32 %v6053_v57, %v6053_v57 }
 0x534   :  { %v2246_v42 = vsel %vm828_vm2, %v2218_v6, 0.0  ;;  %v6074_v44 = vsub.f32 %v5823_v22, %v6008_v41  ;;  %v2221_v46 = vmul.f32 %v6060_v9, %v6060_v9  ;;  %v2248_v15 = vsel %vm828_vm2, %v2219_v12, 0.0 }
 0x535   :  { %v2241_v24 = vadd.f32 %v2240_v34, %v2239_v39  ;;  %v6081_v54 = vsub.f32 %v5838_v25, %v6008_v41  ;;  %v2222_v5 = vmul.f32 %v6067_v62, %v6067_v62  ;;  %v2250_v29 = vsel %vm828_vm2, %v2220_v3, 0.0 }
 0x536   :  { %v6088_v22 = vsub.f32 %v5850_v45, %v6008_v41  ;;  %v2223_v58 = vmul.f32 %v6074_v44, %v6074_v44  ;;  %v2252_v53 = vsel %vm828_vm2, %v2221_v46, 0.0  ;;  %v6095_v25 = vsub.f32 %v5859_v55, %v6008_v41 }
 0x537   :  { %v2243_v13 = vadd.f32 %v2242_v63, %v2241_v24  ;;  %v2224_v20 = vmul.f32 %v6081_v54, %v6081_v54  ;;  %v2254_v37 = vsel %vm828_vm2, %v2222_v5, 0.0  ;;  %v6102_v45 = vsub.f32 %v5880_v49, %v6008_v41 }
 0x538   :  { %v2225_v36 = vmul.f32 %v6088_v22, %v6088_v22  ;;  %v2256_v38 = vsel %vm828_vm2, %v2223_v58, 0.0  ;;  %v6109_v55 = vsub.f32 %v5898_v1, %v6008_v41  ;;  %v2226_v33 = vmul.f32 %v6095_v25, %v6095_v25 }
 0x539   :  { %v2245_v19 = vadd.f32 %v2244_v60, %v2243_v13  ;;  %v2258_v52 = vsel %vm828_vm2, %v2224_v20, 0.0  ;;  %v6116_v49 = vsub.f32 %v5911_v30, %v6008_v41  ;;  %v2227_v48 = vmul.f32 %v6102_v45, %v6102_v45 }
 0x53a   :  { %v2260_v56 = vsel %vm828_vm2, %v2225_v36, 0.0  ;;  %v6123_v1 = vsub.f32 %v5928_v61, %v6008_v41  ;;  %v2228_v28 = vmul.f32 %v6109_v55, %v6109_v55  ;;  %v2262_v32 = vsel %vm828_vm2, %v2226_v33, 0.0 }
 0x53b   :  { %v2247_v26 = vadd.f32 %v2246_v42, %v2245_v19  ;;  %v6130_v30 = vsub.f32 %v5944_v21, %v6008_v41  ;;  %v2229_v4 = vmul.f32 %v6116_v49, %v6116_v49  ;;  %v2264_v34 = vsel %vm828_vm2, %v2227_v48, 0.0 }
 0x53c   :  { %v6137_v61 = vsub.f32 %v5954_v43, %v6008_v41  ;;  %v2230_v6 = vmul.f32 %v6123_v1, %v6123_v1  ;;  %v2266_v63 = vsel %vm828_vm2, %v2228_v28, 0.0  ;;  %v6144_v21 = vsub.f32 %v5964_v23, %v6008_v41 }
 0x53d   :  { %v2249_v11 = vadd.f32 %v2248_v15, %v2247_v26  ;;  %v2231_v12 = vmul.f32 %v6130_v30, %v6130_v30  ;;  %v2268_v60 = vsel %vm828_vm2, %v2229_v4, 0.0  ;;  %v6151_v43 = vsub.f32 %v5970_v18, %v6008_v41 }
 0x53e   :  { %v2232_v3 = vmul.f32 %v6137_v61, %v6137_v61  ;;  %v2270_v42 = vsel %vm828_vm2, %v2230_v6, 0.0  ;;  %v6158_v23 = vsub.f32 %v5976_v35, %v6008_v41  ;;  %v2233_v46 = vmul.f32 %v6144_v21, %v6144_v21 }
 0x53f   :  { %v2251_v17 = vadd.f32 %v2250_v29, %v2249_v11  ;;  %v2272_v15 = vsel %vm828_vm2, %v2231_v12, 0.0  ;;  %v6165_v18 = vsub.f32 %v5988_v8, %v6008_v41  ;;  %v2234_v5 = vmul.f32 %v6151_v43, %v6151_v43 }
 0x540   :  { %v2274_v29 = vsel %vm828_vm2, %v2232_v3, 0.0  ;;  %v2235_v35 = vmul.f32 %v6158_v23, %v6158_v23  ;;  %v2276_v58 = vsel %vm828_vm2, %v2233_v46, 0.0  ;;  %v3918_v3 = vmov 0.0   ;;  %v2736_v46 = vld [vmem:[%s7010_s2 + $0x60] sm:$0xff] }
 0x541   :  { %v2253_v50 = vadd.f32 %v2252_v53, %v2251_v17  ;;  %v2278_v20 = vsel %vm828_vm2, %v2234_v5, 0.0  ;;  %2802 = vmatprep.subr.mxu1 %v3918_v3  ;;  %v2733_v5 = vld [vmem:[%s7010_s2 + $0x48] sm:$0xff] }
 0x542   :  { %v2280_v8 = vsel %vm828_vm2, %v2235_v35, 0.0  ;;  %v2730_v35 = vld [vmem:[%s7010_s2 + $0x30] sm:$0xff] }
 0x543   :  { %v2255_v40 = vadd.f32 %v2254_v37, %v2253_v50  ;;  %v2236_v50 = vmul.f32 %v6165_v18, %v6165_v18 }
 0x545   :  { %v2257_v51 = vadd.f32 %v2256_v38, %v2255_v40  ;;  %v2282_v40 = vsel %vm828_vm2, %v2236_v50, 0.0  ;;  %v2727_v50 = vld [vmem:[%s7010_s2 + $0x18] sm:$0xff] }
 0x547   :  { %v2259_v31 = vadd.f32 %v2258_v52, %v2257_v51 }
 0x549   :  { %v2261_v59 = vadd.f32 %v2260_v56, %v2259_v31 }
 0x54b   :  { %v2263_v39 = vadd.f32 %v2262_v32, %v2261_v59 }
 0x54d   :  { %v2265_v24 = vadd.f32 %v2264_v34, %v2263_v39 }
 0x54f   :  { %v2267_v13 = vadd.f32 %v2266_v63, %v2265_v24 }
 0x551   :  { %v2269_v19 = vadd.f32 %v2268_v60, %v2267_v13 }
 0x553   :  { %v2271_v26 = vadd.f32 %v2270_v42, %v2269_v19  ;;  %v2739_v19 = vld [vmem:[%s7010_s2 + $0x78] sm:$0xff]  ;;  %v2738_v42 = vld [vmem:[%s7010_s2 + $0x70] sm:$0xff] }
 0x554   :  { %2803 = vmatpush1.msra.mxu1 %v2739_v19  ;;  %v6305_v19 = vld [vmem:[%s7014_s6] sm:$0xff] }
 0x555   :  { %v2273_v11 = vadd.f32 %v2272_v15, %v2271_v26  ;;  %2804 = vmatprep.subr.mxu1 %v3918_v3  ;;  %v2737_v26 = vld [vmem:[%s7010_s2 + $0x68] sm:$0xff]  ;;  %v2735_v15 = vld [vmem:[%s7010_s2 + $0x58] sm:$0xff] }
 0x556   :  { %2805 = vmatpush1.msra.mxu1 %v2738_v42 }
 0x557   :  { %v2275_v17 = vadd.f32 %v2274_v29, %v2273_v11  ;;  %2806 = vmatprep.subr.mxu1 %v3918_v3  ;;  %v2734_v11 = vld [vmem:[%s7010_s2 + $0x50] sm:$0xff]  ;;  %v2732_v29 = vld [vmem:[%s7010_s2 + $0x40] sm:$0xff] }
 0x558   :  { %2807 = vmatpush1.msra.mxu1 %v2737_v26  ;;  %v2740_v26 = vld [vmem:[%s7010_s2 + $0x80] sm:$0xff] }
 0x559   :  { %v2277_v53 = vadd.f32 %v2276_v58, %v2275_v17  ;;  %2808 = vmatprep.subr.mxu1 %v3918_v3  ;;  %v2731_v17 = vld [vmem:[%s7010_s2 + $0x38] sm:$0xff]  ;;  %v2729_v58 = vld [vmem:[%s7010_s2 + $0x28] sm:$0xff] }
 0x55a   :  { %2809 = vmatpush1.msra.mxu1 %v2736_v46 }
 0x55b   :  { %v2279_v37 = vadd.f32 %v2278_v20, %v2277_v53  ;;  %2810 = vmatprep.subr.mxu1 %v3918_v3  ;;  %v2728_v53 = vld [vmem:[%s7010_s2 + $0x20] sm:$0xff]  ;;  %v2726_v20 = vld [vmem:[%s7010_s2 + $0x10] sm:$0xff] }
 0x55c   :  { %2811 = vmatpush1.msra.mxu1 %v2735_v15 }
 0x55d   :  { %v2281_v41 = vadd.f32 %v2280_v8, %v2279_v37  ;;  %2812 = vmatprep.subr.mxu1 %v3918_v3  ;;  %v2725_v37 = vld [vmem:[%s7010_s2 + $0x8] sm:$0xff]  ;;  %v2724_v8 = vld [vmem:[%s7010_s2] sm:$0xff] }
 0x55e   :  { %2813 = vmatpush1.msra.mxu1 %v2734_v11 }
 0x55f   :  { %v2283_v36 = vadd.f32 %v2282_v40, %v2281_v41  ;;  %2814 = vmatprep.subr.mxu1 %v3918_v3  ;;  %v2748_v41 = vld [vmem:[%s7010_s2 + $0xc0] sm:$0xff]  ;;  %v2747_v40 = vld [vmem:[%s7010_s2 + $0xb8] sm:$0xff] }
 0x560   :  { %2815 = vmatpush1.msra.mxu1 %v2733_v5 }
 0x561   :  { %v2284_v38 = vrot.slane %v2283_v36, 4  ;;  %2816 = vmatprep.subr.mxu1 %v3918_v3 }
 0x562   :  { %2817 = vmatpush1.msra.mxu1 %v2732_v29 }
 0x563   :  { %v2285_v51 = vadd.f32 %v2284_v38, %v2283_v36  ;;  %2818 = vmatprep.subr.mxu1 %v3918_v3  ;;  %v2746_v36 = vld [vmem:[%s7010_s2 + $0xb0] sm:$0xff]  ;;  %v2745_v38 = vld [vmem:[%s7010_s2 + $0xa8] sm:$0xff] }
 0x564   :  { %2819 = vmatpush1.msra.mxu1 %v2731_v17 }
 0x565   :  { %v2286_v33 = vrot.slane %v2285_v51, 2  ;;  %2820 = vmatprep.subr.mxu1 %v3918_v3 }
 0x566   :  { %2821 = vmatpush1.msra.mxu1 %v2730_v35 }
 0x567   :  { %v2287_v52 = vadd.f32 %v2286_v33, %v2285_v51  ;;  %2822 = vmatprep.subr.mxu1 %v3918_v3 }
 0x568   :  { %2823 = vmatpush1.msra.mxu1 %v2729_v58 }
 0x569   :  { %v2288_v31 = vrot.slane %v2287_v52, 1  ;;  %2824 = vmatprep.subr.mxu1 %v3918_v3 }
 0x56a   :  { %2825 = vmatpush1.msra.mxu1 %v2728_v53 }
 0x56b   :  { %v2289_v48 = vadd.f32 %v2288_v31, %v2287_v52  ;;  %2826 = vmatprep.subr.mxu1 %v3918_v3  ;;  %v2744_v52 = vld [vmem:[%s7010_s2 + $0xa0] sm:$0xff] }
 0x56c   :  { %2827 = vmatpush1.msra.mxu1 %v2727_v50 }
 0x56d   :  { %2295 = vrot.lane.b32.xlu1 %v2289_v48, %s3912_s17  ;;  %2291 = vrot.lane.b32.xlu0 %v2289_v48, %s3910_s0 }
 0x56e   :  { %2828 = vmatprep.subr.mxu1 %v3918_v3 }
 0x56f   :  { %2829 = vmatpush1.msra.mxu1 %v2726_v20 }
 0x570   :  { %2830 = vmatprep.subr.mxu1 %v3918_v3 }
 0x571   :  { %2303 = vrot.lane.b32.xlu1 %v2289_v48, %s3913_s1  ;;  %2299 = vrot.lane.b32.xlu0 %v2289_v48, %s3911_s16 }
 0x572   :  { %2831 = vmatpush1.msra.mxu1 %v2725_v37 }
 0x573   :  { %2832 = vmatprep.subr.mxu1 %v3918_v3 }
 0x574   :  { %2833 = vmatpush1.msra.mxu1 %v2724_v8 }
 0x575   :  { %2307 = vrot.lane.b32.xlu0 %v2289_v48, %s3914_s18  ;;  %2848 = vmatprep.subr.mxu1 %v3918_v3 }
 0x576   :  { %2849 = vmatpush2.msra.mxu1 %v2748_v41 }
 0x577   :  { %2850 = vmatprep.subr.mxu1 %v3918_v3 }
 0x578   :  { %2851 = vmatpush2.msra.mxu1 %v2747_v40 }
 0x579   :  { %2852 = vmatprep.subr.mxu1 %v3918_v3 }
 0x57a   :  { %2853 = vmatpush2.msra.mxu1 %v2746_v36 }
 0x57b   :  { %2854 = vmatprep.subr.mxu1 %v3918_v3 }
 0x57c   :  { %2855 = vmatpush2.msra.mxu1 %v2745_v38 }
 0x57d   :  { %2856 = vmatprep.subr.mxu1 %v3918_v3 }
 0x57e   :  { %2857 = vmatpush2.msra.mxu1 %v2744_v52 }
 0x57f   :  { %2858 = vmatprep.subr.mxu1 %v3918_v3 }
 0x5df   :  { %v2296_v56 = vpop.permute.xlu1 %2295  ;;  %v2292_v59 = vpop.permute.xlu0 %2291 }
 0x5e0   :  { %v2294_v28 = vadd.f32 %v2292_v59, %v2289_v48  ;;  %v2743_v48 = vld [vmem:[%s7010_s2 + $0x98] sm:$0xff] }
 0x5e1   :  { %2859 = vmatpush2.msra.mxu1 %v2743_v48 }
 0x5e2   :  { %v2298_v32 = vadd.f32 %v2296_v56, %v2294_v28  ;;  %2860 = vmatprep.subr.mxu1 %v3918_v3 }
 0x5e3   :  { %v2300_v39 = vpop.permute.xlu0 %2299  ;;  %v2304_v34 = vpop.permute.xlu1 %2303 }
 0x5e4   :  { %v2302_v4 = vadd.f32 %v2300_v39, %v2298_v32  ;;  %v7149_v39 = vld [vmem:[#allocation5_spill] sm:$0xff] }
 0x5e6   :  { %v2306_v24 = vadd.f32 %v2304_v34, %v2302_v4  ;;  %v2365_v4 = vsub.s32 1, %v7149_v39  ;;  %v2393_v34 = vsub.s32 2, %v7149_v39 }
 0x5e7   :  { %v2308_v6 = vpop.permute.xlu0 %2307 }
 0x5e8   :  { %v2310_v63 = vadd.f32 %v2308_v6, %v2306_v24  ;;  %v2742_v24 = vld [vmem:[%s7010_s2 + $0x90] sm:$0xff]  ;;  %v2741_v6 = vld [vmem:[%s7010_s2 + $0x88] sm:$0xff]  ;;  %v6308_v42 = vrot.slane %v6305_v19, %v2365_v4  ;;  %v6314_v46 = vrot.slane %v6305_v19, %v2393_v34  ;;  %s3919_s2 = smov 80  }
 0x5e9   :  { %2861 = vmatpush2.msra.mxu1 %v2742_v24 }
 0x5ea   :  { %v2311_v13 = vmul.f32 0.00086805556, %v2310_v63  ;;  %2862 = vmatprep.subr.mxu1 %v3918_v3 }
 0x5eb   :  { %2863 = vmatpush2.msra.mxu1 %v2741_v6 }
 0x5ec   :  { %v2312_v12 = vadd.f32 1e-05, %v2311_v13  ;;  %2864 = vmatprep.subr.mxu1 %v3918_v3 }
 0x5ed   :  { %2865 = vmatpush2.msra.mxu1 %v2740_v26 }
 0x5ee   :  { %3872 = vrsqrt.f32 %v2312_v12 }
 0x5fb   :  { %v6183_v60 = vpop.eup %3872 }
 0x5fc   :  { %2318 = vrot.lane.b32.xlu0 %v6183_v60, %s3907_s29  ;;  %2315 = vrot.lane.b32.xlu1 %v6183_v60, %s3915_s19 }
 0x600   :  { %2324 = vrot.lane.b32.xlu0 %v6183_v60, %s3906_s28  ;;  %2321 = vrot.lane.b32.xlu1 %v6183_v60, %s3916_s20 }
 0x604   :  { %2327 = vrot.lane.b32.xlu1 %v6183_v60, %s3917_s21 }
 0x66e   :  { %v2319_v51 = vpop.permute.xlu0 %2318  ;;  %v2316_v33 = vpop.permute.xlu1 %2315 }
 0x66f   :  { %v2330_v31 = vsel %vm1966_vm5, %v6183_v60, %v2316_v33 }
 0x670   :  { %v2331_v56 = vsel %vm730_vm0, %v2330_v31, %v2319_v51 }
 0x672   :  { %v2322_v59 = vpop.permute.xlu1 %2321  ;;  %v2325_v28 = vpop.permute.xlu0 %2324 }
 0x673   :  { %v2332_v32 = vsel %vm2015_vm6, %v2331_v56, %v2322_v59 }
 0x674   :  { %v2333_v63 = vsel %vm779_vm1, %v2332_v32, %v2325_v28 }
 0x676   :  { %v2328_v13 = vpop.permute.xlu1 %2327 }
 0x677   :  { %v2334_v12 = vsel %vm2064_vm7, %v2333_v63, %v2328_v13 }
 0x678   :  { %v6300_v60 = vrot.slane %v2334_v12, %v7148_v10 }
 0x67a   :  { %v2347_v15 = vmul.f32 %v6300_v60, %v6060_v9  ;;  %v2348_v11 = vmul.f32 %v6300_v60, %v6067_v62  ;;  %v2343_v5 = vmul.f32 %v6300_v60, %v6032_v14  ;;  %v2344_v29 = vmul.f32 %v6300_v60, %v6038_v16 }
 0x67b   :  { %v2355_v17 = vmul.f32 %v6300_v60, %v6116_v49  ;;  %v2351_v35 = vmul.f32 %v6300_v60, %v6088_v22  ;;  %v2356_v37 = vmul.f32 %v6300_v60, %v6123_v1  ;;  %v2352_v8 = vmul.f32 %v6300_v60, %v6095_v25 }
 0x67c   :  { %v2375_v58 = vmul.f32 %v6308_v42, %v2347_v15  ;;  %v2376_v9 = vmul.f32 %v6308_v42, %v2348_v11  ;;  %v2371_v53 = vmul.f32 %v6308_v42, %v2343_v5  ;;  %v2372_v62 = vmul.f32 %v6308_v42, %v2344_v29 }
 0x67d   :  { %v2383_v22 = vmul.f32 %v6308_v42, %v2355_v17  ;;  %v2379_v20 = vmul.f32 %v6308_v42, %v2351_v35  ;;  %v2349_v36 = vmul.f32 %v6300_v60, %v6074_v44  ;;  %v2350_v38 = vmul.f32 %v6300_v60, %v6081_v54 }
 0x67e   :  { %v2403_v14 = vadd.f32 %v6314_v46, %v2375_v58  ;;  %v2404_v50 = vadd.f32 %v6314_v46, %v2376_v9  ;;  %v6336_v16 = vadd.f32 %v6314_v46, %v2371_v53  ;;  %v6339_v49 = vadd.f32 %v6314_v46, %v2372_v62 }
 0x67f   :  { %v2345_v51 = vmul.f32 %v6300_v60, %v6046_v47  ;;  %v2346_v1 = vmul.f32 %v6300_v60, %v6053_v57  ;;  %v6366_v25 = vadd.f32 %v6314_v46, %v2383_v22  ;;  %v2407_v44 = vadd.f32 %v6314_v46, %v2379_v20 }
 0x680   :  { %v6347_v41 = vpack.i.bf16 %v2404_v50, %v2403_v14  ;;  %v6351_v40 = vpack.i.bf16 %v6339_v49, %v6336_v16  ;;  %v2384_v54 = vmul.f32 %v6308_v42, %v2356_v37  ;;  %v2380_v33 = vmul.f32 %v6308_v42, %v2352_v8 }
 0x681   :  { %v2377_v47 = vmul.f32 %v6308_v42, %v2349_v36  ;;  %v2378_v57 = vmul.f32 %v6308_v42, %v2350_v38  ;;  %v2373_v52 = vmul.f32 %v6308_v42, %v2345_v51  ;;  %v2374_v31 = vmul.f32 %v6308_v42, %v2346_v1 }
 0x682   :  { %3778 = vrot.lane.b32.xlu1 %v6347_v41, %s3919_s2  ;;  %3773 = vrot.lane.b32.xlu0 %v6351_v40, %s3917_s21  ;;  %v2353_v48 = vmul.f32 %v6300_v60, %v6102_v45  ;;  %v2354_v56 = vmul.f32 %v6300_v60, %v6109_v55  ;;  %v6383_v59 = vadd.f32 %v6314_v46, %v2384_v54 }
 0x683   :  { %v2408_v28 = vadd.f32 %v6314_v46, %v2380_v33  ;;  %v2357_v32 = vmul.f32 %v6300_v60, %v6130_v30  ;;  %v2405_v4 = vadd.f32 %v6314_v46, %v2377_v47  ;;  %v2406_v45 = vadd.f32 %v6314_v46, %v2378_v57 }
 0x684   :  { %v6391_v34 = vadd.f32 %v6314_v46, %v2373_v52  ;;  %v6394_v55 = vadd.f32 %v6314_v46, %v2374_v31  ;;  %v2381_v24 = vmul.f32 %v6308_v42, %v2353_v48  ;;  %v2382_v6 = vmul.f32 %v6308_v42, %v2354_v56 }
 0x685   :  { %v2385_v30 = vmul.f32 %v6308_v42, %v2357_v32  ;;  %v2358_v63 = vmul.f32 %v6300_v60, %v6137_v61  ;;  %v6404_v13 = vpack.i.bf16 %v2406_v45, %v2405_v4  ;;  %v2339_v26 = vmul.f32 %v6300_v60, %v6012_v27 }
 0x686   :  { %2471 = vrot.lane.b32.xlu1 %v6366_v25, %s3906_s28  ;;  %2455 = vrot.lane.b32.xlu0 %v2407_v44, %s3910_s0  ;;  %v6408_v12 = vpack.i.bf16 %v6394_v55, %v6391_v34  ;;  %v2340_v15 = vmul.f32 %v6300_v60, %v6016_v7  ;;  %v2409_v11 = vadd.f32 %v6314_v46, %v2381_v24 }
 0x687   :  { %v2410_v5 = vadd.f32 %v6314_v46, %v2382_v6  ;;  %v2361_v29 = vmul.f32 %v6300_v60, %v6158_v23  ;;  %v2362_v61 = vmul.f32 %v6300_v60, %v6165_v18  ;;  %v6425_v27 = vadd.f32 %v6314_v46, %v2385_v30 }
 0x688   :  { %v2386_v7 = vmul.f32 %v6308_v42, %v2358_v63  ;;  %v2367_v35 = vmul.f32 %v6308_v42, %v2339_v26  ;;  %v2368_v23 = vmul.f32 %v6308_v42, %v2340_v15  ;;  %v3852_v9 = vpack.i.bf16 %v2408_v28, %v2407_v44 }
 0x689   :  { %v2389_v17 = vmul.f32 %v6308_v42, %v2361_v29  ;;  %v2390_v58 = vmul.f32 %v6308_v42, %v2362_v61  ;;  %v3867_v62 = vpack.i.bf16 %v2410_v5, %v2409_v11  ;;  %v2341_v37 = vmul.f32 %v6300_v60, %v6020_v2 }
 0x68a   :  { %2473 = vrot.lane.b32.xlu1 %v6383_v59, %s3906_s28  ;;  %2457 = vrot.lane.b32.xlu0 %v2408_v28, %s3910_s0  ;;  %v2414_v14 = vadd.f32 %v6314_v46, %v2386_v7  ;;  %v6439_v50 = vadd.f32 %v6314_v46, %v2367_v35  ;;  %v6442_v22 = vadd.f32 %v6314_v46, %v2368_v23 }
 0x68b   :  { %v2417_v53 = vadd.f32 %v6314_v46, %v2389_v17  ;;  %v2418_v18 = vadd.f32 %v6314_v46, %v2390_v58  ;;  %v2342_v8 = vmul.f32 %v6300_v60, %v6024_v0  ;;  %v2369_v36 = vmul.f32 %v6308_v42, %v2341_v37 }
 0x68c   :  { %v3792_v20 = vpack.i.bf16 %v6442_v22, %v6439_v50  ;;  %v2359_v1 = vmul.f32 %v6300_v60, %v6144_v21  ;;  %v2360_v54 = vmul.f32 %v6300_v60, %v6151_v43 }
 0x68d   :  { %v2370_v38 = vmul.f32 %v6308_v42, %v2342_v8  ;;  %v6461_v2 = vadd.f32 %v6314_v46, %v2369_v36 }
 0x68e   :  { %3788 = vrot.lane.b32.xlu1 %v6404_v13, %s3919_s2  ;;  %3783 = vrot.lane.b32.xlu0 %v6408_v12, %s3917_s21  ;;  %v2388_v47 = vmul.f32 %v6308_v42, %v2360_v54 }
 0x68f   :  { %v6464_v0 = vadd.f32 %v6314_v46, %v2370_v38 }
 0x690   :  { %v2416_v21 = vadd.f32 %v6314_v46, %v2388_v47 }
 0x691   :  { %v3807_v51 = vpack.i.bf16 %v6464_v0, %v6461_v2 }
 0x692   :  { %2475 = vrot.lane.b32.xlu1 %v6425_v27, %s3906_s28  ;;  %2459 = vrot.lane.b32.xlu0 %v2409_v11, %s3910_s0 }
 0x696   :  { %2477 = vrot.lane.b32.xlu1 %v2414_v14, %s3906_s28  ;;  %2461 = vrot.lane.b32.xlu0 %v2410_v5, %s3910_s0 }
 0x69a   :  { %3798 = vrot.lane.b32.xlu1 %v6351_v40, %s3906_s28  ;;  %3793 = vrot.lane.b32.xlu0 %v3792_v20, %s3910_s0 }
 0x69e   :  { %2540 = vrot.lane.b32.xlu1 %v2407_v44, %s3912_s17  ;;  %3803 = vrot.lane.b32.xlu0 %v6347_v41, %s3920_s27  ;;  %v2387_v44 = vmul.f32 %v6308_v42, %v2359_v1 }
 0x6a0   :  { %v2415_v33 = vadd.f32 %v6314_v46, %v2387_v44 }
 0x6a2   :  { %2542 = vrot.lane.b32.xlu1 %v2408_v28, %s3912_s17  ;;  %2552 = vrot.lane.b32.xlu0 %v6366_v25, %s3916_s20 }
 0x6a6   :  { %3808 = vrot.lane.b32.xlu1 %v3807_v51, %s3910_s0  ;;  %2554 = vrot.lane.b32.xlu0 %v6383_v59, %s3916_s20 }
 0x6aa   :  { %3818 = vrot.lane.b32.xlu1 %v6404_v13, %s3920_s27  ;;  %3813 = vrot.lane.b32.xlu0 %v6408_v12, %s3906_s28 }
 0x6ae   :  { %2556 = vrot.lane.b32.xlu1 %v6425_v27, %s3916_s20  ;;  %2544 = vrot.lane.b32.xlu0 %v2409_v11, %s3912_s17 }
 0x6b2   :  { %2558 = vrot.lane.b32.xlu1 %v2414_v14, %s3916_s20  ;;  %2546 = vrot.lane.b32.xlu0 %v2410_v5, %s3912_s17 }
 0x6b6   :  { %3828 = vrot.lane.b32.xlu1 %v3852_v9, %s3919_s2  ;;  %3823 = vrot.lane.b32.xlu0 %v6347_v41, %s3917_s21 }
 0x6ba   :  { %2620 = vrot.lane.b32.xlu1 %v2415_v33, %s3906_s28  ;;  %2604 = vrot.lane.b32.xlu0 %v6366_v25, %s3910_s0 }
 0x6be   :  { %2622 = vrot.lane.b32.xlu1 %v2416_v21, %s3906_s28  ;;  %2606 = vrot.lane.b32.xlu0 %v6383_v59, %s3910_s0 }
 0x6c2   :  { %3838 = vrot.lane.b32.xlu1 %v3867_v62, %s3919_s2  ;;  %3833 = vrot.lane.b32.xlu0 %v6404_v13, %s3917_s21 }
 0x6c6   :  { %2624 = vrot.lane.b32.xlu1 %v2417_v53, %s3906_s28  ;;  %2608 = vrot.lane.b32.xlu0 %v6425_v27, %s3910_s0 }
 0x6ca   :  { %2626 = vrot.lane.b32.xlu1 %v2418_v18, %s3906_s28  ;;  %2610 = vrot.lane.b32.xlu0 %v2414_v14, %s3910_s0 }
 0x6ce   :  { %3848 = vrot.lane.b32.xlu1 %v6347_v41, %s3906_s28  ;;  %3843 = vrot.lane.b32.xlu0 %v6351_v40, %s3910_s0 }
 0x6d2   :  { %2684 = vrot.lane.b32.xlu1 %v6366_v25, %s3912_s17  ;;  %3853 = vrot.lane.b32.xlu0 %v3852_v9, %s3920_s27 }
 0x6d6   :  { %2686 = vrot.lane.b32.xlu1 %v6383_v59, %s3912_s17  ;;  %2696 = vrot.lane.b32.xlu0 %v2415_v33, %s3916_s20 }
 0x6da   :  { %3858 = vrot.lane.b32.xlu1 %v6408_v12, %s3910_s0  ;;  %2698 = vrot.lane.b32.xlu0 %v2416_v21, %s3916_s20 }
 0x6de   :  { %3868 = vrot.lane.b32.xlu1 %v3867_v62, %s3920_s27  ;;  %3863 = vrot.lane.b32.xlu0 %v6404_v13, %s3906_s28 }
 0x6e2   :  { %2700 = vrot.lane.b32.xlu1 %v2417_v53, %s3916_s20  ;;  %2688 = vrot.lane.b32.xlu0 %v6425_v27, %s3912_s17 }
 0x6e6   :  { %2702 = vrot.lane.b32.xlu1 %v2418_v18, %s3916_s20  ;;  %2690 = vrot.lane.b32.xlu0 %v2414_v14, %s3912_s17 }
 0x6f4   :  { %v3779_v43 = vpop.permute.xlu1 %3778  ;;  %v3774_v60 = vpop.permute.xlu0 %3773 }
 0x6f5   :  { %v3780_v42 = vunpack.i.l.bf16 %v3779_v43  ;;  %v3776_v46 = vunpack.i.h.bf16 %v3774_v60  ;;  %v3775_v41 = vunpack.i.l.bf16 %v3774_v60  ;;  %v3781_v25 = vunpack.i.h.bf16 %v3779_v43 }
 0x6f7   :  { %v2483_v40 = vsel %vm2064_vm7, %v6439_v50, %v3775_v41  ;;  %v2484_v59 = vsel %vm2064_vm7, %v6442_v22, %v3776_v46 }
 0x6f8   :  { %v2472_v57 = vpop.permute.xlu1 %2471  ;;  %v2456_v52 = vpop.permute.xlu0 %2455  ;;  %v2487_v31 = vsel %vm940_vm4, %v2483_v40, %v3780_v42  ;;  %v2488_v4 = vsel %vm940_vm4, %v2484_v59, %v3781_v25 }
 0x6f9   :  { %v2496_v48 = vsel %vm779_vm1, %v2456_v52, %v2472_v57  ;;  %v2492_v56 = vsel %vm2491_vm8, %v2487_v31, %v2456_v52 }
 0x6fa   :  { %3525 = vmatprep.mubr.msk.f32.mxu1 %vm2753_vm9, %v2496_v48 }
 0x6fb   :  { %2867 = vmatmul.mubr.f32.vlgmr.msra.gmra.mxu1 %v2492_v56 }
 0x6fc   :  { %v2474_v28 = vpop.permute.xlu1 %2473  ;;  %v2458_v32 = vpop.permute.xlu0 %2457 }
 0x6fd   :  { %v2497_v45 = vsel %vm779_vm1, %v2458_v32, %v2474_v28  ;;  %v2493_v24 = vsel %vm2491_vm8, %v2488_v4, %v2458_v32 }
 0x6fe   :  { %3526 = vmatprep.mubr.msk.f32.mxu1 %vm2753_vm9, %v2497_v45 }
 0x6ff   :  { %2872 = vmatmul.mubr.f32.gmra.mxu1 %v2493_v24 }
 0x700   :  { %v3789_v6 = vpop.permute.xlu1 %3788  ;;  %v3784_v30 = vpop.permute.xlu0 %3783 }
 0x701   :  { %v3790_v63 = vunpack.i.l.bf16 %v3789_v6  ;;  %v3786_v13 = vunpack.i.h.bf16 %v3784_v30  ;;  %v3785_v12 = vunpack.i.l.bf16 %v3784_v30  ;;  %v3791_v15 = vunpack.i.h.bf16 %v3789_v6 }
 0x703   :  { %v2485_v26 = vsel %vm2064_vm7, %v6461_v2, %v3785_v12  ;;  %v2486_v7 = vsel %vm2064_vm7, %v6464_v0, %v3786_v13 }
 0x704   :  { %v2476_v11 = vpop.permute.xlu1 %2475  ;;  %v2460_v5 = vpop.permute.xlu0 %2459  ;;  %v2489_v29 = vsel %vm940_vm4, %v2485_v26, %v3790_v63  ;;  %v2490_v23 = vsel %vm940_vm4, %v2486_v7, %v3791_v15 }
 0x705   :  { %v2498_v61 = vsel %vm779_vm1, %v2460_v5, %v2476_v11  ;;  %v2494_v27 = vsel %vm2491_vm8, %v2489_v29, %v2460_v5 }
 0x706   :  { %3527 = vmatprep.mubr.msk.f32.mxu1 %vm2753_vm9, %v2498_v61 }
 0x707   :  { %2877 = vmatmul.mubr.f32.gmra.mxu1 %v2494_v27 }
 0x708   :  { %v2478_v17 = vpop.permute.xlu1 %2477  ;;  %v2462_v35 = vpop.permute.xlu0 %2461 }
 0x709   :  { %v2499_v58 = vsel %vm779_vm1, %v2462_v35, %v2478_v17  ;;  %v2495_v9 = vsel %vm2491_vm8, %v2490_v23, %v2462_v35 }
 0x70a   :  { %3528 = vmatprep.mubr.msk.f32.mxu1 %vm2753_vm9, %v2499_v58 }
 0x70b   :  { %2882 = vmatmul.mubr.f32.gmra.mxu1 %v2495_v9 }
 0x70c   :  { %v3799_v53 = vpop.permute.xlu1 %3798  ;;  %v3794_v62 = vpop.permute.xlu0 %3793 }
 0x70d   :  { %v3800_v18 = vunpack.i.l.bf16 %v3799_v53  ;;  %v3795_v14 = vunpack.i.l.bf16 %v3794_v62  ;;  %v3801_v37 = vunpack.i.h.bf16 %v3799_v53  ;;  %v3796_v8 = vunpack.i.h.bf16 %v3794_v62 }
 0x70f   :  { %v2564_v36 = vsel %vm2064_vm7, %v3795_v14, %v3800_v18  ;;  %v2565_v54 = vsel %vm2064_vm7, %v3796_v8, %v3801_v37 }
 0x710   :  { %v2541_v50 = vpop.permute.xlu1 %2540  ;;  %v3804_v22 = vpop.permute.xlu0 %3803 }
 0x711   :  { %v3805_v20 = vunpack.i.l.bf16 %v3804_v22  ;;  %v3806_v38 = vunpack.i.h.bf16 %v3804_v22 }
 0x713   :  { %v2568_v2 = vsel %vm940_vm4, %v2564_v36, %v3805_v20  ;;  %v2569_v33 = vsel %vm940_vm4, %v2565_v54, %v3806_v38 }
 0x714   :  { %v2543_v0 = vpop.permute.xlu1 %2542  ;;  %v2553_v51 = vpop.permute.xlu0 %2552  ;;  %v2572_v44 = vsel %vm2491_vm8, %v2568_v2, %v2541_v50 }
 0x715   :  { %v2576_v1 = vsel %vm779_vm1, %v2541_v50, %v2553_v51  ;;  %v2573_v60 = vsel %vm2491_vm8, %v2569_v33, %v2543_v0 }
 0x716   :  { %3529 = vmatprep.mubr.msk.f32.mxu1 %vm2753_vm9, %v2576_v1 }
 0x717   :  { %2887 = vmatmul.mubr.f32.gmra.mxu1 %v2572_v44 }
 0x718   :  { %v3809_v47 = vpop.permute.xlu1 %3808  ;;  %v2555_v21 = vpop.permute.xlu0 %2554 }
 0x719   :  { %v2577_v43 = vsel %vm779_vm1, %v2543_v0, %v2555_v21  ;;  %v3810_v41 = vunpack.i.l.bf16 %v3809_v47  ;;  %v3811_v52 = vunpack.i.h.bf16 %v3809_v47 }
 0x71a   :  { %3530 = vmatprep.mubr.msk.f32.mxu1 %vm2753_vm9, %v2577_v43 }
 0x71b   :  { %2892 = vmatmul.mubr.f32.gmra.mxu1 %v2573_v60 }
 0x71c   :  { %v3819_v42 = vpop.permute.xlu1 %3818  ;;  %v3814_v46 = vpop.permute.xlu0 %3813 }
 0x71d   :  { %v3820_v40 = vunpack.i.l.bf16 %v3819_v42  ;;  %v3816_v25 = vunpack.i.h.bf16 %v3814_v46  ;;  %v3815_v57 = vunpack.i.l.bf16 %v3814_v46  ;;  %v3821_v48 = vunpack.i.h.bf16 %v3819_v42 }
 0x71f   :  { %v2566_v31 = vsel %vm2064_vm7, %v3810_v41, %v3815_v57  ;;  %v2567_v45 = vsel %vm2064_vm7, %v3811_v52, %v3816_v25 }
 0x720   :  { %v2557_v56 = vpop.permute.xlu1 %2556  ;;  %v2545_v59 = vpop.permute.xlu0 %2544  ;;  %v2570_v28 = vsel %vm940_vm4, %v2566_v31, %v3820_v40  ;;  %v2571_v30 = vsel %vm940_vm4, %v2567_v45, %v3821_v48 }
 0x721   :  { %v2578_v32 = vsel %vm779_vm1, %v2545_v59, %v2557_v56  ;;  %v2574_v4 = vsel %vm2491_vm8, %v2570_v28, %v2545_v59 }
 0x722   :  { %3531 = vmatprep.mubr.msk.f32.mxu1 %vm2753_vm9, %v2578_v32 }
 0x723   :  { %2897 = vmatmul.mubr.f32.gmra.mxu1 %v2574_v4 }
 0x724   :  { %v2559_v24 = vpop.permute.xlu1 %2558  ;;  %v2547_v6 = vpop.permute.xlu0 %2546 }
 0x725   :  { %v2579_v63 = vsel %vm779_vm1, %v2547_v6, %v2559_v24  ;;  %v2575_v13 = vsel %vm2491_vm8, %v2571_v30, %v2547_v6 }
 0x726   :  { %3532 = vmatprep.mubr.msk.f32.mxu1 %vm2753_vm9, %v2579_v63 }
 0x727   :  { %2902 = vmatmul.mubr.f32.gmra.mxu1 %v2575_v13 }
 0x728   :  { %v3829_v12 = vpop.permute.xlu1 %3828  ;;  %v3824_v26 = vpop.permute.xlu0 %3823 }
 0x729   :  { %v3830_v15 = vunpack.i.l.bf16 %v3829_v12  ;;  %v3826_v11 = vunpack.i.h.bf16 %v3824_v26  ;;  %v3825_v5 = vunpack.i.l.bf16 %v3824_v26  ;;  %v3831_v61 = vunpack.i.h.bf16 %v3829_v12 }
 0x72b   :  { %v2632_v29 = vsel %vm2064_vm7, %v6336_v16, %v3825_v5  ;;  %v2633_v58 = vsel %vm2064_vm7, %v6339_v49, %v3826_v11 }
 0x72c   :  { %v2621_v27 = vpop.permute.xlu1 %2620  ;;  %v2605_v7 = vpop.permute.xlu0 %2604  ;;  %v2636_v17 = vsel %vm940_vm4, %v2632_v29, %v3830_v15  ;;  %v2637_v62 = vsel %vm940_vm4, %v2633_v58, %v3831_v61 }
 0x72d   :  { %v2644_v35 = vsel %vm779_vm1, %v2605_v7, %v2621_v27  ;;  %v2640_v23 = vsel %vm2491_vm8, %v2636_v17, %v2605_v7 }
 0x72e   :  { %3533 = vmatprep.mubr.msk.f32.mxu1 %vm2753_vm9, %v2644_v35 }
 0x72f   :  { %2907 = vmatmul.mubr.f32.gmra.mxu1 %v2640_v23 }
 0x730   :  { %v2623_v9 = vpop.permute.xlu1 %2622  ;;  %v2607_v53 = vpop.permute.xlu0 %2606 }
 0x731   :  { %v2645_v16 = vsel %vm779_vm1, %v2607_v53, %v2623_v9  ;;  %v2641_v18 = vsel %vm2491_vm8, %v2637_v62, %v2607_v53 }
 0x732   :  { %3534 = vmatprep.mubr.msk.f32.mxu1 %vm2753_vm9, %v2645_v16 }
 0x733   :  { %2912 = vmatmul.mubr.f32.gmra.mxu1 %v2641_v18 }
 0x734   :  { %v3839_v14 = vpop.permute.xlu1 %3838  ;;  %v3834_v50 = vpop.permute.xlu0 %3833 }
 0x735   :  { %v3840_v22 = vunpack.i.l.bf16 %v3839_v14  ;;  %v3836_v20 = vunpack.i.h.bf16 %v3834_v50  ;;  %v3835_v37 = vunpack.i.l.bf16 %v3834_v50  ;;  %v3841_v8 = vunpack.i.h.bf16 %v3839_v14 }
 0x737   :  { %v2634_v49 = vsel %vm2064_vm7, %v6391_v34, %v3835_v37  ;;  %v2635_v1 = vsel %vm2064_vm7, %v6394_v55, %v3836_v20 }
 0x738   :  { %v2625_v36 = vpop.permute.xlu1 %2624  ;;  %v2609_v38 = vpop.permute.xlu0 %2608  ;;  %v2638_v2 = vsel %vm940_vm4, %v2634_v49, %v3840_v22  ;;  %v2639_v33 = vsel %vm940_vm4, %v2635_v1, %v3841_v8 }
 0x739   :  { %v2646_v0 = vsel %vm779_vm1, %v2609_v38, %v2625_v36  ;;  %v2642_v51 = vsel %vm2491_vm8, %v2638_v2, %v2609_v38 }
 0x73a   :  { %3535 = vmatprep.mubr.msk.f32.mxu1 %vm2753_vm9, %v2646_v0 }
 0x73b   :  { %2917 = vmatmul.mubr.f32.gmra.mxu1 %v2642_v51 }
 0x73c   :  { %v2627_v44 = vpop.permute.xlu1 %2626  ;;  %v2611_v54 = vpop.permute.xlu0 %2610 }
 0x73d   :  { %v2647_v34 = vsel %vm779_vm1, %v2611_v54, %v2627_v44  ;;  %v2643_v47 = vsel %vm2491_vm8, %v2639_v33, %v2611_v54 }
 0x73e   :  { %3536 = vmatprep.mubr.msk.f32.mxu1 %vm2753_vm9, %v2647_v34 }
 0x73f   :  { %2922 = vmatmul.mubr.f32.gmra.mxu1 %v2643_v47 }
 0x740   :  { %v3849_v21 = vpop.permute.xlu1 %3848  ;;  %v3844_v43 = vpop.permute.xlu0 %3843 }
 0x741   :  { %v3850_v60 = vunpack.i.l.bf16 %v3849_v21  ;;  %v3845_v42 = vunpack.i.l.bf16 %v3844_v43  ;;  %v3851_v40 = vunpack.i.h.bf16 %v3849_v21  ;;  %v3846_v25 = vunpack.i.h.bf16 %v3844_v43 }
 0x743   :  { %v2708_v57 = vsel %vm2064_vm7, %v3845_v42, %v3850_v60  ;;  %v2709_v32 = vsel %vm2064_vm7, %v3846_v25, %v3851_v40 }
 0x744   :  { %v2685_v46 = vpop.permute.xlu1 %2684  ;;  %v3854_v55 = vpop.permute.xlu0 %3853 }
 0x745   :  { %v3855_v41 = vunpack.i.l.bf16 %v3854_v55  ;;  %v3856_v52 = vunpack.i.h.bf16 %v3854_v55 }
 0x747   :  { %v2712_v31 = vsel %vm940_vm4, %v2708_v57, %v3855_v41  ;;  %v2713_v4 = vsel %vm940_vm4, %v2709_v32, %v3856_v52  ;;  %v2751_v41 = vsub.s32 3, %v7149_v39 }
 0x748   :  { %v2687_v48 = vpop.permute.xlu1 %2686  ;;  %v2697_v56 = vpop.permute.xlu0 %2696  ;;  %v2716_v28 = vsel %vm2491_vm8, %v2712_v31, %v2685_v46 }
 0x749   :  { %v2720_v59 = vsel %vm779_vm1, %v2685_v46, %v2697_v56  ;;  %v2717_v30 = vsel %vm2491_vm8, %v2713_v4, %v2687_v48  ;;  %v2752_v40 = vrot.slane %v6305_v19, %v2751_v41 }
 0x74a   :  { %3537 = vmatprep.mubr.msk.f32.mxu1 %vm2753_vm9, %v2720_v59 }
 0x74b   :  { %2927 = vmatmul.mubr.f32.gmra.mxu1 %v2716_v28 }
 0x74c   :  { %v3859_v45 = vpop.permute.xlu1 %3858  ;;  %v2699_v24 = vpop.permute.xlu0 %2698 }
 0x74d   :  { %v2721_v6 = vsel %vm779_vm1, %v2687_v48, %v2699_v24  ;;  %v3860_v12 = vunpack.i.l.bf16 %v3859_v45  ;;  %v3861_v5 = vunpack.i.h.bf16 %v3859_v45 }
 0x74e   :  { %3538 = vmatprep.mubr.msk.f32.mxu1 %vm2753_vm9, %v2721_v6 }
 0x74f   :  { %2932 = vmatmul.mubr.f32.gmra.mxu1 %v2717_v30 }
 0x750   :  { %v3869_v63 = vpop.permute.xlu1 %3868  ;;  %v3864_v13 = vpop.permute.xlu0 %3863 }
 0x751   :  { %v3870_v26 = vunpack.i.l.bf16 %v3869_v63  ;;  %v3866_v15 = vunpack.i.h.bf16 %v3864_v13  ;;  %v3865_v11 = vunpack.i.l.bf16 %v3864_v13  ;;  %v3871_v61 = vunpack.i.h.bf16 %v3869_v63 }
 0x753   :  { %v2710_v29 = vsel %vm2064_vm7, %v3860_v12, %v3865_v11  ;;  %v2711_v58 = vsel %vm2064_vm7, %v3861_v5, %v3866_v15 }
 0x754   :  { %v2701_v27 = vpop.permute.xlu1 %2700  ;;  %v2689_v7 = vpop.permute.xlu0 %2688  ;;  %v2714_v17 = vsel %vm940_vm4, %v2710_v29, %v3870_v26  ;;  %v2715_v62 = vsel %vm940_vm4, %v2711_v58, %v3871_v61 }
 0x755   :  { %v2722_v35 = vsel %vm779_vm1, %v2689_v7, %v2701_v27  ;;  %v2718_v23 = vsel %vm2491_vm8, %v2714_v17, %v2689_v7 }
 0x756   :  { %3539 = vmatprep.mubr.msk.f32.mxu1 %vm2753_vm9, %v2722_v35 }
 0x757   :  { %2937 = vmatmul.mubr.f32.gmra.mxu1 %v2718_v23 }
 0x758   :  { %v2703_v9 = vpop.permute.xlu1 %2702  ;;  %v2691_v53 = vpop.permute.xlu0 %2690 }
 0x759   :  { %v2723_v16 = vsel %vm779_vm1, %v2691_v53, %v2703_v9  ;;  %v2719_v18 = vsel %vm2491_vm8, %v2715_v62, %v2691_v53 }
 0x75a   :  { %3540 = vmatprep.mubr.msk.f32.mxu1 %vm2753_vm9, %v2723_v16 }
 0x75b   :  { %2942 = vmatmul.mubr.f32.gmra.mxu1 %v2719_v18 }
 0x7bb   :  { %v2868_v14 = vpop.f32.mrf.mxu1 }
 0x7bc   :  { %v2869_v57 = vadd.f32 %v2868_v14, %v2752_v40 }
 0x7bd   :  { %v2870_v50 = vpop.f32.mrf.mxu1 }
 0x7be   :  { %v2947_v28 = vmax.f32 %v2869_v57, 0.0 }
 0x7bf   :  { %v2873_v22 = vpop.f32.mrf.mxu1 }
 0x7c0   :  { %v2874_v29 = vadd.f32 %v2873_v22, %v2752_v40 }
 0x7c1   :  { %v2875_v20 = vpop.f32.mrf.mxu1 }
 0x7c2   :  { %v2948_v18 = vmax.f32 %v2874_v29, 0.0  ;;  %v3126_v29 = vld [vmem:[%s7011_s3 + $0x68] sm:$0xff] }
 0x7c7   :  { %v2878_v37 = vpop.f32.mrf.mxu1 }
 0x7c8   :  { %v2879_v26 = vadd.f32 %v2878_v37, %v2752_v40 }
 0x7c9   :  { %v2880_v49 = vpop.f32.mrf.mxu1 }
 0x7ca   :  { %v2949_v23 = vmax.f32 %v2879_v26, 0.0  ;;  %v3130_v26 = vld [vmem:[%s7011_s3 + $0x88] sm:$0xff] }
 0x7cb   :  { %v6617_v8 = vpop.f32.mrf.mxu1 }
 0x7cd   :  { %v2885_v36 = vpop.f32.mrf.mxu1 }
 0x7d7   :  { %v2888_v38 = vpop.f32.mrf.mxu1 }
 0x7d8   :  { %v2889_v25 = vadd.f32 %v2888_v38, %v2752_v40 }
 0x7d9   :  { %v2890_v2 = vpop.f32.mrf.mxu1 }
 0x7da   :  { %v2951_v48 = vmax.f32 %v2889_v25, 0.0 }
 0x7db   :  { %v2893_v0 = vpop.f32.mrf.mxu1 }
 0x7dc   :  { %v2963_v24 = vmax.f32 %v2947_v28, %v2951_v48  ;;  %v2894_v15 = vadd.f32 %v2893_v0, %v2752_v40  ;;  %v3143_v48 = vld [vmem:[%s7011_s3 + $0xf0] sm:$0xff]  ;;  %v3140_v28 = vld [vmem:[%s7011_s3 + $0xd8] sm:$0xff] }
 0x7dd   :  { %v2895_v51 = vpop.f32.mrf.mxu1 }
 0x7de   :  { %v2952_v9 = vmax.f32 %v2894_v15, 0.0  ;;  %v3129_v15 = vld [vmem:[%s7011_s3 + $0x80] sm:$0xff] }
 0x7e0   :  { %v2964_v36 = vmax.f32 %v2948_v18, %v2952_v9  ;;  %v3118_v9 = vld [vmem:[%s7011_s3 + $0x28] sm:$0xff] }
 0x7e1   :  { %v3114_v18 = vld [vmem:[%s7011_s3 + $0x8] sm:$0xff] }
 0x7e3   :  { %v2898_v1 = vpop.f32.mrf.mxu1 }
 0x7e4   :  { %v2899_v13 = vadd.f32 %v2898_v1, %v2752_v40 }
 0x7e5   :  { %v2900_v44 = vpop.f32.mrf.mxu1 }
 0x7e6   :  { %v2953_v27 = vmax.f32 %v2899_v13, 0.0  ;;  %v3133_v13 = vld [vmem:[%s7011_s3 + $0xa0] sm:$0xff] }
 0x7e7   :  { %v2903_v54 = vpop.f32.mrf.mxu1 }
 0x7e8   :  { %v2965_v50 = vmax.f32 %v2949_v23, %v2953_v27  ;;  %v2904_v1 = vadd.f32 %v2903_v54, %v2752_v40  ;;  %v3124_v27 = vld [vmem:[%s7011_s3 + $0x58] sm:$0xff] }
 0x7e9   :  { %v2905_v33 = vpop.f32.mrf.mxu1  ;;  %v3120_v23 = vld [vmem:[%s7011_s3 + $0x38] sm:$0xff] }
 0x7ea   :  { %v2884_v33 = vadd.f32 %v6617_v8, %v2752_v40 }
 0x7ef   :  { %v2908_v34 = vpop.f32.mrf.mxu1 }
 0x7f0   :  { %v2909_v52 = vadd.f32 %v2908_v34, %v2752_v40 }
 0x7f1   :  { %v2910_v47 = vpop.f32.mrf.mxu1 }
 0x7f2   :  { %v2955_v32 = vmax.f32 %v2909_v52, 0.0 }
 0x7f3   :  { %v2913_v21 = vpop.f32.mrf.mxu1 }
 0x7f4   :  { %v2914_v11 = vadd.f32 %v2913_v21, %v2752_v40 }
 0x7f5   :  { %v2915_v43 = vpop.f32.mrf.mxu1 }
 0x7f6   :  { %v2956_v53 = vmax.f32 %v2914_v11, 0.0  ;;  %v2954_v43 = vmax.f32 %v2904_v1, 0.0  ;;  %v3128_v11 = vld [vmem:[%s7011_s3 + $0x78] sm:$0xff]  ;;  %v3167_v1 = vld [vmem:[%s7011_s3 + $0x1b0] sm:$0xff] }
 0x7fb   :  { %v2918_v60 = vpop.f32.mrf.mxu1 }
 0x7fc   :  { %v2919_v5 = vadd.f32 %v2918_v60, %v2752_v40 }
 0x7fd   :  { %v2920_v42 = vpop.f32.mrf.mxu1 }
 0x7fe   :  { %v2957_v62 = vmax.f32 %v2919_v5, 0.0  ;;  %v2950_v42 = vmax.f32 %v2884_v33, 0.0  ;;  %v3127_v5 = vld [vmem:[%s7011_s3 + $0x70] sm:$0xff]  ;;  %v3165_v33 = vld [vmem:[%s7011_s3 + $0x1a0] sm:$0xff] }
 0x7ff   :  { %v2923_v46 = vpop.f32.mrf.mxu1 }
 0x800   :  { %v2924_v44 = vadd.f32 %v2923_v46, %v2752_v40  ;;  %v2966_v41 = vmax.f32 %v2950_v42, %v2954_v43  ;;  %v3161_v43 = vld [vmem:[%s7011_s3 + $0x180] sm:$0xff]  ;;  %v3159_v42 = vld [vmem:[%s7011_s3 + $0x170] sm:$0xff] }
 0x801   :  { %v2925_v55 = vpop.f32.mrf.mxu1 }
 0x802   :  { %v2958_v60 = vmax.f32 %v2924_v44, 0.0  ;;  %v3166_v44 = vld [vmem:[%s7011_s3 + $0x1a8] sm:$0xff] }
 0x80b   :  { %v2928_v31 = vpop.f32.mrf.mxu1 }
 0x80c   :  { %v2929_v56 = vadd.f32 %v2928_v31, %v2752_v40  ;;  %v3144_v31 = vld [vmem:[%s7011_s3 + $0xf8] sm:$0xff] }
 0x80d   :  { %v2930_v59 = vpop.f32.mrf.mxu1  ;;  %3185 = vmatprep.subr.mxu1 %v3144_v31  ;;  %v3155_v31 = vld [vmem:[%s7011_s3 + $0x150] sm:$0xff] }
 0x80e   :  { %v2959_v4 = vmax.f32 %v2929_v56, 0.0  ;;  %3186 = vmatpush1.msra.mxu1 %v3143_v48  ;;  %v3142_v56 = vld [vmem:[%s7011_s3 + $0xe8] sm:$0xff]  ;;  %v3141_v59 = vld [vmem:[%s7011_s3 + $0xe0] sm:$0xff] }
 0x80f   :  { %v2933_v45 = vpop.f32.mrf.mxu1  ;;  %3187 = vmatprep.subr.mxu1 %v3142_v56  ;;  %v3286_v48 = vld [vmem:[%s7012_s4 + $0xe0] sm:$0xff]  ;;  %v3154_v56 = vld [vmem:[%s7011_s3 + $0x148] sm:$0xff] }
 0x810   :  { %v2967_v6 = vmax.f32 %v2955_v32, %v2959_v4  ;;  %v2934_v12 = vadd.f32 %v2933_v45, %v2752_v40  ;;  %3188 = vmatpush1.msra.mxu1 %v3141_v59  ;;  %v3139_v32 = vld [vmem:[%s7011_s3 + $0xd0] sm:$0xff]  ;;  %v3138_v4 = vld [vmem:[%s7011_s3 + $0xc8] sm:$0xff]  ;;  %v3137_v45 = vld [vmem:[%s7011_s3 + $0xc0] sm:$0xff] }
 0x811   :  { %v2935_v30 = vpop.f32.mrf.mxu1  ;;  %3189 = vmatprep.subr.mxu1 %v3140_v28  ;;  %v3270_v59 = vld [vmem:[%s7012_s4 + $0x60] sm:$0xff] }
 0x812   :  { %v6621_v63 = vmax.f32 %v2963_v24, %v2967_v6  ;;  %v2960_v7 = vmax.f32 %v2934_v12, 0.0  ;;  %3190 = vmatpush1.msra.mxu1 %v3139_v32  ;;  %v3136_v24 = vld [vmem:[%s7011_s3 + $0xb8] sm:$0xff]  ;;  %v3135_v6 = vld [vmem:[%s7011_s3 + $0xb0] sm:$0xff]  ;;  %v3134_v30 = vld [vmem:[%s7011_s3 + $0xa8] sm:$0xff] }
 0x813   :  { %3191 = vmatprep.subr.mxu1 %v3138_v4  ;;  %v3132_v12 = vld [vmem:[%s7011_s3 + $0x98] sm:$0xff]  ;;  %v3153_v28 = vld [vmem:[%s7011_s3 + $0x140] sm:$0xff] }
 0x814   :  { %v2976_v19 = vrot.slane %v6621_v63, 2  ;;  %v2980_v35 = vrot.slane %v6621_v63, 4  ;;  %v2968_v20 = vmax.f32 %v2956_v53, %v2960_v7  ;;  %v2984_v22 = vrot.slane %v6621_v63, 6  ;;  %3192 = vmatpush1.msra.mxu1 %v3137_v45  ;;  %v3123_v7 = vld [vmem:[%s7011_s3 + $0x50] sm:$0xff]  ;;  %v3117_v53 = vld [vmem:[%s7011_s3 + $0x20] sm:$0xff]  ;;  %v3285_v32 = vld [vmem:[%s7012_s4 + $0xd8] sm:$0xff] }
 0x815   :  { %3193 = vmatprep.subr.mxu1 %v3136_v24  ;;  %v3152_v4 = vld [vmem:[%s7011_s3 + $0x138] sm:$0xff]  ;;  %v3151_v24 = vld [vmem:[%s7011_s3 + $0x130] sm:$0xff] }
 0x816   :  { %2977 = vrot.lane.b32.xlu1 %v2976_v19, %s3907_s29  ;;  %v2972_v2 = vmax.f32 %v2964_v36, %v2968_v20  ;;  %3194 = vmatpush1.msra.mxu1 %v3135_v6  ;;  %v3131_v19 = vld [vmem:[%s7011_s3 + $0x90] sm:$0xff]  ;;  %v3269_v45 = vld [vmem:[%s7012_s4 + $0x58] sm:$0xff] }
 0x817   :  { %v2938_v61 = vpop.f32.mrf.mxu1  ;;  %3195 = vmatprep.subr.mxu1 %v3134_v30  ;;  %v3175_v20 = vld [vmem:[%s7011_s3 + $0x1f0] sm:$0xff]  ;;  %v3150_v30 = vld [vmem:[%s7011_s3 + $0x128] sm:$0xff] }
 0x818   :  { %v2939_v17 = vadd.f32 %v2938_v61, %v2752_v40  ;;  %v2992_v21 = vrot.slane %v2972_v2, 2  ;;  %v2996_v46 = vrot.slane %v2972_v2, 4  ;;  %3196 = vmatpush1.msra.mxu1 %v3133_v13  ;;  %v3125_v61 = vld [vmem:[%s7011_s3 + $0x60] sm:$0xff]  ;;  %v3171_v36 = vld [vmem:[%s7011_s3 + $0x1d0] sm:$0xff] }
 0x819   :  { %v2940_v58 = vpop.f32.mrf.mxu1  ;;  %3197 = vmatprep.subr.mxu1 %v3132_v12  ;;  %v3284_v6 = vld [vmem:[%s7012_s4 + $0xd0] sm:$0xff]  ;;  %v3149_v12 = vld [vmem:[%s7011_s3 + $0x120] sm:$0xff] }
 0x81a   :  { %v2961_v16 = vmax.f32 %v2939_v17, 0.0  ;;  %2981 = vrot.lane.b32.xlu1 %v2980_v35, %s3906_s28  ;;  %3198 = vmatpush1.msra.mxu1 %v3131_v19  ;;  %v3122_v17 = vld [vmem:[%s7011_s3 + $0x48] sm:$0xff]  ;;  %v3121_v35 = vld [vmem:[%s7011_s3 + $0x40] sm:$0xff]  ;;  %v3119_v58 = vld [vmem:[%s7011_s3 + $0x30] sm:$0xff] }
 0x81b   :  { %v2943_v14 = vpop.f32.mrf.mxu1  ;;  %3199 = vmatprep.subr.mxu1 %v3130_v26  ;;  %v3268_v13 = vld [vmem:[%s7012_s4 + $0x50] sm:$0xff]  ;;  %v3283_v19 = vld [vmem:[%s7012_s4 + $0xc8] sm:$0xff]  ;;  %v3148_v26 = vld [vmem:[%s7011_s3 + $0x118] sm:$0xff] }
 0x81c   :  { %v2969_v37 = vmax.f32 %v2957_v62, %v2961_v16  ;;  %v2944_v0 = vadd.f32 %v2943_v14, %v2752_v40  ;;  %v3000_v40 = vrot.slane %v2972_v2, 6  ;;  %3200 = vmatpush1.msra.mxu1 %v3129_v15  ;;  %v3116_v62 = vld [vmem:[%s7011_s3 + $0x18] sm:$0xff]  ;;  %v3115_v16 = vld [vmem:[%s7011_s3 + $0x10] sm:$0xff]  ;;  %v3113_v14 = vld [vmem:[%s7011_s3] sm:$0xff] }
 0x81d   :  { %v2945_v49 = vpop.f32.mrf.mxu1  ;;  %3201 = vmatprep.subr.mxu1 %v3128_v11  ;;  %v3267_v15 = vld [vmem:[%s7012_s4 + $0x48] sm:$0xff]  ;;  %v3147_v11 = vld [vmem:[%s7011_s3 + $0x110] sm:$0xff] }
 0x81e   :  { %v6628_v38 = vmax.f32 %v2965_v50, %v2969_v37  ;;  %2985 = vrot.lane.b32.xlu1 %v2984_v22, %s3908_s15  ;;  %v2962_v34 = vmax.f32 %v2944_v0, 0.0  ;;  %3202 = vmatpush1.msra.mxu1 %v3127_v5  ;;  %v3176_v50 = vld [vmem:[%s7011_s3 + $0x1f8] sm:$0xff]  ;;  %v3174_v37 = vld [vmem:[%s7011_s3 + $0x1e8] sm:$0xff]  ;;  %v3173_v22 = vld [vmem:[%s7011_s3 + $0x1e0] sm:$0xff] }
 0x81f   :  { %3203 = vmatprep.subr.mxu1 %v3126_v29  ;;  %v3172_v49 = vld [vmem:[%s7011_s3 + $0x1d8] sm:$0xff]  ;;  %v3169_v0 = vld [vmem:[%s7011_s3 + $0x1c0] sm:$0xff]  ;;  %v3146_v29 = vld [vmem:[%s7011_s3 + $0x108] sm:$0xff] }
 0x820   :  { %v3005_v51 = vrot.slane %v6628_v38, 2  ;;  %v3009_v47 = vrot.slane %v6628_v38, 4  ;;  %v2970_v55 = vmax.f32 %v2958_v60, %v2962_v34  ;;  %v3013_v54 = vrot.slane %v6628_v38, 6  ;;  %3204 = vmatpush1.msra.mxu1 %v3125_v61  ;;  %v3164_v34 = vld [vmem:[%s7011_s3 + $0x198] sm:$0xff]  ;;  %v3282_v5 = vld [vmem:[%s7012_s4 + $0xc0] sm:$0xff] }
 0x821   :  { %3205 = vmatprep.subr.mxu1 %v3124_v27  ;;  %v3160_v60 = vld [vmem:[%s7011_s3 + $0x178] sm:$0xff]  ;;  %v3266_v61 = vld [vmem:[%s7012_s4 + $0x40] sm:$0xff] }
 0x822   :  { %3006 = vrot.lane.b32.xlu0 %v3005_v51, %s3907_s29  ;;  %2989 = vrot.lane.b32.xlu1 %v2972_v2, %s3909_s26  ;;  %v2974_v8 = vmax.f32 %v2966_v41, %v2970_v55  ;;  %v3170_v2 = vld [vmem:[%s7011_s3 + $0x1c8] sm:$0xff]  ;;  %v3168_v51 = vld [vmem:[%s7011_s3 + $0x1b8] sm:$0xff] }
 0x823   :  { %3206 = vmatpush1.msra.mxu1 %v3123_v7  ;;  %v3289_v55 = vld [vmem:[%s7012_s4 + $0xf8] sm:$0xff]  ;;  %v3158_v41 = vld [vmem:[%s7011_s3 + $0x168] sm:$0xff]  ;;  %v3145_v27 = vld [vmem:[%s7011_s3 + $0x100] sm:$0xff] }
 0x824   :  { %v3021_v25 = vrot.slane %v2974_v8, 2  ;;  %v3025_v57 = vrot.slane %v2974_v8, 4  ;;  %v3029_v52 = vrot.slane %v2974_v8, 6  ;;  %3207 = vmatprep.subr.mxu1 %v3122_v17  ;;  %3600 = vmatprep.subr.mxu0 %v3289_v55  ;;  %v3281_v7 = vld [vmem:[%s7012_s4 + $0xb8] sm:$0xff] }
 0x825   :  { %3208 = vmatpush1.msra.mxu1 %v3121_v35  ;;  %v3265_v17 = vld [vmem:[%s7012_s4 + $0x38] sm:$0xff]  ;;  %v3280_v35 = vld [vmem:[%s7012_s4 + $0xb0] sm:$0xff] }
 0x826   :  { %3010 = vrot.lane.b32.xlu0 %v3009_v47, %s3906_s28  ;;  %2993 = vrot.lane.b32.xlu1 %v2992_v21, %s3919_s2  ;;  %v3163_v47 = vld [vmem:[%s7011_s3 + $0x190] sm:$0xff]  ;;  %v3162_v21 = vld [vmem:[%s7011_s3 + $0x188] sm:$0xff] }
 0x827   :  { %3209 = vmatprep.subr.mxu1 %v3120_v23  ;;  %v3264_v23 = vld [vmem:[%s7012_s4 + $0x30] sm:$0xff] }
 0x828   :  { %3210 = vmatpush1.msra.mxu1 %v3119_v58  ;;  %v3279_v58 = vld [vmem:[%s7012_s4 + $0xa8] sm:$0xff] }
 0x829   :  { %3211 = vmatprep.subr.mxu1 %v3118_v9  ;;  %v3263_v9 = vld [vmem:[%s7012_s4 + $0x28] sm:$0xff] }
 0x82a   :  { %3014 = vrot.lane.b32.xlu0 %v3013_v54, %s3908_s15  ;;  %2997 = vrot.lane.b32.xlu1 %v2996_v46, %s3913_s1  ;;  %v3273_v54 = vld [vmem:[%s7012_s4 + $0x78] sm:$0xff]  ;;  %v3288_v46 = vld [vmem:[%s7012_s4 + $0xf0] sm:$0xff] }
 0x82b   :  { %3212 = vmatpush1.msra.mxu1 %v3117_v53  ;;  %3601 = vmatpush3.msra.mxu0 %v3273_v54  ;;  %v3278_v53 = vld [vmem:[%s7012_s4 + $0xa0] sm:$0xff] }
 0x82c   :  { %3213 = vmatprep.subr.mxu1 %v3116_v62  ;;  %3602 = vmatprep.subr.mxu0 %v3288_v46  ;;  %v3262_v62 = vld [vmem:[%s7012_s4 + $0x20] sm:$0xff] }
 0x82d   :  { %3214 = vmatpush1.msra.mxu1 %v3115_v16  ;;  %v3277_v16 = vld [vmem:[%s7012_s4 + $0x98] sm:$0xff] }
 0x82e   :  { %3018 = vrot.lane.b32.xlu0 %v2974_v8, %s3909_s26  ;;  %3001 = vrot.lane.b32.xlu1 %v3000_v40, %s3912_s17  ;;  %v3272_v8 = vld [vmem:[%s7012_s4 + $0x70] sm:$0xff]  ;;  %v3157_v40 = vld [vmem:[%s7011_s3 + $0x160] sm:$0xff] }
 0x82f   :  { %3215 = vmatprep.subr.mxu1 %v3114_v18  ;;  %3603 = vmatpush3.msra.mxu0 %v3272_v8  ;;  %v3261_v18 = vld [vmem:[%s7012_s4 + $0x18] sm:$0xff] }
 0x830   :  { %3216 = vmatpush1.msra.mxu1 %v3113_v14  ;;  %v3276_v14 = vld [vmem:[%s7012_s4 + $0x90] sm:$0xff] }
 0x831   :  { %3217 = vmatprep.subr.mxu1 %v3176_v50  ;;  %v3260_v50 = vld [vmem:[%s7012_s4 + $0x10] sm:$0xff] }
 0x832   :  { %3022 = vrot.lane.b32.xlu0 %v3021_v25, %s3919_s2  ;;  %3218 = vmatpush2.msra.mxu1 %v3175_v20  ;;  %v3287_v25 = vld [vmem:[%s7012_s4 + $0xe8] sm:$0xff] }
 0x833   :  { %3219 = vmatprep.subr.mxu1 %v3174_v37  ;;  %3604 = vmatprep.subr.mxu0 %v3287_v25  ;;  %v3275_v20 = vld [vmem:[%s7012_s4 + $0x88] sm:$0xff] }
 0x834   :  { %3220 = vmatpush2.msra.mxu1 %v3173_v22  ;;  %v3259_v37 = vld [vmem:[%s7012_s4 + $0x8] sm:$0xff] }
 0x835   :  { %3221 = vmatprep.subr.mxu1 %v3172_v49 }
 0x836   :  { %3026 = vrot.lane.b32.xlu0 %v3025_v57, %s3913_s1  ;;  %3222 = vmatpush2.msra.mxu1 %v3171_v36  ;;  %v3156_v57 = vld [vmem:[%s7011_s3 + $0x158] sm:$0xff] }
 0x837   :  { %3223 = vmatprep.subr.mxu1 %v3170_v2 }
 0x838   :  { %3224 = vmatpush2.msra.mxu1 %v3169_v0 }
 0x839   :  { %3225 = vmatprep.subr.mxu1 %v3168_v51 }
 0x83a   :  { %3030 = vrot.lane.b32.xlu0 %v3029_v52, %s3912_s17  ;;  %3226 = vmatpush2.msra.mxu1 %v3167_v1  ;;  %v3271_v52 = vld [vmem:[%s7012_s4 + $0x68] sm:$0xff] }
 0x83b   :  { %3227 = vmatprep.subr.mxu1 %v3166_v44  ;;  %3605 = vmatpush3.msra.mxu0 %v3271_v52 }
 0x83c   :  { %3228 = vmatpush2.msra.mxu1 %v3165_v33  ;;  %3606 = vmatprep.subr.mxu0 %v3286_v48 }
 0x83d   :  { %3229 = vmatprep.subr.mxu1 %v3164_v34  ;;  %3607 = vmatpush3.msra.mxu0 %v3270_v59 }
 0x83e   :  { %3230 = vmatpush2.msra.mxu1 %v3163_v47  ;;  %3608 = vmatprep.subr.mxu0 %v3285_v32 }
 0x83f   :  { %3231 = vmatprep.subr.mxu1 %v3162_v21  ;;  %3609 = vmatpush3.msra.mxu0 %v3269_v45 }
 0x840   :  { %3232 = vmatpush2.msra.mxu1 %v3161_v43  ;;  %3610 = vmatprep.subr.mxu0 %v3284_v6 }
 0x841   :  { %3233 = vmatprep.subr.mxu1 %v3160_v60  ;;  %3611 = vmatpush3.msra.mxu0 %v3268_v13 }
 0x842   :  { %3234 = vmatpush2.msra.mxu1 %v3159_v42  ;;  %3612 = vmatprep.subr.mxu0 %v3283_v19 }
 0x843   :  { %3235 = vmatprep.subr.mxu1 %v3158_v41  ;;  %3613 = vmatpush3.msra.mxu0 %v3267_v15 }
 0x844   :  { %3236 = vmatpush2.msra.mxu1 %v3157_v40  ;;  %3614 = vmatprep.subr.mxu0 %v3282_v5 }
 0x845   :  { %3237 = vmatprep.subr.mxu1 %v3156_v57  ;;  %3615 = vmatpush3.msra.mxu0 %v3266_v61 }
 0x846   :  { %3238 = vmatpush2.msra.mxu1 %v3155_v31  ;;  %3616 = vmatprep.subr.mxu0 %v3281_v7 }
 0x847   :  { %3239 = vmatprep.subr.mxu1 %v3154_v56  ;;  %3617 = vmatpush3.msra.mxu0 %v3265_v17 }
 0x848   :  { %3240 = vmatpush2.msra.mxu1 %v3153_v28  ;;  %3618 = vmatprep.subr.mxu0 %v3280_v35 }
 0x849   :  { %3241 = vmatprep.subr.mxu1 %v3152_v4  ;;  %3619 = vmatpush3.msra.mxu0 %v3264_v23 }
 0x84a   :  { %3242 = vmatpush2.msra.mxu1 %v3151_v24  ;;  %3620 = vmatprep.subr.mxu0 %v3279_v58 }
 0x84b   :  { %3243 = vmatprep.subr.mxu1 %v3150_v30  ;;  %3621 = vmatpush3.msra.mxu0 %v3263_v9 }
 0x84c   :  { %3244 = vmatpush2.msra.mxu1 %v3149_v12  ;;  %3622 = vmatprep.subr.mxu0 %v3278_v53 }
 0x84d   :  { %3245 = vmatprep.subr.mxu1 %v3148_v26  ;;  %3623 = vmatpush3.msra.mxu0 %v3262_v62 }
 0x84e   :  { %3246 = vmatpush2.msra.mxu1 %v3147_v11  ;;  %3624 = vmatprep.subr.mxu0 %v3277_v16 }
 0x84f   :  { %3247 = vmatprep.subr.mxu1 %v3146_v29  ;;  %3625 = vmatpush3.msra.mxu0 %v3261_v18 }
 0x850   :  { %3248 = vmatpush2.msra.mxu1 %v3145_v27  ;;  %3626 = vmatprep.subr.mxu0 %v3276_v14 }
 0x851   :  { %3736 = vmatprep.subr.mxu1 %v3918_v3  ;;  %3627 = vmatpush3.msra.mxu0 %v3260_v50 }
 0x852   :  { %3628 = vmatprep.subr.mxu0 %v3275_v20 }
 0x853   :  { %3629 = vmatpush3.msra.mxu0 %v3259_v37 }
 0x888   :  { %v2978_v22 = vpop.permute.xlu1 %2977 }
 0x889   :  { %v3033_v44 = vsel %vm730_vm0, %v6621_v63, %v2978_v22 }
 0x88c   :  { %v2982_v49 = vpop.permute.xlu1 %2981 }
 0x88d   :  { %v3034_v33 = vsel %vm779_vm1, %v3033_v44, %v2982_v49  ;;  %v28_v44 = vld [vmem:[%s7014_s6 + $0x8] sm:$0xff] }
 0x890   :  { %v2986_v36 = vpop.permute.xlu1 %2985 }
 0x891   :  { %v3035_v21 = vsel %vm828_vm2, %v3034_v33, %v2986_v36  ;;  %v3883_v33 = vld [vmem:[%s7014_s6] sm:$0xff] }
 0x894   :  { %v3007_v2 = vpop.permute.xlu0 %3006  ;;  %v2990_v0 = vpop.permute.xlu1 %2989 }
 0x895   :  { %v3036_v43 = vsel %vm877_vm3, %v3035_v21, %v2990_v0  ;;  %v3042_v25 = vsel %vm730_vm0, %v6628_v38, %v3007_v2  ;;  %v3105_v21 = vsub.s32 5, %v7149_v39 }
 0x898   :  { %v3011_v51 = vpop.permute.xlu0 %3010  ;;  %v2994_v1 = vpop.permute.xlu1 %2993 }
 0x899   :  { %v3037_v60 = vsel %vm940_vm4, %v3036_v43, %v2994_v1  ;;  %v3043_v52 = vsel %vm779_vm1, %v3042_v25, %v3011_v51  ;;  %v3095_v51 = vsub.s32 4, %v7149_v39  ;;  %v3258_v25 = vld [vmem:[%s7012_s4] sm:$0xff] }
 0x89b   :  { %v3100_v43 = vrot.slane %v28_v44, %v3095_v51 }
 0x89c   :  { %v3015_v34 = vpop.permute.xlu0 %3014  ;;  %v2998_v47 = vpop.permute.xlu1 %2997 }
 0x89d   :  { %v3039_v42 = vsel %vm3038_vm10, %v3037_v60, %v2998_v47  ;;  %v3044_v48 = vsel %vm828_vm2, %v3043_v52, %v3015_v34  ;;  %v3096_v34 = vrot.slane %v3883_v33, %v3095_v51  ;;  %v3371_v52 = vld [vmem:[%s7013_s5 + $0x30] sm:$0xff] }
 0x8a0   :  { %v3019_v55 = vpop.permute.xlu0 %3018  ;;  %v3002_v54 = vpop.permute.xlu1 %3001 }
 0x8a1   :  { %v3041_v46 = vsel %vm3040_vm11, %v3039_v42, %v3002_v54  ;;  %v3045_v59 = vsel %vm877_vm3, %v3044_v48, %v3019_v55  ;;  %v3110_v55 = vrot.slane %v28_v44, %v3105_v21  ;;  %v3179_v48 = vsub.s32 6, %v7149_v39 }
 0x8a2   :  { %v3050_v63 = vsel %vm3049_vm12, %v3041_v46, 0.0 }
 0x8a3   :  { %v3051_v41 = vrot.slane %v3050_v63, 4 }
 0x8a4   :  { %v3023_v8 = vpop.permute.xlu0 %3022 }
 0x8a5   :  { %v3052_v40 = vadd.f32 %v3051_v41, %v3050_v63  ;;  %v3046_v32 = vsel %vm940_vm4, %v3045_v59, %v3023_v8  ;;  %v3184_v59 = vrot.slane %v28_v44, %v3179_v48 }
 0x8a7   :  { %v3053_v57 = vrot.slane %v3052_v40, 2 }
 0x8a8   :  { %v3027_v31 = vpop.permute.xlu0 %3026 }
 0x8a9   :  { %v3054_v56 = vadd.f32 %v3053_v57, %v3052_v40  ;;  %v3047_v4 = vsel %vm3038_vm10, %v3046_v32, %v3027_v31  ;;  %v3274_v40 = vld [vmem:[%s7012_s4 + $0x80] sm:$0xff]  ;;  %v3372_v57 = vld [vmem:[%s7013_s5 + $0x38] sm:$0xff]  ;;  %v3370_v31 = vld [vmem:[%s7013_s5 + $0x28] sm:$0xff] }
 0x8aa   :  { %3630 = vmatprep.subr.mxu0 %v3274_v40 }
 0x8ab   :  { %v3055_v28 = vrot.slane %v3054_v56, 1  ;;  %3631 = vmatpush3.msra.mxu0 %v3258_v25 }
 0x8ac   :  { %v3031_v45 = vpop.permute.xlu0 %3030 }
 0x8ad   :  { %v3056_v24 = vadd.f32 %v3055_v28, %v3054_v56  ;;  %v3048_v6 = vsel %vm3040_vm11, %v3047_v4, %v3031_v45  ;;  %v3180_v56 = vrot.slane %v3883_v33, %v3179_v48 }
 0x8ae   :  { %v3057_v38 = vsel %vm3049_vm12, %v3048_v6, 0.0 }
 0x8af   :  { %v3065_v30 = vmul.f32 0.5, %v3056_v24  ;;  %v3058_v13 = vrot.slane %v3057_v38, 4 }
 0x8b1   :  { %v3067_v12 = vsub.f32 %v3041_v46, %v3065_v30  ;;  %v3059_v19 = vadd.f32 %v3058_v13, %v3057_v38  ;;  %v3106_v46 = vrot.slane %v3883_v33, %v3105_v21  ;;  %v3369_v38 = vld [vmem:[%s7013_s5 + $0x20] sm:$0xff]  ;;  %v3368_v30 = vld [vmem:[%s7013_s5 + $0x18] sm:$0xff]  ;;  %v3367_v13 = vld [vmem:[%s7013_s5 + $0x10] sm:$0xff] }
 0x8b3   :  { %v3069_v26 = vmul.f32 %v3067_v12, %v3067_v12  ;;  %v3060_v15 = vrot.slane %v3059_v19, 2 }
 0x8b5   :  { %v3071_v11 = vsel %vm3049_vm12, %v3069_v26, 0.0  ;;  %v3061_v5 = vadd.f32 %v3060_v15, %v3059_v19  ;;  %v3365_v19 = vld [vmem:[%s7013_s5] sm:$0xff]  ;;  %v3292_v26 = vsub.s32 7, %v7149_v39 }
 0x8b6   :  { %v3072_v29 = vrot.slane %v3071_v11, 4 }
 0x8b7   :  { %v3062_v61 = vrot.slane %v3061_v5, 1 }
 0x8b8   :  { %v3073_v27 = vadd.f32 %v3072_v29, %v3071_v11  ;;  %v3293_v11 = vrot.slane %v3883_v33, %v3292_v26 }
 0x8b9   :  { %v3063_v7 = vadd.f32 %v3062_v61, %v3061_v5 }
 0x8ba   :  { %v3074_v17 = vrot.slane %v3073_v27, 2 }
 0x8bb   :  { %v3066_v35 = vmul.f32 0.5, %v3063_v7  ;;  %v29_v7 = vld [vmem:[%s7014_s6 + $0x10] sm:$0xff] }
 0x8bc   :  { %v3075_v23 = vadd.f32 %v3074_v17, %v3073_v27  ;;  %v3376_v17 = vrot.slane %v29_v7, %v7148_v10 }
 0x8bd   :  { %v3068_v58 = vsub.f32 %v3048_v6, %v3066_v35 }
 0x8be   :  { %v3076_v9 = vrot.slane %v3075_v23, 1 }
 0x8bf   :  { %v3070_v53 = vmul.f32 %v3068_v58, %v3068_v58 }
 0x8c0   :  { %v3077_v62 = vadd.f32 %v3076_v9, %v3075_v23 }
 0x8c1   :  { %v3078_v16 = vsel %vm3049_vm12, %v3070_v53, 0.0 }
 0x8c2   :  { %v3079_v18 = vrot.slane %v3078_v16, 4  ;;  %v3085_v50 = vmul.f32 0.5, %v3077_v62 }
 0x8c4   :  { %v3080_v14 = vadd.f32 %v3079_v18, %v3078_v16  ;;  %v3087_v22 = vadd.f32 1e-05, %v3085_v50 }
 0x8c6   :  { %v3081_v20 = vrot.slane %v3080_v14, 2  ;;  %3874 = vrsqrt.f32 %v3087_v22 }
 0x8c8   :  { %v3082_v37 = vadd.f32 %v3081_v20, %v3080_v14 }
 0x8ca   :  { %v3083_v49 = vrot.slane %v3082_v37, 1 }
 0x8cc   :  { %v3084_v36 = vadd.f32 %v3083_v49, %v3082_v37 }
 0x8ce   :  { %v3086_v2 = vmul.f32 0.5, %v3084_v36 }
 0x8d0   :  { %v3088_v0 = vadd.f32 1e-05, %v3086_v2 }
 0x8d2   :  { %3876 = vrsqrt.f32 %v3088_v0 }
 0x8d3   :  { %v3875_v1 = vpop.eup %3874 }
 0x8d4   :  { %v3091_v47 = vmul.f32 %v3875_v1, %v3067_v12  ;;  %v3366_v12 = vld [vmem:[%s7013_s5 + $0x8] sm:$0xff]  ;;  %s3922_s5 = smov [#allocation2]  }
 0x8d5   :  { %s3469_s6 = sshll.u32 %s3922_s5, 4  ;;  %s3470_s6 = int_to_ptr.vmem [resolvable:$true] %s3469_s6 }
 0x8d6   :  { %v3101_v54 = vmul.f32 %v3096_v34, %v3091_v47  ;;  %s3884_s0 = scalar_lea.vmem %s3470_s6, 32  ;;  %p3889_p1 = scmp.lt.s32.totalorder %s3470_s6, %s3470_s6 }
 0x8d7   :  { %p3885_p0 = scmp.ne.s32.totalorder %s3470_s6, %s3884_s0  ;;  %p3890_p2 = scmp.lt.s32.totalorder %s3884_s0, %s3884_s0 }
 0x8d8   :  { %v3111_v8 = vadd.f32 %v3106_v46, %v3101_v54 }
 0x8d9   :  { %p3891_p3 = por %p3890_p2, %p3889_p1 }
 0x8db   :  { %p3892_p4 = pnand %p3891_p3, %p3885_p0 }
 0x8df   :  { %v3877_v60 = vpop.eup %3876 }
 0x8e0   :  { %v3092_v42 = vmul.f32 %v3877_v60, %v3068_v58 }
 0x8e2   :  { %v3102_v63 = vmul.f32 %v3100_v43, %v3092_v42 }
 0x8e4   :  { %v3112_v41 = vadd.f32 %v3110_v55, %v3102_v63 }
 0x8e6   :  { %3249 = vmatprep.mubr.f32.mxu1 %v3112_v41 }
 0x8e7   :  { %3250 = vmatmul.mubr.f32.vlgmr.msra.gmra.mxu1 %v3111_v8 }
 0x8e8   :  { %3737 = vmatpush3.msra.mxu1 %v3372_v57  ;;  %3752 = vmatprep.mubr.msk.f32.mxu1 %vm3921_vm13, %v3918_v3 }
 0x8e9   :  { %3738 = vmatprep.subr.mxu1 %v3918_v3 }
 0x8ea   :  { %3739 = vmatpush3.msra.mxu1 %v3371_v52 }
 0x8eb   :  { %3740 = vmatprep.subr.mxu1 %v3918_v3 }
 0x8ec   :  { %3741 = vmatpush3.msra.mxu1 %v3370_v31 }
 0x8ed   :  { %3742 = vmatprep.subr.mxu1 %v3918_v3 }
 0x8ee   :  { %3743 = vmatpush3.msra.mxu1 %v3369_v38 }
 0x8ef   :  { %3744 = vmatprep.subr.mxu1 %v3918_v3 }
 0x8f0   :  { %3745 = vmatpush3.msra.mxu1 %v3368_v30 }
 0x8f1   :  { %3746 = vmatprep.subr.mxu1 %v3918_v3 }
 0x8f2   :  { %3747 = vmatpush3.msra.mxu1 %v3367_v13 }
 0x8f3   :  { %3748 = vmatprep.subr.mxu1 %v3918_v3 }
 0x8f4   :  { %3749 = vmatpush3.msra.mxu1 %v3366_v12 }
 0x8f5   :  { %3750 = vmatprep.subr.mxu1 %v3918_v3 }
 0x8f6   :  { %3751 = vmatpush3.msra.mxu1 %v3365_v19 }
 0x9a7   :  { %v3251_v28 = vpop.f32.mrf.mxu1 }
 0x9a8   :  { %v3252_v32 = vadd.f32 %v3251_v28, %v3180_v56 }
 0x9a9   :  { %v3253_v4 = vpop.f32.mrf.mxu1 }
 0x9aa   :  { %v3254_v45 = vadd.f32 %v3253_v4, %v3184_v59  ;;  %v3256_v6 = vmax.f32 %v3252_v32, 0.0 }
 0x9ac   :  { %v3257_v24 = vmax.f32 %v3254_v45, 0.0 }
 0x9ae   :  { %3358 = vmatprep.mubr.f32.mxu0 %v3257_v24 }
 0x9af   :  { %3359 = vmatmul.mubr.f32.vlgmr.msra.gmra.mxu0 %v3256_v6 }
 0xa6f   :  { %v3632_v15 = vpop.f32.mrf.mxu0 }
 0xa71   :  { %v3633_v5 = vpop.f32.mrf.mxu0 }
 0xa72   :  { %v3634_v29 = vadd.f32 %v3633_v5, %v3632_v15 }
 0xa74   :  { %v3361_v61 = vadd.f32 %v3634_v29, %v3293_v11 }
 0xa76   :  { %v3364_v27 = vmax.f32 %v3361_v61, 0.0 }
 0xa78   :  { %3753 = vmatmul.mubr.msk.f32.vlgmr.msra.gmra.mxu1 %vm877_vm3, %v3364_v27 }
 0xb38   :  { %v3446_v35 = vpop.f32.mrf.mxu1 }
 0xb39   :  { %v3447_v3 = vadd.f32 %v3446_v35, %v3376_v17 }
 0xb3a   :  { %v3754_v23 = vpop.f32.mrf.mxu1 }
 0xb3b   :  { %v3451_v39 = vsel %vm3450_vm14, %v3447_v3, -inf }
 0xb3c   :  { %3452 = vmax.xlane.f32.xlu0 %v3451_v39 }
 0xbc5   :  { %v3453_v58 = vpop.xlane.xlu0 %3452 }
 0xbc6   :  { %v3454_v9 = vsub.f32 %v3447_v3, %v3453_v58 }
 0xbc8   :  { %v3455_v53 = vmul.f32 1.442695, %v3454_v9 }
 0xbca   :  { %3878 = vpow2.f32 %v3455_v53 }
 0xbd7   :  { %v3879_v62 = vpop.eup %3878 }
 0xbd8   :  { %v3457_v16 = vsel %vm3450_vm14, %v3879_v62, 0.0 }
 0xbd9   :  { %3458 = vadd.xlane.f32.xlu1 %v3457_v16 }
 0xc62   :  { %v3459_v18 = vpop.xlane.xlu1 %3458 }
 0xc63   :  { %3880 = vrcp.f32 %v3459_v18 }
 0xc70   :  { %v3881_v10 = vpop.eup %3880 }
 0xc71   :  { %v3461_v14 = vmul.f32 %v3881_v10, %v3879_v62 }
 0xc73   :  { %3462 = vst.msk [vmem:[#allocation2] sm:$0x3] %vm3450_vm14, %v3461_v14 }
 0xc74   :  { %3895 = shalt.err (!%p3892_p4)
}
 0xc75   :  { %3472 = dma.vmem_to_hbm [thread:$0]  %s3470_s6, 32, %s7015_s7, [#allocation3]  }
 0xc76   :  { %3904 = dma.done.wait [#allocation3], 32  }
 0xc77   :  { %3905 = vsyncadd [#allocation3], 4294967264 }
 0xc78   :  { %3476 = vsyncpa [#allocation3], 1 }

</bundles_post_ra>
